<compile_context>
chip_gen: v5e
topology: v5e:2x2
jax: 0.10.0
libtpu: 0.0.40
codegen_flags: <defaults>
</compile_context>

<pallas_src>
import jax
import jax.numpy as jnp
from jax import lax
from jax.experimental import pallas as pl
from jax.experimental.pallas import tpu as pltpu

# ----------------------------- config -------------------------------------
B, T = 2, 8
N_EMBD = 32
N_LAYER = 2
HEAD_SIZE = 16            # args.head_size_a
DIM_ATT = N_EMBD          # defaulted when dim_att == 0
DIM_FFN = N_EMBD * 4      # defaulted when dim_ffn == 0
N_HEAD = DIM_ATT // HEAD_SIZE
VOCAB = 64
EMB_ID = 1
PAD_ID = 0
HEAD_SIZE_DIVISOR = 8
D_MIX = 32                # TIME_MIX_EXTRA_DIM
D_DECAY = 64              # TIME_DECAY_EXTRA_DIM
LN_EPS = 1e-5
GN_EPS = 1e-5 * HEAD_SIZE_DIVISOR ** 2
# head_qk = 0, share_emb = True, dropout = 0.0  -> final proj is x @ emb.weight.T


# --------------------------- Pallas kernels --------------------------------
def _layernorm_kernel(x_ref, g_ref, b_ref, o_ref):
    x = x_ref[...]
    mu = jnp.mean(x, axis=-1, keepdims=True)
    xc = x - mu
    var = jnp.mean(xc * xc, axis=-1, keepdims=True)
    o_ref[...] = xc * lax.rsqrt(var + LN_EPS) * g_ref[...] + b_ref[...]


def _tmix_stage1_kernel(x_ref, shift_ref, ln1w_ref, ln1b_ref, maax_ref,
                        maa5_ref, w1_ref, w2bd_ref, wrkvg_ref, dw1_ref,
                        dw2_ref, tdecay_ref, rkvg_ref, decay_ref):
    """LN1 + token shift + time-mix + fused r/k/v/g projection + decay MLP."""
    x = x_ref[...]                                   # (BT, C)
    C = N_EMBD
    # ---- LayerNorm (ln1) ----
    mu = jnp.mean(x, axis=-1, keepdims=True)
    xc = x - mu
    var = jnp.mean(xc * xc, axis=-1, keepdims=True)
    xln = xc * lax.rsqrt(var + LN_EPS) * ln1w_ref[...] + ln1b_ref[...]
    # ---- token shift (per-batch shift matrix, runs on the MXU) ----
    xx = jnp.dot(shift_ref[...], xln, preferred_element_type=jnp.float32) - xln
    # ---- low-rank data-dependent mix: one matmul + one block-diag matmul ----
    xxx = xln + xx * maax_ref[...]
    t1 = jnp.tanh(jnp.dot(xxx, w1_ref[...], preferred_element_type=jnp.float32))
    mixes = jnp.dot(t1, w2bd_ref[...],
                    preferred_element_type=jnp.float32) + maa5_ref[...]
    xw = xln + xx * mixes[:, 0 * C:1 * C]
    xk = xln + xx * mixes[:, 1 * C:2 * C]
    xv = xln + xx * mixes[:, 2 * C:3 * C]
    xr = xln + xx * mixes[:, 3 * C:4 * C]
    xg = xln + xx * mixes[:, 4 * C:5 * C]
    # ---- fused r|k|v|g projection (block-diag weight), silu on g lanes ----
    xcat = jnp.concatenate([xr, xk, xv, xg], axis=-1)          # (BT, 4C)
    rkvg = jnp.dot(xcat, wrkvg_ref[...], preferred_element_type=jnp.float32)
    lane = lax.broadcasted_iota(jnp.int32, rkvg.shape, 1)
    rkvg = jnp.where(lane >= 3 * DIM_ATT, rkvg * jax.nn.sigmoid(rkvg), rkvg)
    rkvg_ref[...] = rkvg                                       # lane-dense 128
    # ---- time-decay MLP; emit exp(-exp(w)) so WKV loop has no EUP work ----
    ww = jnp.dot(jnp.tanh(jnp.dot(xw, dw1_ref[...],
                                  preferred_element_type=jnp.float32)),
                 dw2_ref[...], preferred_element_type=jnp.float32)
    decay_ref[...] = jnp.exp(-jnp.exp(tdecay_ref[...] + ww))


def _wkv_bi_kernel(rev_ref, r_ref, k_ref, v_ref, d_ref, u_ref, o_ref):
    """Bidirectional WKV6 for one batch element (grid axis = batch).

    rev_ref : (B, T) int32 in SMEM (scalar-prefetched reverse index)
    r/k/v/d : (1, T, H, N) VMEM blocks (d = precomputed exp(-exp(w)))
    u       : (H, N)
    o       : (1, T, H, N) fwd + bwd outputs summed in place
    """
    b = pl.program_id(0)
    H, N = u_ref.shape
    Tt = r_ref.shape[1]
    u = u_ref[...]

    def step(t, state):
        rt = r_ref[0, t]                       # (H, N)
        kt = k_ref[0, t]
        vt = v_ref[0, t]
        dt = d_ref[0, t]                       # decay, already exp(-exp(w))
        kv = kt[:, :, None] * vt[:, None, :]   # (H, N, N)
        y = jnp.sum(rt[:, :, None] * (state + u[:, :, None] * kv), axis=1)
        return y, dt[:, :, None] * state + kv

    def fwd_body(t, state):
        y, new_state = step(t, state)
        o_ref[0, t] = y
        return new_state

    lax.fori_loop(0, Tt, fwd_body, jnp.zeros((H, N, N), jnp.float32))

    def bwd_body(s, state):
        t = rev_ref[b, s]                      # data-dependent time index
        y, new_state = step(t, state)
        o_ref[0, t] = o_ref[0, t] + y
        return new_state

    lax.fori_loop(0, Tt, bwd_body, jnp.zeros((H, N, N), jnp.float32))


def _finalize_cmix_kernel(x_ref, att_ref, rkvg_ref, gavg_ref, gnw_ref, gnb_ref,
                          wout_ref, shift_ref, ln2w_ref, ln2b_ref, maak_ref,
                          maar_ref, wk_ref, wv_ref, wr_ref, o_ref):
    """GroupNorm + gate + output proj + residual, then LN2 + channel-mix FFN."""
    x = x_ref[...]                                    # (BT, C) residual stream
    a = att_ref[...]                                  # (BT, DIM_ATT)
    # ---- GroupNorm(n_head groups) via group-averaging matmul ----
    mu = jnp.dot(a, gavg_ref[...], preferred_element_type=jnp.float32)
    msq = jnp.dot(a * a, gavg_ref[...], preferred_element_type=jnp.float32)
    var = msq - mu * mu
    xn = (a - mu) * lax.rsqrt(var + GN_EPS) * gnw_ref[...] + gnb_ref[...]
    # ---- gate with silu(g) (g is the last 32 lanes of the packed rkvg) ----
    g = rkvg_ref[:, 3 * DIM_ATT:4 * DIM_ATT]
    att_out = jnp.dot(xn * g, wout_ref[...], preferred_element_type=jnp.float32)
    x = x + att_out                                   # attention residual
    # ---- channel mix: LN2 + token shift + relu^2 FFN + sigmoid gate ----
    mu2 = jnp.mean(x, axis=-1, keepdims=True)
    xc = x - mu2
    var2 = jnp.mean(xc * xc, axis=-1, keepdims=True)
    xln = xc * lax.rsqrt(var2 + LN_EPS) * ln2w_ref[...] + ln2b_ref[...]
    xx = jnp.dot(shift_ref[...], xln, preferred_element_type=jnp.float32) - xln
    xk = xln + xx * maak_ref[...]
    xr = xln + xx * maar_ref[...]
    k = jnp.dot(xk, wk_ref[...], preferred_element_type=jnp.float32)
    k = jnp.maximum(k, 0.0)
    k = k * k
    kv = jnp.dot(k, wv_ref[...], preferred_element_type=jnp.float32)
    r = jnp.dot(xr, wr_ref[...], preferred_element_type=jnp.float32)
    o_ref[...] = x + jax.nn.sigmoid(r) * kv           # FFN residual


def _head_kernel(x_ref, lnw_ref, lnb_ref, embT_ref, o_ref):
    x = x_ref[...]
    mu = jnp.mean(x, axis=-1, keepdims=True)
    xc = x - mu
    var = jnp.mean(xc * xc, axis=-1, keepdims=True)
    xn = xc * lax.rsqrt(var + LN_EPS) * lnw_ref[...] + lnb_ref[...]
    o_ref[...] = jnp.dot(xn, embT_ref[...], preferred_element_type=jnp.float32)


# --------------------------- pallas_call wrappers ---------------------------
def _fullspec(shape):
    nd = len(shape)
    return pl.BlockSpec(tuple(shape), lambda *_: (0,) * nd)


def _call_whole(kernel, out_shapes, *args):
    """Single-program (grid=(1,)) whole-array pallas_call helper."""
    in_specs = [_fullspec(a.shape) for a in args]
    if isinstance(out_shapes, list):
        out_shape = tuple(jax.ShapeDtypeStruct(s, jnp.float32) for s in out_shapes)
        out_specs = [_fullspec(s) for s in out_shapes]
    else:
        out_shape = jax.ShapeDtypeStruct(out_shapes, jnp.float32)
        out_specs = _fullspec(out_shapes)
    return pl.pallas_call(kernel, out_shape=out_shape, grid=(1,),
                          in_specs=in_specs, out_specs=out_specs)(*args)


def pallas_layernorm(x2d, gamma, beta):
    return _call_whole(_layernorm_kernel, x2d.shape, x2d, gamma, beta)


def tmix_stage1(x2d, shiftM, p):
    M = x2d.shape[0]
    return _call_whole(
        _tmix_stage1_kernel,
        [(M, 4 * DIM_ATT), (M, DIM_ATT)],
        x2d, shiftM, p['ln1_w'], p['ln1_b'], p['maa_x'], p['maa5'],
        p['w1'], p['w2bd'], p['wrkvg'], p['dw1'], p['dw2'], p['tdecay'])


def pallas_wkv6_bi(rev_idx, r4, k4, v4, d4, u):
    Bb, Tt, H, N = r4.shape
    spec4 = pl.BlockSpec((1, Tt, H, N), lambda b, rev: (b, 0, 0, 0))
    grid_spec = pltpu.PrefetchScalarGridSpec(
        num_scalar_prefetch=1,
        grid=(Bb,),
        in_specs=[spec4, spec4, spec4, spec4,
                  pl.BlockSpec((H, N), lambda b, rev: (0, 0))],
        out_specs=pl.BlockSpec((1, Tt, H, N), lambda b, rev: (b, 0, 0, 0)),
    )
    return pl.pallas_call(
        _wkv_bi_kernel,
        out_shape=jax.ShapeDtypeStruct((Bb, Tt, H, N), jnp.float32),
        grid_spec=grid_spec,
        compiler_params=pltpu.CompilerParams(
            dimension_semantics=("parallel",)),   # batch is independent (2 TCs on v7x)
    )(rev_idx, r4, k4, v4, d4, u)


def finalize_cmix(x2d, att2d, rkvg, shiftM, p):
    return _call_whole(
        _finalize_cmix_kernel, x2d.shape,
        x2d, att2d, rkvg, p['gavg'], p['gnw'], p['gnb'], p['woutT'],
        shiftM, p['ln2_w'], p['ln2_b'], p['ffn_maa_k'], p['ffn_maa_r'],
        p['wkT'], p['wvT'], p['wrT'])


def head_proj(x2d, lnw, lnb, embT):
    M = x2d.shape[0]
    return _call_whole(_head_kernel, (M, VOCAB), x2d, lnw, lnb, embT)


# ------------------------------ forward pass --------------------------------
@jax.jit
def rwkv_encoder_forward(pp, idx):
    Bb, Tt = idx.shape
    # create_mask (computed as in the reference; not applied further — see TODO)
    mask = jnp.where((idx != PAD_ID) & (idx != EMB_ID), 1, 0).astype(jnp.int32)
    # reverse_x_idx
    lens = jnp.sum(mask, axis=1)
    t_range = jnp.arange(Tt)[None, :]
    rev_idx = jnp.where(t_range < lens[:, None], lens[:, None] - 1 - t_range,
                        t_range).astype(jnp.int32)

    x = pp['emb'][idx].astype(jnp.float32)            # embedding lookup
    x2d = x.reshape(Bb * Tt, N_EMBD)                  # drop0 (p=0.0) -> identity
    shiftM = pp['shiftM']

    for lid in range(N_LAYER):
        p = pp['blocks'][lid]
        if lid == 0:
            x2d = pallas_layernorm(x2d, p['ln0_w'], p['ln0_b'])
        # K1: everything up to the recurrence (lane-dense packed rkvg + decay)
        rkvg, decay = tmix_stage1(x2d, shiftM, p)
        r4 = rkvg[:, 0 * DIM_ATT:1 * DIM_ATT].reshape(Bb, Tt, N_HEAD, HEAD_SIZE)
        k4 = rkvg[:, 1 * DIM_ATT:2 * DIM_ATT].reshape(Bb, Tt, N_HEAD, HEAD_SIZE)
        v4 = rkvg[:, 2 * DIM_ATT:3 * DIM_ATT].reshape(Bb, Tt, N_HEAD, HEAD_SIZE)
        d4 = decay.reshape(Bb, Tt, N_HEAD, HEAD_SIZE)
        # K2: both WKV directions in one launch (rev_idx via scalar prefetch)
        att = pallas_wkv6_bi(rev_idx, r4, k4, v4, d4, p['u'])
        # K3: GroupNorm + gate + output proj + residual + LN2 + FFN + residual
        x2d = finalize_cmix(x2d, att.reshape(Bb * Tt, DIM_ATT), rkvg, shiftM, p)

    # ln_out + tied-embedding projection (head_qk == 0, share_emb == True)
    logits = head_proj(x2d, pp['ln_out_w'], pp['ln_out_b'], pp['embT'])
    return logits.reshape(Bb, Tt, VOCAB)


# --------------------------- parameter init --------------------------------
def linear_init(key, out_f, in_f):
    bound = 1.0 / (in_f ** 0.5)
    return jax.random.uniform(key, (out_f, in_f), jnp.float32, -bound, bound)


def build_params(key):
    keys = list(jax.random.split(key, 64))
    ki = iter(keys)
    params = {'emb': jax.random.normal(next(ki), (VOCAB, N_EMBD), jnp.float32)}
    ddd = (jnp.arange(N_EMBD, dtype=jnp.float32) / N_EMBD)[None, None, :]
    n = jnp.arange(DIM_ATT, dtype=jnp.float32)
    blocks = []
    for lid in range(N_LAYER):
        r1 = 1.0 - lid / N_LAYER
        r0 = lid / (N_LAYER - 1)
        att = {
            'time_maa_x': 1.0 - ddd ** r1,
            'time_maa_w': 1.0 - ddd ** r1,
            'time_maa_k': 1.0 - ddd ** r1,
            'time_maa_v': 1.0 - (ddd ** r1 + 0.3 * r0),
            'time_maa_r': 1.0 - ddd ** (0.5 * r1),
            'time_maa_g': 1.0 - ddd ** (0.5 * r1),
            'time_maa_w1': jax.random.uniform(next(ki), (N_EMBD, D_MIX * 5), jnp.float32, -1e-4, 1e-4),
            'time_maa_w2': jax.random.uniform(next(ki), (5, D_MIX, N_EMBD), jnp.float32, -1e-4, 1e-4),
            'time_decay_w1': jax.random.uniform(next(ki), (N_EMBD, D_DECAY), jnp.float32, -1e-4, 1e-4),
            'time_decay_w2': jax.random.uniform(next(ki), (D_DECAY, DIM_ATT), jnp.float32, -1e-4, 1e-4),
            'time_decay': (-6.0 + 5.0 * (n / (DIM_ATT - 1)) ** (0.7 + 1.3 * r0))[None, None, :],
            'time_faaaa': (r0 * (1.0 - n / (DIM_ATT - 1))
                           + ((n + 1) % 3 - 1) * 0.1).reshape(N_HEAD, HEAD_SIZE),
            'receptance': linear_init(next(ki), DIM_ATT, N_EMBD),
            'key': linear_init(next(ki), DIM_ATT, N_EMBD),
            'value': linear_init(next(ki), DIM_ATT, N_EMBD),
            'gate': linear_init(next(ki), DIM_ATT, N_EMBD),
            'output': linear_init(next(ki), N_EMBD, DIM_ATT),
            'ln_x_w': jnp.ones((DIM_ATT,), jnp.float32),
            'ln_x_b': jnp.zeros((DIM_ATT,), jnp.float32),
        }
        ffn = {
            'time_maa_k': 1.0 - ddd ** r1,
            'time_maa_r': 1.0 - ddd ** r1,
            'key': linear_init(next(ki), DIM_FFN, N_EMBD),
            'receptance': linear_init(next(ki), N_EMBD, N_EMBD),
            'value': linear_init(next(ki), N_EMBD, DIM_FFN),
        }
        blk = {'att': att, 'ffn': ffn,
               'ln1_w': jnp.ones((N_EMBD,), jnp.float32), 'ln1_b': jnp.zeros((N_EMBD,), jnp.float32),
               'ln2_w': jnp.ones((N_EMBD,), jnp.float32), 'ln2_b': jnp.zeros((N_EMBD,), jnp.float32)}
        if lid == 0:
            blk['ln0_w'] = jnp.ones((N_EMBD,), jnp.float32)
            blk['ln0_b'] = jnp.zeros((N_EMBD,), jnp.float32)
        blocks.append(blk)
    params['blocks'] = blocks
    params['ln_out_w'] = jnp.ones((N_EMBD,), jnp.float32)
    params['ln_out_b'] = jnp.zeros((N_EMBD,), jnp.float32)
    return params


def _block_diag(mats):
    rows = sum(m.shape[0] for m in mats)
    cols = sum(m.shape[1] for m in mats)
    out = jnp.zeros((rows, cols), jnp.float32)
    r = c = 0
    for m in mats:
        out = out.at[r:r + m.shape[0], c:c + m.shape[1]].set(m)
        r += m.shape[0]
        c += m.shape[1]
    return out


def prepare_params(params):
    """Fuse / reshape PyTorch-style parameters into the kernel-friendly form."""
    BT = B * T
    ii = jnp.arange(BT)
    # per-batch token-shift matrix for flattened (B*T, C) activations
    shiftM = ((ii[:, None] == ii[None, :] + 1)
              & (ii[:, None] % T != 0)).astype(jnp.float32)
    gidx = jnp.arange(DIM_ATT) // HEAD_SIZE
    gavg = (gidx[:, None] == gidx[None, :]).astype(jnp.float32) / HEAD_SIZE

    pp = {'emb': params['emb'], 'embT': params['emb'].T,
          'ln_out_w': params['ln_out_w'].reshape(1, -1),
          'ln_out_b': params['ln_out_b'].reshape(1, -1),
          'shiftM': shiftM, 'blocks': []}
    for lid in range(N_LAYER):
        blk = params['blocks'][lid]
        att, ffn = blk['att'], blk['ffn']
        p = {
            'ln1_w': blk['ln1_w'].reshape(1, -1), 'ln1_b': blk['ln1_b'].reshape(1, -1),
            'ln2_w': blk['ln2_w'].reshape(1, -1), 'ln2_b': blk['ln2_b'].reshape(1, -1),
            'maa_x': att['time_maa_x'].reshape(1, -1),
            # order (w, k, v, r, g) matches the torch unbind order
            'maa5': jnp.concatenate([att['time_maa_w'], att['time_maa_k'],
                                     att['time_maa_v'], att['time_maa_r'],
                                     att['time_maa_g']], axis=-1).reshape(1, -1),
            'w1': att['time_maa_w1'],
            'w2bd': _block_diag([att['time_maa_w2'][i] for i in range(5)]),
            # fused projection weight, output lanes ordered [r | k | v | g]
            'wrkvg': _block_diag([att['receptance'].T, att['key'].T,
                                  att['value'].T, att['gate'].T]),
            'dw1': att['time_decay_w1'], 'dw2': att['time_decay_w2'],
            'tdecay': att['time_decay'].reshape(1, -1),
            'u': att['time_faaaa'],
            'gavg': gavg,
            'gnw': att['ln_x_w'].reshape(1, -1), 'gnb': att['ln_x_b'].reshape(1, -1),
            'woutT': att['output'].T,
            'ffn_maa_k': ffn['time_maa_k'].reshape(1, -1),
            'ffn_maa_r': ffn['time_maa_r'].reshape(1, -1),
            'wkT': ffn['key'].T, 'wvT': ffn['value'].T, 'wrT': ffn['receptance'].T,
        }
        if lid == 0:
            p['ln0_w'] = blk['ln0_w'].reshape(1, -1)
            p['ln0_b'] = blk['ln0_b'].reshape(1, -1)
        pp['blocks'].append(p)
    return pp


# ------------------------------- main ---------------------------------------
if __name__ == "__main__":
    key = jax.random.PRNGKey(0)
    pkey, ikey = jax.random.split(key)
    params = build_params(pkey)
    prepped = prepare_params(params)

    idx = jax.random.randint(ikey, (B, T), 2, VOCAB)   # ordinary tokens
    idx = idx.at[0, 5].set(EMB_ID)                     # [EMB] token
    idx = idx.at[0, 6:].set(PAD_ID)                    # padding tail
    idx = idx.at[1, 7].set(EMB_ID)
    idx = idx.astype(jnp.int32)

    out = rwkv_encoder_forward(prepped, idx)
    jax.block_until_ready(out)
    assert out.shape == (B, T, VOCAB)
    assert bool(jnp.all(jnp.isfinite(out)))
    print("KERNEL_OK")
</pallas_src>

<mosaic_0001>
module attributes {stable_mosaic.version = 11 : i64} {
  func.func @_layernorm_kernel(%arg0: i32, %arg1: memref<16x32xf32, #tpu.memory_space<vmem>>, %arg2: memref<1x32xf32, #tpu.memory_space<vmem>>, %arg3: memref<1x32xf32, #tpu.memory_space<vmem>>, %arg4: memref<16x32xf32, #tpu.memory_space<vmem>>) attributes {dimension_semantics = [#tpu.dimension_semantics<arbitrary>], iteration_bounds = array<i64: 1>, scalar_prefetch = 0 : i64, scratch_operands = 0 : i64, tpu.core_type = #tpu.core_type<tc>, window_params = [{pipeline_mode = #tpu.pipeline_mode<synchronous>, transform_indices = @transform_0, window_bounds = array<i64: 16, 32>}, {pipeline_mode = #tpu.pipeline_mode<synchronous>, transform_indices = @transform_1, window_bounds = array<i64: 1, 32>}, {pipeline_mode = #tpu.pipeline_mode<synchronous>, transform_indices = @transform_2, window_bounds = array<i64: 1, 32>}, {pipeline_mode = #tpu.pipeline_mode<synchronous>, transform_indices = @transform_3, window_bounds = array<i64: 16, 32>}]} {
    %c0 = arith.constant 0 : index
    %c0_0 = arith.constant 0 : index
    %0 = vector.load %arg1[%c0, %c0_0] : memref<16x32xf32, #tpu.memory_space<vmem>>, vector<16x32xf32>
    %cst = arith.constant dense<0.000000e+00> : vector<16xf32>
    %1 = vector.multi_reduction <add>, %0, %cst [1] : vector<16x32xf32> to vector<16xf32>
    %2 = vector.shape_cast %1 : vector<16xf32> to vector<16x1xf32>
    %cst_1 = arith.constant 3.200000e+01 : f32
    %3 = vector.broadcast %cst_1 : f32 to vector<16x1xf32>
    %4 = arith.divf %2, %3 : vector<16x1xf32>
    %5 = vector.broadcast %4 : vector<16x1xf32> to vector<16x32xf32>
    %6 = arith.subf %0, %5 : vector<16x32xf32>
    %7 = arith.mulf %6, %6 : vector<16x32xf32>
    %cst_2 = arith.constant dense<0.000000e+00> : vector<16xf32>
    %8 = vector.multi_reduction <add>, %7, %cst_2 [1] : vector<16x32xf32> to vector<16xf32>
    %9 = vector.shape_cast %8 : vector<16xf32> to vector<16x1xf32>
    %cst_3 = arith.constant 3.200000e+01 : f32
    %10 = vector.broadcast %cst_3 : f32 to vector<16x1xf32>
    %11 = arith.divf %9, %10 : vector<16x1xf32>
    %cst_4 = arith.constant 9.99999974E-6 : f32
    %12 = vector.broadcast %cst_4 : f32 to vector<16x1xf32>
    %13 = arith.addf %11, %12 : vector<16x1xf32>
    %14 = math.rsqrt %13 : vector<16x1xf32>
    %15 = vector.broadcast %14 : vector<16x1xf32> to vector<16x32xf32>
    %16 = arith.mulf %6, %15 : vector<16x32xf32>
    %c0_5 = arith.constant 0 : index
    %c0_6 = arith.constant 0 : index
    %17 = vector.load %arg2[%c0_5, %c0_6] : memref<1x32xf32, #tpu.memory_space<vmem>>, vector<1x32xf32>
    %18 = vector.broadcast %17 : vector<1x32xf32> to vector<16x32xf32>
    %19 = arith.mulf %16, %18 : vector<16x32xf32>
    %c0_7 = arith.constant 0 : index
    %c0_8 = arith.constant 0 : index
    %20 = vector.load %arg3[%c0_7, %c0_8] : memref<1x32xf32, #tpu.memory_space<vmem>>, vector<1x32xf32>
    %21 = vector.broadcast %20 : vector<1x32xf32> to vector<16x32xf32>
    %22 = arith.addf %19, %21 : vector<16x32xf32>
    %c0_9 = arith.constant 0 : index
    %c0_10 = arith.constant 0 : index
    %23 = vector.load %arg4[%c0_9, %c0_10] : memref<16x32xf32, #tpu.memory_space<vmem>>, vector<16x32xf32>
    tpu.vector_store %arg4[%c0_9, %c0_10], %22 {strides = array<i32>} : memref<16x32xf32, #tpu.memory_space<vmem>>, vector<16x32xf32>,
    return
  }
  func.func @transform_0(%arg0: i32) -> (i32, i32) {
    %c0_i32 = arith.constant 0 : i32
    %c0_i32_0 = arith.constant 0 : i32
    %c0_i32_1 = arith.constant 0 : i32
    return %c0_i32, %c0_i32_0 : i32, i32
  }
  func.func @transform_1(%arg0: i32) -> (i32, i32) {
    %c0_i32 = arith.constant 0 : i32
    %c0_i32_0 = arith.constant 0 : i32
    %c0_i32_1 = arith.constant 0 : i32
    return %c0_i32, %c0_i32_0 : i32, i32
  }
  func.func @transform_2(%arg0: i32) -> (i32, i32) {
    %c0_i32 = arith.constant 0 : i32
    %c0_i32_0 = arith.constant 0 : i32
    %c0_i32_1 = arith.constant 0 : i32
    return %c0_i32, %c0_i32_0 : i32, i32
  }
  func.func @transform_3(%arg0: i32) -> (i32, i32) {
    %c0_i32 = arith.constant 0 : i32
    %c0_i32_0 = arith.constant 0 : i32
    %c0_i32_1 = arith.constant 0 : i32
    return %c0_i32, %c0_i32_0 : i32, i32
  }
}

module attributes {stable_mosaic.version = 11 : i64} {
  func.func @_tmix_stage1_kernel(%arg0: i32, %arg1: memref<16x32xf32, #tpu.memory_space<vmem>>, %arg2: memref<16x16xf32, #tpu.memory_space<vmem>>, %arg3: memref<1x32xf32, #tpu.memory_space<vmem>>, %arg4: memref<1x32xf32, #tpu.memory_space<vmem>>, %arg5: memref<1x32xf32, #tpu.memory_space<vmem>>, %arg6: memref<1x160xf32, #tpu.memory_space<vmem>>, %arg7: memref<32x160xf32, #tpu.memory_space<vmem>>, %arg8: memref<160x160xf32, #tpu.memory_space<vmem>>, %arg9: memref<128x128xf32, #tpu.memory_space<vmem>>, %arg10: memref<32x64xf32, #tpu.memory_space<vmem>>, %arg11: memref<64x32xf32, #tpu.memory_space<vmem>>, %arg12: memref<1x32xf32, #tpu.memory_space<vmem>>, %arg13: memref<16x128xf32, #tpu.memory_space<vmem>>, %arg14: memref<16x32xf32, #tpu.memory_space<vmem>>) attributes {dimension_semantics = [#tpu.dimension_semantics<arbitrary>], iteration_bounds = array<i64: 1>, scalar_prefetch = 0 : i64, scratch_operands = 0 : i64, tpu.core_type = #tpu.core_type<tc>, window_params = [{pipeline_mode = #tpu.pipeline_mode<synchronous>, transform_indices = @transform_0, window_bounds = array<i64: 16, 32>}, {pipeline_mode = #tpu.pipeline_mode<synchronous>, transform_indices = @transform_1, window_bounds = array<i64: 16, 16>}, {pipeline_mode = #tpu.pipeline_mode<synchronous>, transform_indices = @transform_2, window_bounds = array<i64: 1, 32>}, {pipeline_mode = #tpu.pipeline_mode<synchronous>, transform_indices = @transform_3, window_bounds = array<i64: 1, 32>}, {pipeline_mode = #tpu.pipeline_mode<synchronous>, transform_indices = @transform_4, window_bounds = array<i64: 1, 32>}, {pipeline_mode = #tpu.pipeline_mode<synchronous>, transform_indices = @transform_5, window_bounds = array<i64: 1, 160>}, {pipeline_mode = #tpu.pipeline_mode<synchronous>, transform_indices = @transform_6, window_bounds = array<i64: 32, 160>}, {pipeline_mode = #tpu.pipeline_mode<synchronous>, transform_indices = @transform_7, window_bounds = array<i64: 160, 160>}, {pipeline_mode = #tpu.pipeline_mode<synchronous>, transform_indices = @transform_8, window_bounds = array<i64: 128, 128>}, {pipeline_mode = #tpu.pipeline_mode<synchronous>, transform_indices = @transform_9, window_bounds = array<i64: 32, 64>}, {pipeline_mode = #tpu.pipeline_mode<synchronous>, transform_indices = @transform_10, window_bounds = array<i64: 64, 32>}, {pipeline_mode = #tpu.pipeline_mode<synchronous>, transform_indices = @transform_11, window_bounds = array<i64: 1, 32>}, {pipeline_mode = #tpu.pipeline_mode<synchronous>, transform_indices = @transform_12, window_bounds = array<i64: 16, 128>}, {pipeline_mode = #tpu.pipeline_mode<synchronous>, transform_indices = @transform_13, window_bounds = array<i64: 16, 32>}]} {
    %c0 = arith.constant 0 : index
    %c0_0 = arith.constant 0 : index
    %0 = vector.load %arg1[%c0, %c0_0] : memref<16x32xf32, #tpu.memory_space<vmem>>, vector<16x32xf32>
    %cst = arith.constant dense<0.000000e+00> : vector<16xf32>
    %1 = vector.multi_reduction <add>, %0, %cst [1] : vector<16x32xf32> to vector<16xf32>
    %2 = vector.shape_cast %1 : vector<16xf32> to vector<16x1xf32>
    %cst_1 = arith.constant 3.200000e+01 : f32
    %3 = vector.broadcast %cst_1 : f32 to vector<16x1xf32>
    %4 = arith.divf %2, %3 : vector<16x1xf32>
    %5 = vector.broadcast %4 : vector<16x1xf32> to vector<16x32xf32>
    %6 = arith.subf %0, %5 : vector<16x32xf32>
    %7 = arith.mulf %6, %6 : vector<16x32xf32>
    %cst_2 = arith.constant dense<0.000000e+00> : vector<16xf32>
    %8 = vector.multi_reduction <add>, %7, %cst_2 [1] : vector<16x32xf32> to vector<16xf32>
    %9 = vector.shape_cast %8 : vector<16xf32> to vector<16x1xf32>
    %cst_3 = arith.constant 3.200000e+01 : f32
    %10 = vector.broadcast %cst_3 : f32 to vector<16x1xf32>
    %11 = arith.divf %9, %10 : vector<16x1xf32>
    %cst_4 = arith.constant 9.99999974E-6 : f32
    %12 = vector.broadcast %cst_4 : f32 to vector<16x1xf32>
    %13 = arith.addf %11, %12 : vector<16x1xf32>
    %14 = math.rsqrt %13 : vector<16x1xf32>
    %15 = vector.broadcast %14 : vector<16x1xf32> to vector<16x32xf32>
    %16 = arith.mulf %6, %15 : vector<16x32xf32>
    %c0_5 = arith.constant 0 : index
    %c0_6 = arith.constant 0 : index
    %17 = vector.load %arg3[%c0_5, %c0_6] : memref<1x32xf32, #tpu.memory_space<vmem>>, vector<1x32xf32>
    %18 = vector.broadcast %17 : vector<1x32xf32> to vector<16x32xf32>
    %19 = arith.mulf %16, %18 : vector<16x32xf32>
    %c0_7 = arith.constant 0 : index
    %c0_8 = arith.constant 0 : index
    %20 = vector.load %arg4[%c0_7, %c0_8] : memref<1x32xf32, #tpu.memory_space<vmem>>, vector<1x32xf32>
    %21 = vector.broadcast %20 : vector<1x32xf32> to vector<16x32xf32>
    %22 = arith.addf %19, %21 : vector<16x32xf32>
    %c0_9 = arith.constant 0 : index
    %c0_10 = arith.constant 0 : index
    %23 = vector.load %arg2[%c0_9, %c0_10] : memref<16x16xf32, #tpu.memory_space<vmem>>, vector<16x16xf32>
    %cst_11 = arith.constant dense<0.000000e+00> : vector<16x32xf32>
    %24 = tpu.matmul %23, %22, %cst_11 {dimension_numbers = #tpu.dot_dimension_numbers<[1], [0], [0], [1], [0, 0, 1, 1], [], []>} : vector<16x16xf32>, vector<16x32xf32>, vector<16x32xf32> -> vector<16x32xf32>
    %25 = arith.subf %24, %22 : vector<16x32xf32>
    %c0_12 = arith.constant 0 : index
    %c0_13 = arith.constant 0 : index
    %26 = vector.load %arg5[%c0_12, %c0_13] : memref<1x32xf32, #tpu.memory_space<vmem>>, vector<1x32xf32>
    %27 = vector.broadcast %26 : vector<1x32xf32> to vector<16x32xf32>
    %28 = arith.mulf %25, %27 : vector<16x32xf32>
    %29 = arith.addf %22, %28 : vector<16x32xf32>
    %c0_14 = arith.constant 0 : index
    %c0_15 = arith.constant 0 : index
    %30 = vector.load %arg7[%c0_14, %c0_15] : memref<32x160xf32, #tpu.memory_space<vmem>>, vector<32x160xf32>
    %cst_16 = arith.constant dense<0.000000e+00> : vector<16x160xf32>
    %31 = tpu.matmul %29, %30, %cst_16 {dimension_numbers = #tpu.dot_dimension_numbers<[1], [0], [0], [1], [0, 0, 1, 1], [], []>} : vector<16x32xf32>, vector<32x160xf32>, vector<16x160xf32> -> vector<16x160xf32>
    %32 = math.tanh %31 : vector<16x160xf32>
    %c0_17 = arith.constant 0 : index
    %c0_18 = arith.constant 0 : index
    %33 = vector.load %arg8[%c0_17, %c0_18] : memref<160x160xf32, #tpu.memory_space<vmem>>, vector<160x160xf32>
    %cst_19 = arith.constant dense<0.000000e+00> : vector<16x160xf32>
    %34 = tpu.matmul %32, %33, %cst_19 {dimension_numbers = #tpu.dot_dimension_numbers<[1], [0], [0], [1], [0, 0, 1, 1], [], []>} : vector<16x160xf32>, vector<160x160xf32>, vector<16x160xf32> -> vector<16x160xf32>
    %c0_20 = arith.constant 0 : index
    %c0_21 = arith.constant 0 : index
    %35 = vector.load %arg6[%c0_20, %c0_21] : memref<1x160xf32, #tpu.memory_space<vmem>>, vector<1x160xf32>
    %36 = vector.broadcast %35 : vector<1x160xf32> to vector<16x160xf32>
    %37 = arith.addf %34, %36 : vector<16x160xf32>
    %38 = vector.extract_strided_slice %37 {offsets = [0, 0], sizes = [16, 32], strides = [1, 1]} : vector<16x160xf32> to vector<16x32xf32>
    %39 = arith.mulf %25, %38 : vector<16x32xf32>
    %40 = arith.addf %22, %39 : vector<16x32xf32>
    %41 = vector.extract_strided_slice %37 {offsets = [0, 32], sizes = [16, 32], strides = [1, 1]} : vector<16x160xf32> to vector<16x32xf32>
    %42 = arith.mulf %25, %41 : vector<16x32xf32>
    %43 = arith.addf %22, %42 : vector<16x32xf32>
    %44 = vector.extract_strided_slice %37 {offsets = [0, 64], sizes = [16, 32], strides = [1, 1]} : vector<16x160xf32> to vector<16x32xf32>
    %45 = arith.mulf %25, %44 : vector<16x32xf32>
    %46 = arith.addf %22, %45 : vector<16x32xf32>
    %47 = vector.extract_strided_slice %37 {offsets = [0, 96], sizes = [16, 32], strides = [1, 1]} : vector<16x160xf32> to vector<16x32xf32>
    %48 = arith.mulf %25, %47 : vector<16x32xf32>
    %49 = arith.addf %22, %48 : vector<16x32xf32>
    %50 = vector.extract_strided_slice %37 {offsets = [0, 128], sizes = [16, 32], strides = [1, 1]} : vector<16x160xf32> to vector<16x32xf32>
    %51 = arith.mulf %25, %50 : vector<16x32xf32>
    %52 = arith.addf %22, %51 : vector<16x32xf32>
    %53 = tpu.concatenate %49, %43, %46, %52 in 1 : vector<16x32xf32>, vector<16x32xf32>, vector<16x32xf32>, vector<16x32xf32> -> vector<16x128xf32>
    %c0_22 = arith.constant 0 : index
    %c0_23 = arith.constant 0 : index
    %54 = vector.load %arg9[%c0_22, %c0_23] : memref<128x128xf32, #tpu.memory_space<vmem>>, vector<128x128xf32>
    %cst_24 = arith.constant dense<0.000000e+00> : vector<16x128xf32>
    %55 = tpu.matmul %53, %54, %cst_24 {dimension_numbers = #tpu.dot_dimension_numbers<[1], [0], [0], [1], [0, 0, 1, 1], [], []>} : vector<16x128xf32>, vector<128x128xf32>, vector<16x128xf32> -> vector<16x128xf32>
    %56 = tpu.iota {dimensions = array<i32: 1>} : vector<16x128xi32>
    %c96_i32 = arith.constant 96 : i32
    %57 = vector.broadcast %c96_i32 : i32 to vector<16x128xi32>
    %58 = arith.cmpi sge, %56, %57 : vector<16x128xi32>
    %59 = arith.negf %55 : vector<16x128xf32>
    %60 = math.exp %59 : vector<16x128xf32>
    %cst_25 = arith.constant 1.000000e+00 : f32
    %61 = vector.broadcast %cst_25 : f32 to vector<16x128xf32>
    %62 = arith.addf %61, %60 : vector<16x128xf32>
    %63 = arith.divf %61, %62 : vector<16x128xf32>
    %64 = arith.mulf %55, %63 : vector<16x128xf32>
    %65 = arith.select %58, %64, %55 : vector<16x128xi1>, vector<16x128xf32>
    %c0_26 = arith.constant 0 : index
    %c0_27 = arith.constant 0 : index
    %66 = vector.load %arg13[%c0_26, %c0_27] : memref<16x128xf32, #tpu.memory_space<vmem>>, vector<16x128xf32>
    tpu.vector_store %arg13[%c0_26, %c0_27], %65 {strides = array<i32>} : memref<16x128xf32, #tpu.memory_space<vmem>>, vector<16x128xf32>,
    %c0_28 = arith.constant 0 : index
    %c0_29 = arith.constant 0 : index
    %67 = vector.load %arg10[%c0_28, %c0_29] : memref<32x64xf32, #tpu.memory_space<vmem>>, vector<32x64xf32>
    %cst_30 = arith.constant dense<0.000000e+00> : vector<16x64xf32>
    %68 = tpu.matmul %40, %67, %cst_30 {dimension_numbers = #tpu.dot_dimension_numbers<[1], [0], [0], [1], [0, 0, 1, 1], [], []>} : vector<16x32xf32>, vector<32x64xf32>, vector<16x64xf32> -> vector<16x64xf32>
    %69 = math.tanh %68 : vector<16x64xf32>
    %c0_31 = arith.constant 0 : index
    %c0_32 = arith.constant 0 : index
    %70 = vector.load %arg11[%c0_31, %c0_32] : memref<64x32xf32, #tpu.memory_space<vmem>>, vector<64x32xf32>
    %cst_33 = arith.constant dense<0.000000e+00> : vector<16x32xf32>
    %71 = tpu.matmul %69, %70, %cst_33 {dimension_numbers = #tpu.dot_dimension_numbers<[1], [0], [0], [1], [0, 0, 1, 1], [], []>} : vector<16x64xf32>, vector<64x32xf32>, vector<16x32xf32> -> vector<16x32xf32>
    %c0_34 = arith.constant 0 : index
    %c0_35 = arith.constant 0 : index
    %72 = vector.load %arg12[%c0_34, %c0_35] : memref<1x32xf32, #tpu.memory_space<vmem>>, vector<1x32xf32>
    %73 = vector.broadcast %72 : vector<1x32xf32> to vector<16x32xf32>
    %74 = arith.addf %73, %71 : vector<16x32xf32>
    %75 = math.exp %74 : vector<16x32xf32>
    %cst_36 = arith.constant 0.000000e+00 : f32
    %76 = vector.broadcast %cst_36 : f32 to vector<16x32xf32>
    %77 = arith.subf %76, %75 : vector<16x32xf32>
    %78 = math.exp %77 : vector<16x32xf32>
    %c0_37 = arith.constant 0 : index
    %c0_38 = arith.constant 0 : index
    %79 = vector.load %arg14[%c0_37, %c0_38] : memref<16x32xf32, #tpu.memory_space<vmem>>, vector<16x32xf32>
    tpu.vector_store %arg14[%c0_37, %c0_38], %78 {strides = array<i32>} : memref<16x32xf32, #tpu.memory_space<vmem>>, vector<16x32xf32>,
    return
  }
  func.func @transform_0(%arg0: i32) -> (i32, i32) {
    %c0_i32 = arith.constant 0 : i32
    %c0_i32_0 = arith.constant 0 : i32
    %c0_i32_1 = arith.constant 0 : i32
    return %c0_i32, %c0_i32_0 : i32, i32
  }
  func.func @transform_1(%arg0: i32) -> (i32, i32) {
    %c0_i32 = arith.constant 0 : i32
    %c0_i32_0 = arith.constant 0 : i32
    %c0_i32_1 = arith.constant 0 : i32
    return %c0_i32, %c0_i32_0 : i32, i32
  }
  func.func @transform_2(%arg0: i32) -> (i32, i32) {
    %c0_i32 = arith.constant 0 : i32
    %c0_i32_0 = arith.constant 0 : i32
    %c0_i32_1 = arith.constant 0 : i32
    return %c0_i32, %c0_i32_0 : i32, i32
  }
  func.func @transform_3(%arg0: i32) -> (i32, i32) {
    %c0_i32 = arith.constant 0 : i32
    %c0_i32_0 = arith.constant 0 : i32
    %c0_i32_1 = arith.constant 0 : i32
    return %c0_i32, %c0_i32_0 : i32, i32
  }
  func.func @transform_4(%arg0: i32) -> (i32, i32) {
    %c0_i32 = arith.constant 0 : i32
    %c0_i32_0 = arith.constant 0 : i32
    %c0_i32_1 = arith.constant 0 : i32
    return %c0_i32, %c0_i32_0 : i32, i32
  }
  func.func @transform_5(%arg0: i32) -> (i32, i32) {
    %c0_i32 = arith.constant 0 : i32
    %c0_i32_0 = arith.constant 0 : i32
    %c0_i32_1 = arith.constant 0 : i32
    return %c0_i32, %c0_i32_0 : i32, i32
  }
  func.func @transform_6(%arg0: i32) -> (i32, i32) {
    %c0_i32 = arith.constant 0 : i32
    %c0_i32_0 = arith.constant 0 : i32
    %c0_i32_1 = arith.constant 0 : i32
    return %c0_i32, %c0_i32_0 : i32, i32
  }
  func.func @transform_7(%arg0: i32) -> (i32, i32) {
    %c0_i32 = arith.constant 0 : i32
    %c0_i32_0 = arith.constant 0 : i32
    %c0_i32_1 = arith.constant 0 : i32
    return %c0_i32, %c0_i32_0 : i32, i32
  }
  func.func @transform_8(%arg0: i32) -> (i32, i32) {
    %c0_i32 = arith.constant 0 : i32
    %c0_i32_0 = arith.constant 0 : i32
    %c0_i32_1 = arith.constant 0 : i32
    return %c0_i32, %c0_i32_0 : i32, i32
  }
  func.func @transform_9(%arg0: i32) -> (i32, i32) {
    %c0_i32 = arith.constant 0 : i32
    %c0_i32_0 = arith.constant 0 : i32
    %c0_i32_1 = arith.constant 0 : i32
    return %c0_i32, %c0_i32_0 : i32, i32
  }
  func.func @transform_10(%arg0: i32) -> (i32, i32) {
    %c0_i32 = arith.constant 0 : i32
    %c0_i32_0 = arith.constant 0 : i32
    %c0_i32_1 = arith.constant 0 : i32
    return %c0_i32, %c0_i32_0 : i32, i32
  }
  func.func @transform_11(%arg0: i32) -> (i32, i32) {
    %c0_i32 = arith.constant 0 : i32
    %c0_i32_0 = arith.constant 0 : i32
    %c0_i32_1 = arith.constant 0 : i32
    return %c0_i32, %c0_i32_0 : i32, i32
  }
  func.func @transform_12(%arg0: i32) -> (i32, i32) {
    %c0_i32 = arith.constant 0 : i32
    %c0_i32_0 = arith.constant 0 : i32
    %c0_i32_1 = arith.constant 0 : i32
    return %c0_i32, %c0_i32_0 : i32, i32
  }
  func.func @transform_13(%arg0: i32) -> (i32, i32) {
    %c0_i32 = arith.constant 0 : i32
    %c0_i32_0 = arith.constant 0 : i32
    %c0_i32_1 = arith.constant 0 : i32
    return %c0_i32, %c0_i32_0 : i32, i32
  }
}

module attributes {stable_mosaic.version = 11 : i64} {
  func.func @_wkv_bi_kernel(%arg0: i32, %arg1: memref<2x8xi32, #tpu.memory_space<smem>>, %arg2: memref<1x8x2x16xf32, #tpu.memory_space<vmem>>, %arg3: memref<1x8x2x16xf32, #tpu.memory_space<vmem>>, %arg4: memref<1x8x2x16xf32, #tpu.memory_space<vmem>>, %arg5: memref<1x8x2x16xf32, #tpu.memory_space<vmem>>, %arg6: memref<2x16xf32, #tpu.memory_space<vmem>>, %arg7: memref<1x8x2x16xf32, #tpu.memory_space<vmem>>) attributes {dimension_semantics = [#tpu.dimension_semantics<parallel>], iteration_bounds = array<i64: 2>, scalar_prefetch = 1 : i64, scratch_operands = 0 : i64, tpu.core_type = #tpu.core_type<tc>, window_params = [{transform_indices = @transform_0, window_bounds = array<i64: 1, 8, 2, 16>}, {transform_indices = @transform_1, window_bounds = array<i64: 1, 8, 2, 16>}, {transform_indices = @transform_2, window_bounds = array<i64: 1, 8, 2, 16>}, {transform_indices = @transform_3, window_bounds = array<i64: 1, 8, 2, 16>}, {pipeline_mode = #tpu.pipeline_mode<synchronous>, transform_indices = @transform_4, window_bounds = array<i64: 2, 16>}, {transform_indices = @transform_5, window_bounds = array<i64: 1, 8, 2, 16>}]} {
    %c0 = arith.constant 0 : index
    %c0_0 = arith.constant 0 : index
    %0 = vector.load %arg6[%c0, %c0_0] : memref<2x16xf32, #tpu.memory_space<vmem>>, vector<2x16xf32>
    %cst = arith.constant 0.000000e+00 : f32
    %1 = vector.broadcast %cst : f32 to vector<2x16x16xf32>
    %c0_i32 = arith.constant 0 : i32
    %c8_i32 = arith.constant 8 : i32
    %2 = arith.addi %c0_i32, %c8_i32 : i32
    %c1_i32 = arith.constant 1 : i32
    %3 = scf.for %arg8 = %c0_i32 to %2 step %c1_i32 iter_args(%arg9 = %1) -> (vector<2x16x16xf32>)  : i32 {
      %c0_7 = arith.constant 0 : index
      %7 = arith.index_cast %arg8 : i32 to index
      %c0_8 = arith.constant 0 : index
      %c0_9 = arith.constant 0 : index
      %8 = vector.load %arg2[%c0_7, %7, %c0_8, %c0_9] : memref<1x8x2x16xf32, #tpu.memory_space<vmem>>, vector<1x1x2x16xf32>
      %9 = vector.shape_cast %8 : vector<1x1x2x16xf32> to vector<2x16xf32>
      %c0_10 = arith.constant 0 : index
      %10 = arith.index_cast %arg8 : i32 to index
      %c0_11 = arith.constant 0 : index
      %c0_12 = arith.constant 0 : index
      %11 = vector.load %arg3[%c0_10, %10, %c0_11, %c0_12] : memref<1x8x2x16xf32, #tpu.memory_space<vmem>>, vector<1x1x2x16xf32>
      %12 = vector.shape_cast %11 : vector<1x1x2x16xf32> to vector<2x16xf32>
      %c0_13 = arith.constant 0 : index
      %13 = arith.index_cast %arg8 : i32 to index
      %c0_14 = arith.constant 0 : index
      %c0_15 = arith.constant 0 : index
      %14 = vector.load %arg4[%c0_13, %13, %c0_14, %c0_15] : memref<1x8x2x16xf32, #tpu.memory_space<vmem>>, vector<1x1x2x16xf32>
      %15 = vector.shape_cast %14 : vector<1x1x2x16xf32> to vector<2x16xf32>
      %c0_16 = arith.constant 0 : index
      %16 = arith.index_cast %arg8 : i32 to index
      %c0_17 = arith.constant 0 : index
      %c0_18 = arith.constant 0 : index
      %17 = vector.load %arg5[%c0_16, %16, %c0_17, %c0_18] : memref<1x8x2x16xf32, #tpu.memory_space<vmem>>, vector<1x1x2x16xf32>
      %18 = vector.shape_cast %17 : vector<1x1x2x16xf32> to vector<2x16xf32>
      %19 = vector.shape_cast %12 : vector<2x16xf32> to vector<2x16x1xf32>
      %20 = vector.shape_cast %15 : vector<2x16xf32> to vector<2x1x16xf32>
      %21 = vector.broadcast %19 : vector<2x16x1xf32> to vector<2x16x16xf32>
      %22 = vector.broadcast %20 : vector<2x1x16xf32> to vector<2x16x16xf32>
      %23 = arith.mulf %21, %22 : vector<2x16x16xf32>
      %24 = vector.shape_cast %9 : vector<2x16xf32> to vector<2x16x1xf32>
      %25 = vector.shape_cast %0 : vector<2x16xf32> to vector<2x16x1xf32>
      %26 = vector.broadcast %25 : vector<2x16x1xf32> to vector<2x16x16xf32>
      %27 = arith.mulf %26, %23 : vector<2x16x16xf32>
      %28 = arith.addf %arg9, %27 : vector<2x16x16xf32>
      %29 = vector.broadcast %24 : vector<2x16x1xf32> to vector<2x16x16xf32>
      %30 = arith.mulf %29, %28 : vector<2x16x16xf32>
      %cst_19 = arith.constant dense<0.000000e+00> : vector<2x16xf32>
      %31 = vector.multi_reduction <add>, %30, %cst_19 [1] : vector<2x16x16xf32> to vector<2x16xf32>
      %32 = vector.shape_cast %18 : vector<2x16xf32> to vector<2x16x1xf32>
      %33 = vector.broadcast %32 : vector<2x16x1xf32> to vector<2x16x16xf32>
      %34 = arith.mulf %33, %arg9 : vector<2x16x16xf32>
      %35 = arith.addf %34, %23 : vector<2x16x16xf32>
      %c0_20 = arith.constant 0 : index
      %36 = arith.index_cast %arg8 : i32 to index
      %c0_21 = arith.constant 0 : index
      %c0_22 = arith.constant 0 : index
      %37 = vector.load %arg7[%c0_20, %36, %c0_21, %c0_22] : memref<1x8x2x16xf32, #tpu.memory_space<vmem>>, vector<1x1x2x16xf32>
      %38 = vector.shape_cast %37 : vector<1x1x2x16xf32> to vector<2x16xf32>
      %39 = vector.shape_cast %31 : vector<2x16xf32> to vector<1x1x2x16xf32>
      tpu.vector_store %arg7[%c0_20, %36, %c0_21, %c0_22], %39 {strides = array<i32>} : memref<1x8x2x16xf32, #tpu.memory_space<vmem>>, vector<1x1x2x16xf32>,
      scf.yield %35 : vector<2x16x16xf32>
    }
    %c8_i32_1 = arith.constant 8 : i32
    %cst_2 = arith.constant 0.000000e+00 : f32
    %4 = vector.broadcast %cst_2 : f32 to vector<2x16x16xf32>
    %c0_i32_3 = arith.constant 0 : i32
    %c8_i32_4 = arith.constant 8 : i32
    %5 = arith.addi %c0_i32_3, %c8_i32_4 : i32
    %c1_i32_5 = arith.constant 1 : i32
    %6 = scf.for %arg8 = %c0_i32_3 to %5 step %c1_i32_5 iter_args(%arg9 = %4) -> (vector<2x16x16xf32>)  : i32 {
      %7 = arith.index_cast %arg0 : i32 to index
      %8 = arith.index_cast %arg8 : i32 to index
      %9 = memref.load %arg1[%7, %8] : memref<2x8xi32, #tpu.memory_space<smem>>
      %c0_7 = arith.constant 0 : index
      %10 = arith.index_cast %9 : i32 to index
      %c0_8 = arith.constant 0 : index
      %c0_9 = arith.constant 0 : index
      %11 = vector.load %arg2[%c0_7, %10, %c0_8, %c0_9] : memref<1x8x2x16xf32, #tpu.memory_space<vmem>>, vector<1x1x2x16xf32>
      %12 = vector.shape_cast %11 : vector<1x1x2x16xf32> to vector<2x16xf32>
      %c0_10 = arith.constant 0 : index
      %13 = arith.index_cast %9 : i32 to index
      %c0_11 = arith.constant 0 : index
      %c0_12 = arith.constant 0 : index
      %14 = vector.load %arg3[%c0_10, %13, %c0_11, %c0_12] : memref<1x8x2x16xf32, #tpu.memory_space<vmem>>, vector<1x1x2x16xf32>
      %15 = vector.shape_cast %14 : vector<1x1x2x16xf32> to vector<2x16xf32>
      %c0_13 = arith.constant 0 : index
      %16 = arith.index_cast %9 : i32 to index
      %c0_14 = arith.constant 0 : index
      %c0_15 = arith.constant 0 : index
      %17 = vector.load %arg4[%c0_13, %16, %c0_14, %c0_15] : memref<1x8x2x16xf32, #tpu.memory_space<vmem>>, vector<1x1x2x16xf32>
      %18 = vector.shape_cast %17 : vector<1x1x2x16xf32> to vector<2x16xf32>
      %c0_16 = arith.constant 0 : index
      %19 = arith.index_cast %9 : i32 to index
      %c0_17 = arith.constant 0 : index
      %c0_18 = arith.constant 0 : index
      %20 = vector.load %arg5[%c0_16, %19, %c0_17, %c0_18] : memref<1x8x2x16xf32, #tpu.memory_space<vmem>>, vector<1x1x2x16xf32>
      %21 = vector.shape_cast %20 : vector<1x1x2x16xf32> to vector<2x16xf32>
      %22 = vector.shape_cast %15 : vector<2x16xf32> to vector<2x16x1xf32>
      %23 = vector.shape_cast %18 : vector<2x16xf32> to vector<2x1x16xf32>
      %24 = vector.broadcast %22 : vector<2x16x1xf32> to vector<2x16x16xf32>
      %25 = vector.broadcast %23 : vector<2x1x16xf32> to vector<2x16x16xf32>
      %26 = arith.mulf %24, %25 : vector<2x16x16xf32>
      %27 = vector.shape_cast %12 : vector<2x16xf32> to vector<2x16x1xf32>
      %28 = vector.shape_cast %0 : vector<2x16xf32> to vector<2x16x1xf32>
      %29 = vector.broadcast %28 : vector<2x16x1xf32> to vector<2x16x16xf32>
      %30 = arith.mulf %29, %26 : vector<2x16x16xf32>
      %31 = arith.addf %arg9, %30 : vector<2x16x16xf32>
      %32 = vector.broadcast %27 : vector<2x16x1xf32> to vector<2x16x16xf32>
      %33 = arith.mulf %32, %31 : vector<2x16x16xf32>
      %cst_19 = arith.constant dense<0.000000e+00> : vector<2x16xf32>
      %34 = vector.multi_reduction <add>, %33, %cst_19 [1] : vector<2x16x16xf32> to vector<2x16xf32>
      %35 = vector.shape_cast %21 : vector<2x16xf32> to vector<2x16x1xf32>
      %36 = vector.broadcast %35 : vector<2x16x1xf32> to vector<2x16x16xf32>
      %37 = arith.mulf %36, %arg9 : vector<2x16x16xf32>
      %38 = arith.addf %37, %26 : vector<2x16x16xf32>
      %c0_20 = arith.constant 0 : index
      %39 = arith.index_cast %9 : i32 to index
      %c0_21 = arith.constant 0 : index
      %c0_22 = arith.constant 0 : index
      %40 = vector.load %arg7[%c0_20, %39, %c0_21, %c0_22] : memref<1x8x2x16xf32, #tpu.memory_space<vmem>>, vector<1x1x2x16xf32>
      %41 = vector.shape_cast %40 : vector<1x1x2x16xf32> to vector<2x16xf32>
      %42 = arith.addf %41, %34 : vector<2x16xf32>
      %c0_23 = arith.constant 0 : index
      %43 = arith.index_cast %9 : i32 to index
      %c0_24 = arith.constant 0 : index
      %c0_25 = arith.constant 0 : index
      %44 = vector.load %arg7[%c0_23, %43, %c0_24, %c0_25] : memref<1x8x2x16xf32, #tpu.memory_space<vmem>>, vector<1x1x2x16xf32>
      %45 = vector.shape_cast %44 : vector<1x1x2x16xf32> to vector<2x16xf32>
      %46 = vector.shape_cast %42 : vector<2x16xf32> to vector<1x1x2x16xf32>
      tpu.vector_store %arg7[%c0_23, %43, %c0_24, %c0_25], %46 {strides = array<i32>} : memref<1x8x2x16xf32, #tpu.memory_space<vmem>>, vector<1x1x2x16xf32>,
      scf.yield %38 : vector<2x16x16xf32>
    }
    %c8_i32_6 = arith.constant 8 : i32
    return
  }
  func.func @transform_0(%arg0: i32, %arg1: memref<2x8xi32, #tpu.memory_space<smem>>) -> (i32, i32, i32, i32) {
    %c0_i32 = arith.constant 0 : i32
    %c0_i32_0 = arith.constant 0 : i32
    %c0_i32_1 = arith.constant 0 : i32
    %c0_i32_2 = arith.constant 0 : i32
    return %arg0, %c0_i32, %c0_i32_0, %c0_i32_1 : i32, i32, i32, i32
  }
  func.func @transform_1(%arg0: i32, %arg1: memref<2x8xi32, #tpu.memory_space<smem>>) -> (i32, i32, i32, i32) {
    %c0_i32 = arith.constant 0 : i32
    %c0_i32_0 = arith.constant 0 : i32
    %c0_i32_1 = arith.constant 0 : i32
    %c0_i32_2 = arith.constant 0 : i32
    return %arg0, %c0_i32, %c0_i32_0, %c0_i32_1 : i32, i32, i32, i32
  }
  func.func @transform_2(%arg0: i32, %arg1: memref<2x8xi32, #tpu.memory_space<smem>>) -> (i32, i32, i32, i32) {
    %c0_i32 = arith.constant 0 : i32
    %c0_i32_0 = arith.constant 0 : i32
    %c0_i32_1 = arith.constant 0 : i32
    %c0_i32_2 = arith.constant 0 : i32
    return %arg0, %c0_i32, %c0_i32_0, %c0_i32_1 : i32, i32, i32, i32
  }
  func.func @transform_3(%arg0: i32, %arg1: memref<2x8xi32, #tpu.memory_space<smem>>) -> (i32, i32, i32, i32) {
    %c0_i32 = arith.constant 0 : i32
    %c0_i32_0 = arith.constant 0 : i32
    %c0_i32_1 = arith.constant 0 : i32
    %c0_i32_2 = arith.constant 0 : i32
    return %arg0, %c0_i32, %c0_i32_0, %c0_i32_1 : i32, i32, i32, i32
  }
  func.func @transform_4(%arg0: i32, %arg1: memref<2x8xi32, #tpu.memory_space<smem>>) -> (i32, i32) {
    %c0_i32 = arith.constant 0 : i32
    %c0_i32_0 = arith.constant 0 : i32
    %c0_i32_1 = arith.constant 0 : i32
    return %c0_i32, %c0_i32_0 : i32, i32
  }
  func.func @transform_5(%arg0: i32, %arg1: memref<2x8xi32, #tpu.memory_space<smem>>) -> (i32, i32, i32, i32) {
    %c0_i32 = arith.constant 0 : i32
    %c0_i32_0 = arith.constant 0 : i32
    %c0_i32_1 = arith.constant 0 : i32
    %c0_i32_2 = arith.constant 0 : i32
    return %arg0, %c0_i32, %c0_i32_0, %c0_i32_1 : i32, i32, i32, i32
  }
}

module attributes {stable_mosaic.version = 11 : i64} {
  func.func @_finalize_cmix_kernel(%arg0: i32, %arg1: memref<16x32xf32, #tpu.memory_space<vmem>>, %arg2: memref<16x32xf32, #tpu.memory_space<vmem>>, %arg3: memref<16x128xf32, #tpu.memory_space<vmem>>, %arg4: memref<32x32xf32, #tpu.memory_space<vmem>>, %arg5: memref<1x32xf32, #tpu.memory_space<vmem>>, %arg6: memref<1x32xf32, #tpu.memory_space<vmem>>, %arg7: memref<32x32xf32, #tpu.memory_space<vmem>>, %arg8: memref<16x16xf32, #tpu.memory_space<vmem>>, %arg9: memref<1x32xf32, #tpu.memory_space<vmem>>, %arg10: memref<1x32xf32, #tpu.memory_space<vmem>>, %arg11: memref<1x32xf32, #tpu.memory_space<vmem>>, %arg12: memref<1x32xf32, #tpu.memory_space<vmem>>, %arg13: memref<32x128xf32, #tpu.memory_space<vmem>>, %arg14: memref<128x32xf32, #tpu.memory_space<vmem>>, %arg15: memref<32x32xf32, #tpu.memory_space<vmem>>, %arg16: memref<16x32xf32, #tpu.memory_space<vmem>>) attributes {dimension_semantics = [#tpu.dimension_semantics<arbitrary>], iteration_bounds = array<i64: 1>, scalar_prefetch = 0 : i64, scratch_operands = 0 : i64, tpu.core_type = #tpu.core_type<tc>, window_params = [{pipeline_mode = #tpu.pipeline_mode<synchronous>, transform_indices = @transform_0, window_bounds = array<i64: 16, 32>}, {pipeline_mode = #tpu.pipeline_mode<synchronous>, transform_indices = @transform_1, window_bounds = array<i64: 16, 32>}, {pipeline_mode = #tpu.pipeline_mode<synchronous>, transform_indices = @transform_2, window_bounds = array<i64: 16, 128>}, {pipeline_mode = #tpu.pipeline_mode<synchronous>, transform_indices = @transform_3, window_bounds = array<i64: 32, 32>}, {pipeline_mode = #tpu.pipeline_mode<synchronous>, transform_indices = @transform_4, window_bounds = array<i64: 1, 32>}, {pipeline_mode = #tpu.pipeline_mode<synchronous>, transform_indices = @transform_5, window_bounds = array<i64: 1, 32>}, {pipeline_mode = #tpu.pipeline_mode<synchronous>, transform_indices = @transform_6, window_bounds = array<i64: 32, 32>}, {pipeline_mode = #tpu.pipeline_mode<synchronous>, transform_indices = @transform_7, window_bounds = array<i64: 16, 16>}, {pipeline_mode = #tpu.pipeline_mode<synchronous>, transform_indices = @transform_8, window_bounds = array<i64: 1, 32>}, {pipeline_mode = #tpu.pipeline_mode<synchronous>, transform_indices = @transform_9, window_bounds = array<i64: 1, 32>}, {pipeline_mode = #tpu.pipeline_mode<synchronous>, transform_indices = @transform_10, window_bounds = array<i64: 1, 32>}, {pipeline_mode = #tpu.pipeline_mode<synchronous>, transform_indices = @transform_11, window_bounds = array<i64: 1, 32>}, {pipeline_mode = #tpu.pipeline_mode<synchronous>, transform_indices = @transform_12, window_bounds = array<i64: 32, 128>}, {pipeline_mode = #tpu.pipeline_mode<synchronous>, transform_indices = @transform_13, window_bounds = array<i64: 128, 32>}, {pipeline_mode = #tpu.pipeline_mode<synchronous>, transform_indices = @transform_14, window_bounds = array<i64: 32, 32>}, {pipeline_mode = #tpu.pipeline_mode<synchronous>, transform_indices = @transform_15, window_bounds = array<i64: 16, 32>}]} {
    %c0 = arith.constant 0 : index
    %c0_0 = arith.constant 0 : index
    %0 = vector.load %arg1[%c0, %c0_0] : memref<16x32xf32, #tpu.memory_space<vmem>>, vector<16x32xf32>
    %c0_1 = arith.constant 0 : index
    %c0_2 = arith.constant 0 : index
    %1 = vector.load %arg2[%c0_1, %c0_2] : memref<16x32xf32, #tpu.memory_space<vmem>>, vector<16x32xf32>
    %c0_3 = arith.constant 0 : index
    %c0_4 = arith.constant 0 : index
    %2 = vector.load %arg4[%c0_3, %c0_4] : memref<32x32xf32, #tpu.memory_space<vmem>>, vector<32x32xf32>
    %cst = arith.constant dense<0.000000e+00> : vector<16x32xf32>
    %3 = tpu.matmul %1, %2, %cst {dimension_numbers = #tpu.dot_dimension_numbers<[1], [0], [0], [1], [0, 0, 1, 1], [], []>} : vector<16x32xf32>, vector<32x32xf32>, vector<16x32xf32> -> vector<16x32xf32>
    %4 = arith.mulf %1, %1 : vector<16x32xf32>
    %c0_5 = arith.constant 0 : index
    %c0_6 = arith.constant 0 : index
    %5 = vector.load %arg4[%c0_5, %c0_6] : memref<32x32xf32, #tpu.memory_space<vmem>>, vector<32x32xf32>
    %cst_7 = arith.constant dense<0.000000e+00> : vector<16x32xf32>
    %6 = tpu.matmul %4, %5, %cst_7 {dimension_numbers = #tpu.dot_dimension_numbers<[1], [0], [0], [1], [0, 0, 1, 1], [], []>} : vector<16x32xf32>, vector<32x32xf32>, vector<16x32xf32> -> vector<16x32xf32>
    %7 = arith.mulf %3, %3 : vector<16x32xf32>
    %8 = arith.subf %6, %7 : vector<16x32xf32>
    %9 = arith.subf %1, %3 : vector<16x32xf32>
    %cst_8 = arith.constant 6.400000e-04 : f32
    %10 = vector.broadcast %cst_8 : f32 to vector<16x32xf32>
    %11 = arith.addf %8, %10 : vector<16x32xf32>
    %12 = math.rsqrt %11 : vector<16x32xf32>
    %13 = arith.mulf %9, %12 : vector<16x32xf32>
    %c0_9 = arith.constant 0 : index
    %c0_10 = arith.constant 0 : index
    %14 = vector.load %arg5[%c0_9, %c0_10] : memref<1x32xf32, #tpu.memory_space<vmem>>, vector<1x32xf32>
    %15 = vector.broadcast %14 : vector<1x32xf32> to vector<16x32xf32>
    %16 = arith.mulf %13, %15 : vector<16x32xf32>
    %c0_11 = arith.constant 0 : index
    %c0_12 = arith.constant 0 : index
    %17 = vector.load %arg6[%c0_11, %c0_12] : memref<1x32xf32, #tpu.memory_space<vmem>>, vector<1x32xf32>
    %18 = vector.broadcast %17 : vector<1x32xf32> to vector<16x32xf32>
    %19 = arith.addf %16, %18 : vector<16x32xf32>
    %c0_13 = arith.constant 0 : index
    %c96 = arith.constant 96 : index
    %20 = vector.load %arg3[%c0_13, %c96] : memref<16x128xf32, #tpu.memory_space<vmem>>, vector<16x32xf32>
    %21 = arith.mulf %19, %20 : vector<16x32xf32>
    %c0_14 = arith.constant 0 : index
    %c0_15 = arith.constant 0 : index
    %22 = vector.load %arg7[%c0_14, %c0_15] : memref<32x32xf32, #tpu.memory_space<vmem>>, vector<32x32xf32>
    %cst_16 = arith.constant dense<0.000000e+00> : vector<16x32xf32>
    %23 = tpu.matmul %21, %22, %cst_16 {dimension_numbers = #tpu.dot_dimension_numbers<[1], [0], [0], [1], [0, 0, 1, 1], [], []>} : vector<16x32xf32>, vector<32x32xf32>, vector<16x32xf32> -> vector<16x32xf32>
    %24 = arith.addf %0, %23 : vector<16x32xf32>
    %cst_17 = arith.constant dense<0.000000e+00> : vector<16xf32>
    %25 = vector.multi_reduction <add>, %24, %cst_17 [1] : vector<16x32xf32> to vector<16xf32>
    %26 = vector.shape_cast %25 : vector<16xf32> to vector<16x1xf32>
    %cst_18 = arith.constant 3.200000e+01 : f32
    %27 = vector.broadcast %cst_18 : f32 to vector<16x1xf32>
    %28 = arith.divf %26, %27 : vector<16x1xf32>
    %29 = vector.broadcast %28 : vector<16x1xf32> to vector<16x32xf32>
    %30 = arith.subf %24, %29 : vector<16x32xf32>
    %31 = arith.mulf %30, %30 : vector<16x32xf32>
    %cst_19 = arith.constant dense<0.000000e+00> : vector<16xf32>
    %32 = vector.multi_reduction <add>, %31, %cst_19 [1] : vector<16x32xf32> to vector<16xf32>
    %33 = vector.shape_cast %32 : vector<16xf32> to vector<16x1xf32>
    %cst_20 = arith.constant 3.200000e+01 : f32
    %34 = vector.broadcast %cst_20 : f32 to vector<16x1xf32>
    %35 = arith.divf %33, %34 : vector<16x1xf32>
    %cst_21 = arith.constant 9.99999974E-6 : f32
    %36 = vector.broadcast %cst_21 : f32 to vector<16x1xf32>
    %37 = arith.addf %35, %36 : vector<16x1xf32>
    %38 = math.rsqrt %37 : vector<16x1xf32>
    %39 = vector.broadcast %38 : vector<16x1xf32> to vector<16x32xf32>
    %40 = arith.mulf %30, %39 : vector<16x32xf32>
    %c0_22 = arith.constant 0 : index
    %c0_23 = arith.constant 0 : index
    %41 = vector.load %arg9[%c0_22, %c0_23] : memref<1x32xf32, #tpu.memory_space<vmem>>, vector<1x32xf32>
    %42 = vector.broadcast %41 : vector<1x32xf32> to vector<16x32xf32>
    %43 = arith.mulf %40, %42 : vector<16x32xf32>
    %c0_24 = arith.constant 0 : index
    %c0_25 = arith.constant 0 : index
    %44 = vector.load %arg10[%c0_24, %c0_25] : memref<1x32xf32, #tpu.memory_space<vmem>>, vector<1x32xf32>
    %45 = vector.broadcast %44 : vector<1x32xf32> to vector<16x32xf32>
    %46 = arith.addf %43, %45 : vector<16x32xf32>
    %c0_26 = arith.constant 0 : index
    %c0_27 = arith.constant 0 : index
    %47 = vector.load %arg8[%c0_26, %c0_27] : memref<16x16xf32, #tpu.memory_space<vmem>>, vector<16x16xf32>
    %cst_28 = arith.constant dense<0.000000e+00> : vector<16x32xf32>
    %48 = tpu.matmul %47, %46, %cst_28 {dimension_numbers = #tpu.dot_dimension_numbers<[1], [0], [0], [1], [0, 0, 1, 1], [], []>} : vector<16x16xf32>, vector<16x32xf32>, vector<16x32xf32> -> vector<16x32xf32>
    %49 = arith.subf %48, %46 : vector<16x32xf32>
    %c0_29 = arith.constant 0 : index
    %c0_30 = arith.constant 0 : index
    %50 = vector.load %arg11[%c0_29, %c0_30] : memref<1x32xf32, #tpu.memory_space<vmem>>, vector<1x32xf32>
    %51 = vector.broadcast %50 : vector<1x32xf32> to vector<16x32xf32>
    %52 = arith.mulf %49, %51 : vector<16x32xf32>
    %53 = arith.addf %46, %52 : vector<16x32xf32>
    %c0_31 = arith.constant 0 : index
    %c0_32 = arith.constant 0 : index
    %54 = vector.load %arg12[%c0_31, %c0_32] : memref<1x32xf32, #tpu.memory_space<vmem>>, vector<1x32xf32>
    %55 = vector.broadcast %54 : vector<1x32xf32> to vector<16x32xf32>
    %56 = arith.mulf %49, %55 : vector<16x32xf32>
    %57 = arith.addf %46, %56 : vector<16x32xf32>
    %c0_33 = arith.constant 0 : index
    %c0_34 = arith.constant 0 : index
    %58 = vector.load %arg13[%c0_33, %c0_34] : memref<32x128xf32, #tpu.memory_space<vmem>>, vector<32x128xf32>
    %cst_35 = arith.constant dense<0.000000e+00> : vector<16x128xf32>
    %59 = tpu.matmul %53, %58, %cst_35 {dimension_numbers = #tpu.dot_dimension_numbers<[1], [0], [0], [1], [0, 0, 1, 1], [], []>} : vector<16x32xf32>, vector<32x128xf32>, vector<16x128xf32> -> vector<16x128xf32>
    %cst_36 = arith.constant 0.000000e+00 : f32
    %60 = vector.broadcast %cst_36 : f32 to vector<16x128xf32>
    %61 = arith.maximumf %59, %60 : vector<16x128xf32>
    %62 = arith.mulf %61, %61 : vector<16x128xf32>
    %c0_37 = arith.constant 0 : index
    %c0_38 = arith.constant 0 : index
    %63 = vector.load %arg14[%c0_37, %c0_38] : memref<128x32xf32, #tpu.memory_space<vmem>>, vector<128x32xf32>
    %cst_39 = arith.constant dense<0.000000e+00> : vector<16x32xf32>
    %64 = tpu.matmul %62, %63, %cst_39 {dimension_numbers = #tpu.dot_dimension_numbers<[1], [0], [0], [1], [0, 0, 1, 1], [], []>} : vector<16x128xf32>, vector<128x32xf32>, vector<16x32xf32> -> vector<16x32xf32>
    %c0_40 = arith.constant 0 : index
    %c0_41 = arith.constant 0 : index
    %65 = vector.load %arg15[%c0_40, %c0_41] : memref<32x32xf32, #tpu.memory_space<vmem>>, vector<32x32xf32>
    %cst_42 = arith.constant dense<0.000000e+00> : vector<16x32xf32>
    %66 = tpu.matmul %57, %65, %cst_42 {dimension_numbers = #tpu.dot_dimension_numbers<[1], [0], [0], [1], [0, 0, 1, 1], [], []>} : vector<16x32xf32>, vector<32x32xf32>, vector<16x32xf32> -> vector<16x32xf32>
    %67 = arith.negf %66 : vector<16x32xf32>
    %68 = math.exp %67 : vector<16x32xf32>
    %cst_43 = arith.constant 1.000000e+00 : f32
    %69 = vector.broadcast %cst_43 : f32 to vector<16x32xf32>
    %70 = arith.addf %69, %68 : vector<16x32xf32>
    %71 = arith.divf %69, %70 : vector<16x32xf32>
    %72 = arith.mulf %71, %64 : vector<16x32xf32>
    %73 = arith.addf %24, %72 : vector<16x32xf32>
    %c0_44 = arith.constant 0 : index
    %c0_45 = arith.constant 0 : index
    %74 = vector.load %arg16[%c0_44, %c0_45] : memref<16x32xf32, #tpu.memory_space<vmem>>, vector<16x32xf32>
    tpu.vector_store %arg16[%c0_44, %c0_45], %73 {strides = array<i32>} : memref<16x32xf32, #tpu.memory_space<vmem>>, vector<16x32xf32>,
    return
  }
  func.func @transform_0(%arg0: i32) -> (i32, i32) {
    %c0_i32 = arith.constant 0 : i32
    %c0_i32_0 = arith.constant 0 : i32
    %c0_i32_1 = arith.constant 0 : i32
    return %c0_i32, %c0_i32_0 : i32, i32
  }
  func.func @transform_1(%arg0: i32) -> (i32, i32) {
    %c0_i32 = arith.constant 0 : i32
    %c0_i32_0 = arith.constant 0 : i32
    %c0_i32_1 = arith.constant 0 : i32
    return %c0_i32, %c0_i32_0 : i32, i32
  }
  func.func @transform_2(%arg0: i32) -> (i32, i32) {
    %c0_i32 = arith.constant 0 : i32
    %c0_i32_0 = arith.constant 0 : i32
    %c0_i32_1 = arith.constant 0 : i32
    return %c0_i32, %c0_i32_0 : i32, i32
  }
  func.func @transform_3(%arg0: i32) -> (i32, i32) {
    %c0_i32 = arith.constant 0 : i32
    %c0_i32_0 = arith.constant 0 : i32
    %c0_i32_1 = arith.constant 0 : i32
    return %c0_i32, %c0_i32_0 : i32, i32
  }
  func.func @transform_4(%arg0: i32) -> (i32, i32) {
    %c0_i32 = arith.constant 0 : i32
    %c0_i32_0 = arith.constant 0 : i32
    %c0_i32_1 = arith.constant 0 : i32
    return %c0_i32, %c0_i32_0 : i32, i32
  }
  func.func @transform_5(%arg0: i32) -> (i32, i32) {
    %c0_i32 = arith.constant 0 : i32
    %c0_i32_0 = arith.constant 0 : i32
    %c0_i32_1 = arith.constant 0 : i32
    return %c0_i32, %c0_i32_0 : i32, i32
  }
  func.func @transform_6(%arg0: i32) -> (i32, i32) {
    %c0_i32 = arith.constant 0 : i32
    %c0_i32_0 = arith.constant 0 : i32
    %c0_i32_1 = arith.constant 0 : i32
    return %c0_i32, %c0_i32_0 : i32, i32
  }
  func.func @transform_7(%arg0: i32) -> (i32, i32) {
    %c0_i32 = arith.constant 0 : i32
    %c0_i32_0 = arith.constant 0 : i32
    %c0_i32_1 = arith.constant 0 : i32
    return %c0_i32, %c0_i32_0 : i32, i32
  }
  func.func @transform_8(%arg0: i32) -> (i32, i32) {
    %c0_i32 = arith.constant 0 : i32
    %c0_i32_0 = arith.constant 0 : i32
    %c0_i32_1 = arith.constant 0 : i32
    return %c0_i32, %c0_i32_0 : i32, i32
  }
  func.func @transform_9(%arg0: i32) -> (i32, i32) {
    %c0_i32 = arith.constant 0 : i32
    %c0_i32_0 = arith.constant 0 : i32
    %c0_i32_1 = arith.constant 0 : i32
    return %c0_i32, %c0_i32_0 : i32, i32
  }
  func.func @transform_10(%arg0: i32) -> (i32, i32) {
    %c0_i32 = arith.constant 0 : i32
    %c0_i32_0 = arith.constant 0 : i32
    %c0_i32_1 = arith.constant 0 : i32
    return %c0_i32, %c0_i32_0 : i32, i32
  }
  func.func @transform_11(%arg0: i32) -> (i32, i32) {
    %c0_i32 = arith.constant 0 : i32
    %c0_i32_0 = arith.constant 0 : i32
    %c0_i32_1 = arith.constant 0 : i32
    return %c0_i32, %c0_i32_0 : i32, i32
  }
  func.func @transform_12(%arg0: i32) -> (i32, i32) {
    %c0_i32 = arith.constant 0 : i32
    %c0_i32_0 = arith.constant 0 : i32
    %c0_i32_1 = arith.constant 0 : i32
    return %c0_i32, %c0_i32_0 : i32, i32
  }
  func.func @transform_13(%arg0: i32) -> (i32, i32) {
    %c0_i32 = arith.constant 0 : i32
    %c0_i32_0 = arith.constant 0 : i32
    %c0_i32_1 = arith.constant 0 : i32
    return %c0_i32, %c0_i32_0 : i32, i32
  }
  func.func @transform_14(%arg0: i32) -> (i32, i32) {
    %c0_i32 = arith.constant 0 : i32
    %c0_i32_0 = arith.constant 0 : i32
    %c0_i32_1 = arith.constant 0 : i32
    return %c0_i32, %c0_i32_0 : i32, i32
  }
  func.func @transform_15(%arg0: i32) -> (i32, i32) {
    %c0_i32 = arith.constant 0 : i32
    %c0_i32_0 = arith.constant 0 : i32
    %c0_i32_1 = arith.constant 0 : i32
    return %c0_i32, %c0_i32_0 : i32, i32
  }
}

module attributes {stable_mosaic.version = 11 : i64} {
  func.func @_tmix_stage1_kernel(%arg0: i32, %arg1: memref<16x32xf32, #tpu.memory_space<vmem>>, %arg2: memref<16x16xf32, #tpu.memory_space<vmem>>, %arg3: memref<1x32xf32, #tpu.memory_space<vmem>>, %arg4: memref<1x32xf32, #tpu.memory_space<vmem>>, %arg5: memref<1x32xf32, #tpu.memory_space<vmem>>, %arg6: memref<1x160xf32, #tpu.memory_space<vmem>>, %arg7: memref<32x160xf32, #tpu.memory_space<vmem>>, %arg8: memref<160x160xf32, #tpu.memory_space<vmem>>, %arg9: memref<128x128xf32, #tpu.memory_space<vmem>>, %arg10: memref<32x64xf32, #tpu.memory_space<vmem>>, %arg11: memref<64x32xf32, #tpu.memory_space<vmem>>, %arg12: memref<1x32xf32, #tpu.memory_space<vmem>>, %arg13: memref<16x128xf32, #tpu.memory_space<vmem>>, %arg14: memref<16x32xf32, #tpu.memory_space<vmem>>) attributes {dimension_semantics = [#tpu.dimension_semantics<arbitrary>], iteration_bounds = array<i64: 1>, scalar_prefetch = 0 : i64, scratch_operands = 0 : i64, tpu.core_type = #tpu.core_type<tc>, window_params = [{pipeline_mode = #tpu.pipeline_mode<synchronous>, transform_indices = @transform_0, window_bounds = array<i64: 16, 32>}, {pipeline_mode = #tpu.pipeline_mode<synchronous>, transform_indices = @transform_1, window_bounds = array<i64: 16, 16>}, {pipeline_mode = #tpu.pipeline_mode<synchronous>, transform_indices = @transform_2, window_bounds = array<i64: 1, 32>}, {pipeline_mode = #tpu.pipeline_mode<synchronous>, transform_indices = @transform_3, window_bounds = array<i64: 1, 32>}, {pipeline_mode = #tpu.pipeline_mode<synchronous>, transform_indices = @transform_4, window_bounds = array<i64: 1, 32>}, {pipeline_mode = #tpu.pipeline_mode<synchronous>, transform_indices = @transform_5, window_bounds = array<i64: 1, 160>}, {pipeline_mode = #tpu.pipeline_mode<synchronous>, transform_indices = @transform_6, window_bounds = array<i64: 32, 160>}, {pipeline_mode = #tpu.pipeline_mode<synchronous>, transform_indices = @transform_7, window_bounds = array<i64: 160, 160>}, {pipeline_mode = #tpu.pipeline_mode<synchronous>, transform_indices = @transform_8, window_bounds = array<i64: 128, 128>}, {pipeline_mode = #tpu.pipeline_mode<synchronous>, transform_indices = @transform_9, window_bounds = array<i64: 32, 64>}, {pipeline_mode = #tpu.pipeline_mode<synchronous>, transform_indices = @transform_10, window_bounds = array<i64: 64, 32>}, {pipeline_mode = #tpu.pipeline_mode<synchronous>, transform_indices = @transform_11, window_bounds = array<i64: 1, 32>}, {pipeline_mode = #tpu.pipeline_mode<synchronous>, transform_indices = @transform_12, window_bounds = array<i64: 16, 128>}, {pipeline_mode = #tpu.pipeline_mode<synchronous>, transform_indices = @transform_13, window_bounds = array<i64: 16, 32>}]} {
    %c0 = arith.constant 0 : index
    %c0_0 = arith.constant 0 : index
    %0 = vector.load %arg1[%c0, %c0_0] : memref<16x32xf32, #tpu.memory_space<vmem>>, vector<16x32xf32>
    %cst = arith.constant dense<0.000000e+00> : vector<16xf32>
    %1 = vector.multi_reduction <add>, %0, %cst [1] : vector<16x32xf32> to vector<16xf32>
    %2 = vector.shape_cast %1 : vector<16xf32> to vector<16x1xf32>
    %cst_1 = arith.constant 3.200000e+01 : f32
    %3 = vector.broadcast %cst_1 : f32 to vector<16x1xf32>
    %4 = arith.divf %2, %3 : vector<16x1xf32>
    %5 = vector.broadcast %4 : vector<16x1xf32> to vector<16x32xf32>
    %6 = arith.subf %0, %5 : vector<16x32xf32>
    %7 = arith.mulf %6, %6 : vector<16x32xf32>
    %cst_2 = arith.constant dense<0.000000e+00> : vector<16xf32>
    %8 = vector.multi_reduction <add>, %7, %cst_2 [1] : vector<16x32xf32> to vector<16xf32>
    %9 = vector.shape_cast %8 : vector<16xf32> to vector<16x1xf32>
    %cst_3 = arith.constant 3.200000e+01 : f32
    %10 = vector.broadcast %cst_3 : f32 to vector<16x1xf32>
    %11 = arith.divf %9, %10 : vector<16x1xf32>
    %cst_4 = arith.constant 9.99999974E-6 : f32
    %12 = vector.broadcast %cst_4 : f32 to vector<16x1xf32>
    %13 = arith.addf %11, %12 : vector<16x1xf32>
    %14 = math.rsqrt %13 : vector<16x1xf32>
    %15 = vector.broadcast %14 : vector<16x1xf32> to vector<16x32xf32>
    %16 = arith.mulf %6, %15 : vector<16x32xf32>
    %c0_5 = arith.constant 0 : index
    %c0_6 = arith.constant 0 : index
    %17 = vector.load %arg3[%c0_5, %c0_6] : memref<1x32xf32, #tpu.memory_space<vmem>>, vector<1x32xf32>
    %18 = vector.broadcast %17 : vector<1x32xf32> to vector<16x32xf32>
    %19 = arith.mulf %16, %18 : vector<16x32xf32>
    %c0_7 = arith.constant 0 : index
    %c0_8 = arith.constant 0 : index
    %20 = vector.load %arg4[%c0_7, %c0_8] : memref<1x32xf32, #tpu.memory_space<vmem>>, vector<1x32xf32>
    %21 = vector.broadcast %20 : vector<1x32xf32> to vector<16x32xf32>
    %22 = arith.addf %19, %21 : vector<16x32xf32>
    %c0_9 = arith.constant 0 : index
    %c0_10 = arith.constant 0 : index
    %23 = vector.load %arg2[%c0_9, %c0_10] : memref<16x16xf32, #tpu.memory_space<vmem>>, vector<16x16xf32>
    %cst_11 = arith.constant dense<0.000000e+00> : vector<16x32xf32>
    %24 = tpu.matmul %23, %22, %cst_11 {dimension_numbers = #tpu.dot_dimension_numbers<[1], [0], [0], [1], [0, 0, 1, 1], [], []>} : vector<16x16xf32>, vector<16x32xf32>, vector<16x32xf32> -> vector<16x32xf32>
    %25 = arith.subf %24, %22 : vector<16x32xf32>
    %c0_12 = arith.constant 0 : index
    %c0_13 = arith.constant 0 : index
    %26 = vector.load %arg5[%c0_12, %c0_13] : memref<1x32xf32, #tpu.memory_space<vmem>>, vector<1x32xf32>
    %27 = vector.broadcast %26 : vector<1x32xf32> to vector<16x32xf32>
    %28 = arith.mulf %25, %27 : vector<16x32xf32>
    %29 = arith.addf %22, %28 : vector<16x32xf32>
    %c0_14 = arith.constant 0 : index
    %c0_15 = arith.constant 0 : index
    %30 = vector.load %arg7[%c0_14, %c0_15] : memref<32x160xf32, #tpu.memory_space<vmem>>, vector<32x160xf32>
    %cst_16 = arith.constant dense<0.000000e+00> : vector<16x160xf32>
    %31 = tpu.matmul %29, %30, %cst_16 {dimension_numbers = #tpu.dot_dimension_numbers<[1], [0], [0], [1], [0, 0, 1, 1], [], []>} : vector<16x32xf32>, vector<32x160xf32>, vector<16x160xf32> -> vector<16x160xf32>
    %32 = math.tanh %31 : vector<16x160xf32>
    %c0_17 = arith.constant 0 : index
    %c0_18 = arith.constant 0 : index
    %33 = vector.load %arg8[%c0_17, %c0_18] : memref<160x160xf32, #tpu.memory_space<vmem>>, vector<160x160xf32>
    %cst_19 = arith.constant dense<0.000000e+00> : vector<16x160xf32>
    %34 = tpu.matmul %32, %33, %cst_19 {dimension_numbers = #tpu.dot_dimension_numbers<[1], [0], [0], [1], [0, 0, 1, 1], [], []>} : vector<16x160xf32>, vector<160x160xf32>, vector<16x160xf32> -> vector<16x160xf32>
    %c0_20 = arith.constant 0 : index
    %c0_21 = arith.constant 0 : index
    %35 = vector.load %arg6[%c0_20, %c0_21] : memref<1x160xf32, #tpu.memory_space<vmem>>, vector<1x160xf32>
    %36 = vector.broadcast %35 : vector<1x160xf32> to vector<16x160xf32>
    %37 = arith.addf %34, %36 : vector<16x160xf32>
    %38 = vector.extract_strided_slice %37 {offsets = [0, 0], sizes = [16, 32], strides = [1, 1]} : vector<16x160xf32> to vector<16x32xf32>
    %39 = arith.mulf %25, %38 : vector<16x32xf32>
    %40 = arith.addf %22, %39 : vector<16x32xf32>
    %41 = vector.extract_strided_slice %37 {offsets = [0, 32], sizes = [16, 32], strides = [1, 1]} : vector<16x160xf32> to vector<16x32xf32>
    %42 = arith.mulf %25, %41 : vector<16x32xf32>
    %43 = arith.addf %22, %42 : vector<16x32xf32>
    %44 = vector.extract_strided_slice %37 {offsets = [0, 64], sizes = [16, 32], strides = [1, 1]} : vector<16x160xf32> to vector<16x32xf32>
    %45 = arith.mulf %25, %44 : vector<16x32xf32>
    %46 = arith.addf %22, %45 : vector<16x32xf32>
    %47 = vector.extract_strided_slice %37 {offsets = [0, 96], sizes = [16, 32], strides = [1, 1]} : vector<16x160xf32> to vector<16x32xf32>
    %48 = arith.mulf %25, %47 : vector<16x32xf32>
    %49 = arith.addf %22, %48 : vector<16x32xf32>
    %50 = vector.extract_strided_slice %37 {offsets = [0, 128], sizes = [16, 32], strides = [1, 1]} : vector<16x160xf32> to vector<16x32xf32>
    %51 = arith.mulf %25, %50 : vector<16x32xf32>
    %52 = arith.addf %22, %51 : vector<16x32xf32>
    %53 = tpu.concatenate %49, %43, %46, %52 in 1 : vector<16x32xf32>, vector<16x32xf32>, vector<16x32xf32>, vector<16x32xf32> -> vector<16x128xf32>
    %c0_22 = arith.constant 0 : index
    %c0_23 = arith.constant 0 : index
    %54 = vector.load %arg9[%c0_22, %c0_23] : memref<128x128xf32, #tpu.memory_space<vmem>>, vector<128x128xf32>
    %cst_24 = arith.constant dense<0.000000e+00> : vector<16x128xf32>
    %55 = tpu.matmul %53, %54, %cst_24 {dimension_numbers = #tpu.dot_dimension_numbers<[1], [0], [0], [1], [0, 0, 1, 1], [], []>} : vector<16x128xf32>, vector<128x128xf32>, vector<16x128xf32> -> vector<16x128xf32>
    %56 = tpu.iota {dimensions = array<i32: 1>} : vector<16x128xi32>
    %c96_i32 = arith.constant 96 : i32
    %57 = vector.broadcast %c96_i32 : i32 to vector<16x128xi32>
    %58 = arith.cmpi sge, %56, %57 : vector<16x128xi32>
    %59 = arith.negf %55 : vector<16x128xf32>
    %60 = math.exp %59 : vector<16x128xf32>
    %cst_25 = arith.constant 1.000000e+00 : f32
    %61 = vector.broadcast %cst_25 : f32 to vector<16x128xf32>
    %62 = arith.addf %61, %60 : vector<16x128xf32>
    %63 = arith.divf %61, %62 : vector<16x128xf32>
    %64 = arith.mulf %55, %63 : vector<16x128xf32>
    %65 = arith.select %58, %64, %55 : vector<16x128xi1>, vector<16x128xf32>
    %c0_26 = arith.constant 0 : index
    %c0_27 = arith.constant 0 : index
    %66 = vector.load %arg13[%c0_26, %c0_27] : memref<16x128xf32, #tpu.memory_space<vmem>>, vector<16x128xf32>
    tpu.vector_store %arg13[%c0_26, %c0_27], %65 {strides = array<i32>} : memref<16x128xf32, #tpu.memory_space<vmem>>, vector<16x128xf32>,
    %c0_28 = arith.constant 0 : index
    %c0_29 = arith.constant 0 : index
    %67 = vector.load %arg10[%c0_28, %c0_29] : memref<32x64xf32, #tpu.memory_space<vmem>>, vector<32x64xf32>
    %cst_30 = arith.constant dense<0.000000e+00> : vector<16x64xf32>
    %68 = tpu.matmul %40, %67, %cst_30 {dimension_numbers = #tpu.dot_dimension_numbers<[1], [0], [0], [1], [0, 0, 1, 1], [], []>} : vector<16x32xf32>, vector<32x64xf32>, vector<16x64xf32> -> vector<16x64xf32>
    %69 = math.tanh %68 : vector<16x64xf32>
    %c0_31 = arith.constant 0 : index
    %c0_32 = arith.constant 0 : index
    %70 = vector.load %arg11[%c0_31, %c0_32] : memref<64x32xf32, #tpu.memory_space<vmem>>, vector<64x32xf32>
    %cst_33 = arith.constant dense<0.000000e+00> : vector<16x32xf32>
    %71 = tpu.matmul %69, %70, %cst_33 {dimension_numbers = #tpu.dot_dimension_numbers<[1], [0], [0], [1], [0, 0, 1, 1], [], []>} : vector<16x64xf32>, vector<64x32xf32>, vector<16x32xf32> -> vector<16x32xf32>
    %c0_34 = arith.constant 0 : index
    %c0_35 = arith.constant 0 : index
    %72 = vector.load %arg12[%c0_34, %c0_35] : memref<1x32xf32, #tpu.memory_space<vmem>>, vector<1x32xf32>
    %73 = vector.broadcast %72 : vector<1x32xf32> to vector<16x32xf32>
    %74 = arith.addf %73, %71 : vector<16x32xf32>
    %75 = math.exp %74 : vector<16x32xf32>
    %cst_36 = arith.constant 0.000000e+00 : f32
    %76 = vector.broadcast %cst_36 : f32 to vector<16x32xf32>
    %77 = arith.subf %76, %75 : vector<16x32xf32>
    %78 = math.exp %77 : vector<16x32xf32>
    %c0_37 = arith.constant 0 : index
    %c0_38 = arith.constant 0 : index
    %79 = vector.load %arg14[%c0_37, %c0_38] : memref<16x32xf32, #tpu.memory_space<vmem>>, vector<16x32xf32>
    tpu.vector_store %arg14[%c0_37, %c0_38], %78 {strides = array<i32>} : memref<16x32xf32, #tpu.memory_space<vmem>>, vector<16x32xf32>,
    return
  }
  func.func @transform_0(%arg0: i32) -> (i32, i32) {
    %c0_i32 = arith.constant 0 : i32
    %c0_i32_0 = arith.constant 0 : i32
    %c0_i32_1 = arith.constant 0 : i32
    return %c0_i32, %c0_i32_0 : i32, i32
  }
  func.func @transform_1(%arg0: i32) -> (i32, i32) {
    %c0_i32 = arith.constant 0 : i32
    %c0_i32_0 = arith.constant 0 : i32
    %c0_i32_1 = arith.constant 0 : i32
    return %c0_i32, %c0_i32_0 : i32, i32
  }
  func.func @transform_2(%arg0: i32) -> (i32, i32) {
    %c0_i32 = arith.constant 0 : i32
    %c0_i32_0 = arith.constant 0 : i32
    %c0_i32_1 = arith.constant 0 : i32
    return %c0_i32, %c0_i32_0 : i32, i32
  }
  func.func @transform_3(%arg0: i32) -> (i32, i32) {
    %c0_i32 = arith.constant 0 : i32
    %c0_i32_0 = arith.constant 0 : i32
    %c0_i32_1 = arith.constant 0 : i32
    return %c0_i32, %c0_i32_0 : i32, i32
  }
  func.func @transform_4(%arg0: i32) -> (i32, i32) {
    %c0_i32 = arith.constant 0 : i32
    %c0_i32_0 = arith.constant 0 : i32
    %c0_i32_1 = arith.constant 0 : i32
    return %c0_i32, %c0_i32_0 : i32, i32
  }
  func.func @transform_5(%arg0: i32) -> (i32, i32) {
    %c0_i32 = arith.constant 0 : i32
    %c0_i32_0 = arith.constant 0 : i32
    %c0_i32_1 = arith.constant 0 : i32
    return %c0_i32, %c0_i32_0 : i32, i32
  }
  func.func @transform_6(%arg0: i32) -> (i32, i32) {
    %c0_i32 = arith.constant 0 : i32
    %c0_i32_0 = arith.constant 0 : i32
    %c0_i32_1 = arith.constant 0 : i32
    return %c0_i32, %c0_i32_0 : i32, i32
  }
  func.func @transform_7(%arg0: i32) -> (i32, i32) {
    %c0_i32 = arith.constant 0 : i32
    %c0_i32_0 = arith.constant 0 : i32
    %c0_i32_1 = arith.constant 0 : i32
    return %c0_i32, %c0_i32_0 : i32, i32
  }
  func.func @transform_8(%arg0: i32) -> (i32, i32) {
    %c0_i32 = arith.constant 0 : i32
    %c0_i32_0 = arith.constant 0 : i32
    %c0_i32_1 = arith.constant 0 : i32
    return %c0_i32, %c0_i32_0 : i32, i32
  }
  func.func @transform_9(%arg0: i32) -> (i32, i32) {
    %c0_i32 = arith.constant 0 : i32
    %c0_i32_0 = arith.constant 0 : i32
    %c0_i32_1 = arith.constant 0 : i32
    return %c0_i32, %c0_i32_0 : i32, i32
  }
  func.func @transform_10(%arg0: i32) -> (i32, i32) {
    %c0_i32 = arith.constant 0 : i32
    %c0_i32_0 = arith.constant 0 : i32
    %c0_i32_1 = arith.constant 0 : i32
    return %c0_i32, %c0_i32_0 : i32, i32
  }
  func.func @transform_11(%arg0: i32) -> (i32, i32) {
    %c0_i32 = arith.constant 0 : i32
    %c0_i32_0 = arith.constant 0 : i32
    %c0_i32_1 = arith.constant 0 : i32
    return %c0_i32, %c0_i32_0 : i32, i32
  }
  func.func @transform_12(%arg0: i32) -> (i32, i32) {
    %c0_i32 = arith.constant 0 : i32
    %c0_i32_0 = arith.constant 0 : i32
    %c0_i32_1 = arith.constant 0 : i32
    return %c0_i32, %c0_i32_0 : i32, i32
  }
  func.func @transform_13(%arg0: i32) -> (i32, i32) {
    %c0_i32 = arith.constant 0 : i32
    %c0_i32_0 = arith.constant 0 : i32
    %c0_i32_1 = arith.constant 0 : i32
    return %c0_i32, %c0_i32_0 : i32, i32
  }
}

module attributes {stable_mosaic.version = 11 : i64} {
  func.func @_finalize_cmix_kernel(%arg0: i32, %arg1: memref<16x32xf32, #tpu.memory_space<vmem>>, %arg2: memref<16x32xf32, #tpu.memory_space<vmem>>, %arg3: memref<16x128xf32, #tpu.memory_space<vmem>>, %arg4: memref<32x32xf32, #tpu.memory_space<vmem>>, %arg5: memref<1x32xf32, #tpu.memory_space<vmem>>, %arg6: memref<1x32xf32, #tpu.memory_space<vmem>>, %arg7: memref<32x32xf32, #tpu.memory_space<vmem>>, %arg8: memref<16x16xf32, #tpu.memory_space<vmem>>, %arg9: memref<1x32xf32, #tpu.memory_space<vmem>>, %arg10: memref<1x32xf32, #tpu.memory_space<vmem>>, %arg11: memref<1x32xf32, #tpu.memory_space<vmem>>, %arg12: memref<1x32xf32, #tpu.memory_space<vmem>>, %arg13: memref<32x128xf32, #tpu.memory_space<vmem>>, %arg14: memref<128x32xf32, #tpu.memory_space<vmem>>, %arg15: memref<32x32xf32, #tpu.memory_space<vmem>>, %arg16: memref<16x32xf32, #tpu.memory_space<vmem>>) attributes {dimension_semantics = [#tpu.dimension_semantics<arbitrary>], iteration_bounds = array<i64: 1>, scalar_prefetch = 0 : i64, scratch_operands = 0 : i64, tpu.core_type = #tpu.core_type<tc>, window_params = [{pipeline_mode = #tpu.pipeline_mode<synchronous>, transform_indices = @transform_0, window_bounds = array<i64: 16, 32>}, {pipeline_mode = #tpu.pipeline_mode<synchronous>, transform_indices = @transform_1, window_bounds = array<i64: 16, 32>}, {pipeline_mode = #tpu.pipeline_mode<synchronous>, transform_indices = @transform_2, window_bounds = array<i64: 16, 128>}, {pipeline_mode = #tpu.pipeline_mode<synchronous>, transform_indices = @transform_3, window_bounds = array<i64: 32, 32>}, {pipeline_mode = #tpu.pipeline_mode<synchronous>, transform_indices = @transform_4, window_bounds = array<i64: 1, 32>}, {pipeline_mode = #tpu.pipeline_mode<synchronous>, transform_indices = @transform_5, window_bounds = array<i64: 1, 32>}, {pipeline_mode = #tpu.pipeline_mode<synchronous>, transform_indices = @transform_6, window_bounds = array<i64: 32, 32>}, {pipeline_mode = #tpu.pipeline_mode<synchronous>, transform_indices = @transform_7, window_bounds = array<i64: 16, 16>}, {pipeline_mode = #tpu.pipeline_mode<synchronous>, transform_indices = @transform_8, window_bounds = array<i64: 1, 32>}, {pipeline_mode = #tpu.pipeline_mode<synchronous>, transform_indices = @transform_9, window_bounds = array<i64: 1, 32>}, {pipeline_mode = #tpu.pipeline_mode<synchronous>, transform_indices = @transform_10, window_bounds = array<i64: 1, 32>}, {pipeline_mode = #tpu.pipeline_mode<synchronous>, transform_indices = @transform_11, window_bounds = array<i64: 1, 32>}, {pipeline_mode = #tpu.pipeline_mode<synchronous>, transform_indices = @transform_12, window_bounds = array<i64: 32, 128>}, {pipeline_mode = #tpu.pipeline_mode<synchronous>, transform_indices = @transform_13, window_bounds = array<i64: 128, 32>}, {pipeline_mode = #tpu.pipeline_mode<synchronous>, transform_indices = @transform_14, window_bounds = array<i64: 32, 32>}, {pipeline_mode = #tpu.pipeline_mode<synchronous>, transform_indices = @transform_15, window_bounds = array<i64: 16, 32>}]} {
    %c0 = arith.constant 0 : index
    %c0_0 = arith.constant 0 : index
    %0 = vector.load %arg1[%c0, %c0_0] : memref<16x32xf32, #tpu.memory_space<vmem>>, vector<16x32xf32>
    %c0_1 = arith.constant 0 : index
    %c0_2 = arith.constant 0 : index
    %1 = vector.load %arg2[%c0_1, %c0_2] : memref<16x32xf32, #tpu.memory_space<vmem>>, vector<16x32xf32>
    %c0_3 = arith.constant 0 : index
    %c0_4 = arith.constant 0 : index
    %2 = vector.load %arg4[%c0_3, %c0_4] : memref<32x32xf32, #tpu.memory_space<vmem>>, vector<32x32xf32>
    %cst = arith.constant dense<0.000000e+00> : vector<16x32xf32>
    %3 = tpu.matmul %1, %2, %cst {dimension_numbers = #tpu.dot_dimension_numbers<[1], [0], [0], [1], [0, 0, 1, 1], [], []>} : vector<16x32xf32>, vector<32x32xf32>, vector<16x32xf32> -> vector<16x32xf32>
    %4 = arith.mulf %1, %1 : vector<16x32xf32>
    %c0_5 = arith.constant 0 : index
    %c0_6 = arith.constant 0 : index
    %5 = vector.load %arg4[%c0_5, %c0_6] : memref<32x32xf32, #tpu.memory_space<vmem>>, vector<32x32xf32>
    %cst_7 = arith.constant dense<0.000000e+00> : vector<16x32xf32>
    %6 = tpu.matmul %4, %5, %cst_7 {dimension_numbers = #tpu.dot_dimension_numbers<[1], [0], [0], [1], [0, 0, 1, 1], [], []>} : vector<16x32xf32>, vector<32x32xf32>, vector<16x32xf32> -> vector<16x32xf32>
    %7 = arith.mulf %3, %3 : vector<16x32xf32>
    %8 = arith.subf %6, %7 : vector<16x32xf32>
    %9 = arith.subf %1, %3 : vector<16x32xf32>
    %cst_8 = arith.constant 6.400000e-04 : f32
    %10 = vector.broadcast %cst_8 : f32 to vector<16x32xf32>
    %11 = arith.addf %8, %10 : vector<16x32xf32>
    %12 = math.rsqrt %11 : vector<16x32xf32>
    %13 = arith.mulf %9, %12 : vector<16x32xf32>
    %c0_9 = arith.constant 0 : index
    %c0_10 = arith.constant 0 : index
    %14 = vector.load %arg5[%c0_9, %c0_10] : memref<1x32xf32, #tpu.memory_space<vmem>>, vector<1x32xf32>
    %15 = vector.broadcast %14 : vector<1x32xf32> to vector<16x32xf32>
    %16 = arith.mulf %13, %15 : vector<16x32xf32>
    %c0_11 = arith.constant 0 : index
    %c0_12 = arith.constant 0 : index
    %17 = vector.load %arg6[%c0_11, %c0_12] : memref<1x32xf32, #tpu.memory_space<vmem>>, vector<1x32xf32>
    %18 = vector.broadcast %17 : vector<1x32xf32> to vector<16x32xf32>
    %19 = arith.addf %16, %18 : vector<16x32xf32>
    %c0_13 = arith.constant 0 : index
    %c96 = arith.constant 96 : index
    %20 = vector.load %arg3[%c0_13, %c96] : memref<16x128xf32, #tpu.memory_space<vmem>>, vector<16x32xf32>
    %21 = arith.mulf %19, %20 : vector<16x32xf32>
    %c0_14 = arith.constant 0 : index
    %c0_15 = arith.constant 0 : index
    %22 = vector.load %arg7[%c0_14, %c0_15] : memref<32x32xf32, #tpu.memory_space<vmem>>, vector<32x32xf32>
    %cst_16 = arith.constant dense<0.000000e+00> : vector<16x32xf32>
    %23 = tpu.matmul %21, %22, %cst_16 {dimension_numbers = #tpu.dot_dimension_numbers<[1], [0], [0], [1], [0, 0, 1, 1], [], []>} : vector<16x32xf32>, vector<32x32xf32>, vector<16x32xf32> -> vector<16x32xf32>
    %24 = arith.addf %0, %23 : vector<16x32xf32>
    %cst_17 = arith.constant dense<0.000000e+00> : vector<16xf32>
    %25 = vector.multi_reduction <add>, %24, %cst_17 [1] : vector<16x32xf32> to vector<16xf32>
    %26 = vector.shape_cast %25 : vector<16xf32> to vector<16x1xf32>
    %cst_18 = arith.constant 3.200000e+01 : f32
    %27 = vector.broadcast %cst_18 : f32 to vector<16x1xf32>
    %28 = arith.divf %26, %27 : vector<16x1xf32>
    %29 = vector.broadcast %28 : vector<16x1xf32> to vector<16x32xf32>
    %30 = arith.subf %24, %29 : vector<16x32xf32>
    %31 = arith.mulf %30, %30 : vector<16x32xf32>
    %cst_19 = arith.constant dense<0.000000e+00> : vector<16xf32>
    %32 = vector.multi_reduction <add>, %31, %cst_19 [1] : vector<16x32xf32> to vector<16xf32>
    %33 = vector.shape_cast %32 : vector<16xf32> to vector<16x1xf32>
    %cst_20 = arith.constant 3.200000e+01 : f32
    %34 = vector.broadcast %cst_20 : f32 to vector<16x1xf32>
    %35 = arith.divf %33, %34 : vector<16x1xf32>
    %cst_21 = arith.constant 9.99999974E-6 : f32
    %36 = vector.broadcast %cst_21 : f32 to vector<16x1xf32>
    %37 = arith.addf %35, %36 : vector<16x1xf32>
    %38 = math.rsqrt %37 : vector<16x1xf32>
    %39 = vector.broadcast %38 : vector<16x1xf32> to vector<16x32xf32>
    %40 = arith.mulf %30, %39 : vector<16x32xf32>
    %c0_22 = arith.constant 0 : index
    %c0_23 = arith.constant 0 : index
    %41 = vector.load %arg9[%c0_22, %c0_23] : memref<1x32xf32, #tpu.memory_space<vmem>>, vector<1x32xf32>
    %42 = vector.broadcast %41 : vector<1x32xf32> to vector<16x32xf32>
    %43 = arith.mulf %40, %42 : vector<16x32xf32>
    %c0_24 = arith.constant 0 : index
    %c0_25 = arith.constant 0 : index
    %44 = vector.load %arg10[%c0_24, %c0_25] : memref<1x32xf32, #tpu.memory_space<vmem>>, vector<1x32xf32>
    %45 = vector.broadcast %44 : vector<1x32xf32> to vector<16x32xf32>
    %46 = arith.addf %43, %45 : vector<16x32xf32>
    %c0_26 = arith.constant 0 : index
    %c0_27 = arith.constant 0 : index
    %47 = vector.load %arg8[%c0_26, %c0_27] : memref<16x16xf32, #tpu.memory_space<vmem>>, vector<16x16xf32>
    %cst_28 = arith.constant dense<0.000000e+00> : vector<16x32xf32>
    %48 = tpu.matmul %47, %46, %cst_28 {dimension_numbers = #tpu.dot_dimension_numbers<[1], [0], [0], [1], [0, 0, 1, 1], [], []>} : vector<16x16xf32>, vector<16x32xf32>, vector<16x32xf32> -> vector<16x32xf32>
    %49 = arith.subf %48, %46 : vector<16x32xf32>
    %c0_29 = arith.constant 0 : index
    %c0_30 = arith.constant 0 : index
    %50 = vector.load %arg11[%c0_29, %c0_30] : memref<1x32xf32, #tpu.memory_space<vmem>>, vector<1x32xf32>
    %51 = vector.broadcast %50 : vector<1x32xf32> to vector<16x32xf32>
    %52 = arith.mulf %49, %51 : vector<16x32xf32>
    %53 = arith.addf %46, %52 : vector<16x32xf32>
    %c0_31 = arith.constant 0 : index
    %c0_32 = arith.constant 0 : index
    %54 = vector.load %arg12[%c0_31, %c0_32] : memref<1x32xf32, #tpu.memory_space<vmem>>, vector<1x32xf32>
    %55 = vector.broadcast %54 : vector<1x32xf32> to vector<16x32xf32>
    %56 = arith.mulf %49, %55 : vector<16x32xf32>
    %57 = arith.addf %46, %56 : vector<16x32xf32>
    %c0_33 = arith.constant 0 : index
    %c0_34 = arith.constant 0 : index
    %58 = vector.load %arg13[%c0_33, %c0_34] : memref<32x128xf32, #tpu.memory_space<vmem>>, vector<32x128xf32>
    %cst_35 = arith.constant dense<0.000000e+00> : vector<16x128xf32>
    %59 = tpu.matmul %53, %58, %cst_35 {dimension_numbers = #tpu.dot_dimension_numbers<[1], [0], [0], [1], [0, 0, 1, 1], [], []>} : vector<16x32xf32>, vector<32x128xf32>, vector<16x128xf32> -> vector<16x128xf32>
    %cst_36 = arith.constant 0.000000e+00 : f32
    %60 = vector.broadcast %cst_36 : f32 to vector<16x128xf32>
    %61 = arith.maximumf %59, %60 : vector<16x128xf32>
    %62 = arith.mulf %61, %61 : vector<16x128xf32>
    %c0_37 = arith.constant 0 : index
    %c0_38 = arith.constant 0 : index
    %63 = vector.load %arg14[%c0_37, %c0_38] : memref<128x32xf32, #tpu.memory_space<vmem>>, vector<128x32xf32>
    %cst_39 = arith.constant dense<0.000000e+00> : vector<16x32xf32>
    %64 = tpu.matmul %62, %63, %cst_39 {dimension_numbers = #tpu.dot_dimension_numbers<[1], [0], [0], [1], [0, 0, 1, 1], [], []>} : vector<16x128xf32>, vector<128x32xf32>, vector<16x32xf32> -> vector<16x32xf32>
    %c0_40 = arith.constant 0 : index
    %c0_41 = arith.constant 0 : index
    %65 = vector.load %arg15[%c0_40, %c0_41] : memref<32x32xf32, #tpu.memory_space<vmem>>, vector<32x32xf32>
    %cst_42 = arith.constant dense<0.000000e+00> : vector<16x32xf32>
    %66 = tpu.matmul %57, %65, %cst_42 {dimension_numbers = #tpu.dot_dimension_numbers<[1], [0], [0], [1], [0, 0, 1, 1], [], []>} : vector<16x32xf32>, vector<32x32xf32>, vector<16x32xf32> -> vector<16x32xf32>
    %67 = arith.negf %66 : vector<16x32xf32>
    %68 = math.exp %67 : vector<16x32xf32>
    %cst_43 = arith.constant 1.000000e+00 : f32
    %69 = vector.broadcast %cst_43 : f32 to vector<16x32xf32>
    %70 = arith.addf %69, %68 : vector<16x32xf32>
    %71 = arith.divf %69, %70 : vector<16x32xf32>
    %72 = arith.mulf %71, %64 : vector<16x32xf32>
    %73 = arith.addf %24, %72 : vector<16x32xf32>
    %c0_44 = arith.constant 0 : index
    %c0_45 = arith.constant 0 : index
    %74 = vector.load %arg16[%c0_44, %c0_45] : memref<16x32xf32, #tpu.memory_space<vmem>>, vector<16x32xf32>
    tpu.vector_store %arg16[%c0_44, %c0_45], %73 {strides = array<i32>} : memref<16x32xf32, #tpu.memory_space<vmem>>, vector<16x32xf32>,
    return
  }
  func.func @transform_0(%arg0: i32) -> (i32, i32) {
    %c0_i32 = arith.constant 0 : i32
    %c0_i32_0 = arith.constant 0 : i32
    %c0_i32_1 = arith.constant 0 : i32
    return %c0_i32, %c0_i32_0 : i32, i32
  }
  func.func @transform_1(%arg0: i32) -> (i32, i32) {
    %c0_i32 = arith.constant 0 : i32
    %c0_i32_0 = arith.constant 0 : i32
    %c0_i32_1 = arith.constant 0 : i32
    return %c0_i32, %c0_i32_0 : i32, i32
  }
  func.func @transform_2(%arg0: i32) -> (i32, i32) {
    %c0_i32 = arith.constant 0 : i32
    %c0_i32_0 = arith.constant 0 : i32
    %c0_i32_1 = arith.constant 0 : i32
    return %c0_i32, %c0_i32_0 : i32, i32
  }
  func.func @transform_3(%arg0: i32) -> (i32, i32) {
    %c0_i32 = arith.constant 0 : i32
    %c0_i32_0 = arith.constant 0 : i32
    %c0_i32_1 = arith.constant 0 : i32
    return %c0_i32, %c0_i32_0 : i32, i32
  }
  func.func @transform_4(%arg0: i32) -> (i32, i32) {
    %c0_i32 = arith.constant 0 : i32
    %c0_i32_0 = arith.constant 0 : i32
    %c0_i32_1 = arith.constant 0 : i32
    return %c0_i32, %c0_i32_0 : i32, i32
  }
  func.func @transform_5(%arg0: i32) -> (i32, i32) {
    %c0_i32 = arith.constant 0 : i32
    %c0_i32_0 = arith.constant 0 : i32
    %c0_i32_1 = arith.constant 0 : i32
    return %c0_i32, %c0_i32_0 : i32, i32
  }
  func.func @transform_6(%arg0: i32) -> (i32, i32) {
    %c0_i32 = arith.constant 0 : i32
    %c0_i32_0 = arith.constant 0 : i32
    %c0_i32_1 = arith.constant 0 : i32
    return %c0_i32, %c0_i32_0 : i32, i32
  }
  func.func @transform_7(%arg0: i32) -> (i32, i32) {
    %c0_i32 = arith.constant 0 : i32
    %c0_i32_0 = arith.constant 0 : i32
    %c0_i32_1 = arith.constant 0 : i32
    return %c0_i32, %c0_i32_0 : i32, i32
  }
  func.func @transform_8(%arg0: i32) -> (i32, i32) {
    %c0_i32 = arith.constant 0 : i32
    %c0_i32_0 = arith.constant 0 : i32
    %c0_i32_1 = arith.constant 0 : i32
    return %c0_i32, %c0_i32_0 : i32, i32
  }
  func.func @transform_9(%arg0: i32) -> (i32, i32) {
    %c0_i32 = arith.constant 0 : i32
    %c0_i32_0 = arith.constant 0 : i32
    %c0_i32_1 = arith.constant 0 : i32
    return %c0_i32, %c0_i32_0 : i32, i32
  }
  func.func @transform_10(%arg0: i32) -> (i32, i32) {
    %c0_i32 = arith.constant 0 : i32
    %c0_i32_0 = arith.constant 0 : i32
    %c0_i32_1 = arith.constant 0 : i32
    return %c0_i32, %c0_i32_0 : i32, i32
  }
  func.func @transform_11(%arg0: i32) -> (i32, i32) {
    %c0_i32 = arith.constant 0 : i32
    %c0_i32_0 = arith.constant 0 : i32
    %c0_i32_1 = arith.constant 0 : i32
    return %c0_i32, %c0_i32_0 : i32, i32
  }
  func.func @transform_12(%arg0: i32) -> (i32, i32) {
    %c0_i32 = arith.constant 0 : i32
    %c0_i32_0 = arith.constant 0 : i32
    %c0_i32_1 = arith.constant 0 : i32
    return %c0_i32, %c0_i32_0 : i32, i32
  }
  func.func @transform_13(%arg0: i32) -> (i32, i32) {
    %c0_i32 = arith.constant 0 : i32
    %c0_i32_0 = arith.constant 0 : i32
    %c0_i32_1 = arith.constant 0 : i32
    return %c0_i32, %c0_i32_0 : i32, i32
  }
  func.func @transform_14(%arg0: i32) -> (i32, i32) {
    %c0_i32 = arith.constant 0 : i32
    %c0_i32_0 = arith.constant 0 : i32
    %c0_i32_1 = arith.constant 0 : i32
    return %c0_i32, %c0_i32_0 : i32, i32
  }
  func.func @transform_15(%arg0: i32) -> (i32, i32) {
    %c0_i32 = arith.constant 0 : i32
    %c0_i32_0 = arith.constant 0 : i32
    %c0_i32_1 = arith.constant 0 : i32
    return %c0_i32, %c0_i32_0 : i32, i32
  }
}

module attributes {stable_mosaic.version = 11 : i64} {
  func.func @_head_kernel(%arg0: i32, %arg1: memref<16x32xf32, #tpu.memory_space<vmem>>, %arg2: memref<1x32xf32, #tpu.memory_space<vmem>>, %arg3: memref<1x32xf32, #tpu.memory_space<vmem>>, %arg4: memref<32x64xf32, #tpu.memory_space<vmem>>, %arg5: memref<16x64xf32, #tpu.memory_space<vmem>>) attributes {dimension_semantics = [#tpu.dimension_semantics<arbitrary>], iteration_bounds = array<i64: 1>, scalar_prefetch = 0 : i64, scratch_operands = 0 : i64, tpu.core_type = #tpu.core_type<tc>, window_params = [{pipeline_mode = #tpu.pipeline_mode<synchronous>, transform_indices = @transform_0, window_bounds = array<i64: 16, 32>}, {pipeline_mode = #tpu.pipeline_mode<synchronous>, transform_indices = @transform_1, window_bounds = array<i64: 1, 32>}, {pipeline_mode = #tpu.pipeline_mode<synchronous>, transform_indices = @transform_2, window_bounds = array<i64: 1, 32>}, {pipeline_mode = #tpu.pipeline_mode<synchronous>, transform_indices = @transform_3, window_bounds = array<i64: 32, 64>}, {pipeline_mode = #tpu.pipeline_mode<synchronous>, transform_indices = @transform_4, window_bounds = array<i64: 16, 64>}]} {
    %c0 = arith.constant 0 : index
    %c0_0 = arith.constant 0 : index
    %0 = vector.load %arg1[%c0, %c0_0] : memref<16x32xf32, #tpu.memory_space<vmem>>, vector<16x32xf32>
    %cst = arith.constant dense<0.000000e+00> : vector<16xf32>
    %1 = vector.multi_reduction <add>, %0, %cst [1] : vector<16x32xf32> to vector<16xf32>
    %2 = vector.shape_cast %1 : vector<16xf32> to vector<16x1xf32>
    %cst_1 = arith.constant 3.200000e+01 : f32
    %3 = vector.broadcast %cst_1 : f32 to vector<16x1xf32>
    %4 = arith.divf %2, %3 : vector<16x1xf32>
    %5 = vector.broadcast %4 : vector<16x1xf32> to vector<16x32xf32>
    %6 = arith.subf %0, %5 : vector<16x32xf32>
    %7 = arith.mulf %6, %6 : vector<16x32xf32>
    %cst_2 = arith.constant dense<0.000000e+00> : vector<16xf32>
    %8 = vector.multi_reduction <add>, %7, %cst_2 [1] : vector<16x32xf32> to vector<16xf32>
    %9 = vector.shape_cast %8 : vector<16xf32> to vector<16x1xf32>
    %cst_3 = arith.constant 3.200000e+01 : f32
    %10 = vector.broadcast %cst_3 : f32 to vector<16x1xf32>
    %11 = arith.divf %9, %10 : vector<16x1xf32>
    %cst_4 = arith.constant 9.99999974E-6 : f32
    %12 = vector.broadcast %cst_4 : f32 to vector<16x1xf32>
    %13 = arith.addf %11, %12 : vector<16x1xf32>
    %14 = math.rsqrt %13 : vector<16x1xf32>
    %15 = vector.broadcast %14 : vector<16x1xf32> to vector<16x32xf32>
    %16 = arith.mulf %6, %15 : vector<16x32xf32>
    %c0_5 = arith.constant 0 : index
    %c0_6 = arith.constant 0 : index
    %17 = vector.load %arg2[%c0_5, %c0_6] : memref<1x32xf32, #tpu.memory_space<vmem>>, vector<1x32xf32>
    %18 = vector.broadcast %17 : vector<1x32xf32> to vector<16x32xf32>
    %19 = arith.mulf %16, %18 : vector<16x32xf32>
    %c0_7 = arith.constant 0 : index
    %c0_8 = arith.constant 0 : index
    %20 = vector.load %arg3[%c0_7, %c0_8] : memref<1x32xf32, #tpu.memory_space<vmem>>, vector<1x32xf32>
    %21 = vector.broadcast %20 : vector<1x32xf32> to vector<16x32xf32>
    %22 = arith.addf %19, %21 : vector<16x32xf32>
    %c0_9 = arith.constant 0 : index
    %c0_10 = arith.constant 0 : index
    %23 = vector.load %arg4[%c0_9, %c0_10] : memref<32x64xf32, #tpu.memory_space<vmem>>, vector<32x64xf32>
    %cst_11 = arith.constant dense<0.000000e+00> : vector<16x64xf32>
    %24 = tpu.matmul %22, %23, %cst_11 {dimension_numbers = #tpu.dot_dimension_numbers<[1], [0], [0], [1], [0, 0, 1, 1], [], []>} : vector<16x32xf32>, vector<32x64xf32>, vector<16x64xf32> -> vector<16x64xf32>
    %c0_12 = arith.constant 0 : index
    %c0_13 = arith.constant 0 : index
    %25 = vector.load %arg5[%c0_12, %c0_13] : memref<16x64xf32, #tpu.memory_space<vmem>>, vector<16x64xf32>
    tpu.vector_store %arg5[%c0_12, %c0_13], %24 {strides = array<i32>} : memref<16x64xf32, #tpu.memory_space<vmem>>, vector<16x64xf32>,
    return
  }
  func.func @transform_0(%arg0: i32) -> (i32, i32) {
    %c0_i32 = arith.constant 0 : i32
    %c0_i32_0 = arith.constant 0 : i32
    %c0_i32_1 = arith.constant 0 : i32
    return %c0_i32, %c0_i32_0 : i32, i32
  }
  func.func @transform_1(%arg0: i32) -> (i32, i32) {
    %c0_i32 = arith.constant 0 : i32
    %c0_i32_0 = arith.constant 0 : i32
    %c0_i32_1 = arith.constant 0 : i32
    return %c0_i32, %c0_i32_0 : i32, i32
  }
  func.func @transform_2(%arg0: i32) -> (i32, i32) {
    %c0_i32 = arith.constant 0 : i32
    %c0_i32_0 = arith.constant 0 : i32
    %c0_i32_1 = arith.constant 0 : i32
    return %c0_i32, %c0_i32_0 : i32, i32
  }
  func.func @transform_3(%arg0: i32) -> (i32, i32) {
    %c0_i32 = arith.constant 0 : i32
    %c0_i32_0 = arith.constant 0 : i32
    %c0_i32_1 = arith.constant 0 : i32
    return %c0_i32, %c0_i32_0 : i32, i32
  }
  func.func @transform_4(%arg0: i32) -> (i32, i32) {
    %c0_i32 = arith.constant 0 : i32
    %c0_i32_0 = arith.constant 0 : i32
    %c0_i32_1 = arith.constant 0 : i32
    return %c0_i32, %c0_i32_0 : i32, i32
  }
}

</mosaic_0001>

<bundles_post_ra>
// kernel: rwkv_encoder_forward.8
= control target key start
LH: loop header
LB: loop body
LE: loop exit
PB: predicated region body
PF: predicated region fallthrough
CT: control target
= control target key end

     0   :  { %vm16_vm0 = vcmask 261120   ;;  %v95_v4 = vmov 32.0   ;;  %s140_s0 = inlined_call_operand.vmem [shape: f32[16,32], index: 0, kind: input, shape index: {}]   ;;  %s141_s1 = inlined_call_operand.vmem [shape: f32[1,32], index: 1, kind: input, shape index: {}]   ;;  %s142_s2 = inlined_call_operand.vmem [shape: f32[1,32], index: 2, kind: input, shape index: {}]   ;;  %s143_s3 = inlined_call_operand.vmem [shape: f32[16,32], index: 3, kind: output, shape index: {}]  }
   0x1   :  { %v14_v0 = vld [vmem:[%s140_s0] sm:$0xff]  ;;  %v15_v2 = vld [vmem:[%s140_s0 + $0x8] sm:$0xff]  ;;  %89 = vrcp.f32 %v95_v4 }
   0x2   :  { %v17_v1 = vsel %vm16_vm0, %v14_v0, 0.0  ;;  %v20_v3 = vsel %vm16_vm0, %v15_v2, 0.0  ;;  %v87_v35 = vld [vmem:[%s141_s1] ss:$0 sm:$0xff] }
   0x3   :  { %18 = vadd.xlane.f32.xlu0 %v17_v1  ;;  %v88_v38 = vld [vmem:[%s142_s2] ss:$0 sm:$0xff] }
   0x7   :  { %v90_v5 = vpop.eup %89 }
   0x8   :  { %v24_v6 = vmul.f32 32.0, %v90_v5  ;;  %vm28_vm1 = vweird.f32 %v90_v5 }
   0xa   :  { %v25_v7 = vsub.f32 1.0, %v24_v6 }
   0xb   :  { %21 = vadd.xlane.f32.xlu0 %v20_v3 }
   0xc   :  { %v26_v8 = vmul.f32 %v90_v5, %v25_v7 }
   0xe   :  { %v27_v9 = vadd.f32 %v90_v5, %v26_v8 }
  0x10   :  { %v29_v10 = vsel %vm28_vm1, %v90_v5, %v27_v9 }
  0x76   :  { %v19_v11 = vpop.xlane.xlu0 %18 }
  0x77   :  { %v30_v12 = vmul.f32 %v29_v10, %v19_v11 }
  0x79   :  { %v32_v13 = vsub.f32 %v14_v0, %v30_v12 }
  0x7b   :  { %v34_v14 = vmul.f32 %v32_v13, %v32_v13 }
  0x7d   :  { %v36_v15 = vsel %vm16_vm0, %v34_v14, 0.0 }
  0x7e   :  { %37 = vadd.xlane.f32.xlu1 %v36_v15  ;;  %v22_v16 = vpop.xlane.xlu0 %21 }
  0x7f   :  { %v31_v17 = vmul.f32 %v29_v10, %v22_v16 }
  0x81   :  { %v33_v18 = vsub.f32 %v15_v2, %v31_v17 }
  0x83   :  { %v35_v19 = vmul.f32 %v33_v18, %v33_v18 }
  0x85   :  { %v39_v20 = vsel %vm16_vm0, %v35_v19, 0.0 }
  0x86   :  { %40 = vadd.xlane.f32.xlu1 %v39_v20 }
  0xf1   :  { %v38_v21 = vpop.xlane.xlu1 %37 }
  0xf2   :  { %v42_v22 = vmul.f32 %v38_v21, %v29_v10 }
  0xf4   :  { %v44_v23 = vadd.f32 1e-05, %v42_v22 }
  0xf6   :  { %91 = vrsqrt.f32 %v44_v23  ;;  %vm52_vm3 = vweird.f32 %v44_v23 }
  0xf9   :  { %v41_v24 = vpop.xlane.xlu1 %40 }
  0xfa   :  { %v43_v25 = vmul.f32 %v41_v24, %v29_v10 }
  0xfc   :  { %v92_v26 = vpop.eup %91  ;;  %v45_v27 = vadd.f32 1e-05, %v43_v25 }
  0xfd   :  { %v47_v28 = vmul.f32 %v92_v26, %v44_v23  ;;  %vm53_vm2 = vweird.f32 %v92_v26 }
  0xfe   :  { %93 = vrsqrt.f32 %v45_v27  ;;  %vm54_vm4 = vmor %vm52_vm3, %vm53_vm2  ;;  %vm62_vm6 = vweird.f32 %v45_v27 }
  0xff   :  { %v48_v29 = vmul.f32 %v92_v26, %v47_v28 }
 0x101   :  { %v49_v30 = vmul.f32 0.5, %v48_v29 }
 0x103   :  { %v50_v31 = vsub.f32 1.5, %v49_v30 }
 0x104   :  { %v94_v32 = vpop.eup %93 }
 0x105   :  { %v51_v33 = vmul.f32 %v92_v26, %v50_v31  ;;  %v57_v34 = vmul.f32 %v94_v32, %v45_v27  ;;  %vm63_vm5 = vweird.f32 %v94_v32 }
 0x106   :  { %vm64_vm7 = vmor %vm62_vm6, %vm63_vm5 }
 0x107   :  { %v55_v36 = vsel %vm54_vm4, %v92_v26, %v51_v33  ;;  %v58_v37 = vmul.f32 %v94_v32, %v57_v34 }
 0x108   :  { %v66_v39 = vmul.f32 %v55_v36, %v32_v13 }
 0x109   :  { %v59_v40 = vmul.f32 0.5, %v58_v37 }
 0x10a   :  { %v72_v41 = vmul.f32 %v87_v35, %v66_v39 }
 0x10b   :  { %v60_v42 = vsub.f32 1.5, %v59_v40 }
 0x10c   :  { %v78_v43 = vadd.f32 %v88_v38, %v72_v41 }
 0x10d   :  { %v61_v44 = vmul.f32 %v94_v32, %v60_v42 }
 0x10e   :  { %80 = vst.msk [vmem:[%s143_s3] sm:$0xff] %vm16_vm0, %v78_v43 }
 0x10f   :  { %v65_v45 = vsel %vm64_vm7, %v94_v32, %v61_v44 }
 0x110   :  { %v67_v46 = vmul.f32 %v65_v45, %v33_v18 }
 0x112   :  { %v73_v47 = vmul.f32 %v87_v35, %v67_v46 }
 0x114   :  { %v79_v48 = vadd.f32 %v88_v38, %v73_v47 }
 0x116   :  { %81 = vst.msk [vmem:[%s143_s3 + $0x8] sm:$0xff] %vm16_vm0, %v79_v48 }

// kernel: rwkv_encoder_forward.10
= control target key start
LH: loop header
LB: loop body
LE: loop exit
PB: predicated region body
PF: predicated region fallthrough
CT: control target
= control target key end

     0   :  { %s1050_s24 = smov [#allocation3]   ;;  %s1305_s0 = inlined_call_operand.vmem [shape: s32[2,8], index: 0, kind: input, shape index: {}]   ;;  %s1306_s1 = inlined_call_operand.vmem [shape: f32[2,8,2,16], index: 1, kind: input, shape index: {}]   ;;  %s1307_s2 = inlined_call_operand.vmem [shape: f32[2,8,2,16], index: 2, kind: input, shape index: {}]   ;;  %s1308_s3 = inlined_call_operand.vmem [shape: f32[2,8,2,16], index: 3, kind: input, shape index: {}]   ;;  %s1309_s4 = inlined_call_operand.vmem [shape: f32[2,8,2,16], index: 4, kind: input, shape index: {}]   ;;  %s1310_s5 = inlined_call_operand.vmem [shape: f32[2,16], index: 5, kind: input, shape index: {}]   ;;  %s1311_s6 = inlined_call_operand.vmem [shape: f32[2,8,2,16], index: 6, kind: output, shape index: {}]  }
   0x1   :  { %s12_s23 = sshll.u32 %s1305_s0, 4  ;;  %s13_s23 = int_to_ptr.vmem [resolvable:$true] %s12_s23 }
   0x2   :  { %15 = dma.vmem_to_smem %s13_s23, 32, %s1050_s24, [#allocation2] }
   0x3   :  { %1004 = dma.done.wait [#allocation2], 32 }
   0x4   :  { %1005 = vsyncadd [#allocation2], 4294967264 }
   0x5   :  { %18 = sfence }
   0x6   :  { %s1089_s25 = smov 0  }
   0x7 LB: > { %s1095_s26 = sadd.s32 4294967295, %s1008_s25   ;;  %p814_p0 = scmp.ge.s32.totalorder %s1008_s25, 1  ;;  %s1008_s25 = sphi %s1089_s25, %s24_s25  }
   0x8   : > { %p226_p1 = scmp.lt.s32.totalorder %s1008_s25, 3 }
   0xa   : > { %p227_p2 = pnand %p814_p0, %p226_p1 }
   0xb   : > { %p269_p3 = scmp.lt.s32.totalorder (!%p227_p2), %s1095_s26, 1  ;;  %s1139_s21 = smov (!%p227_p2), 0  }
   0xc   : > { %230 = sbr.rel (%p227_p2) target bundleno = 412 (0x19c), region = 40 }
  0x11   : > { %v1103_v0 = vld [vmem:[%s1310_s5] sm:$0x3]  ;;  %s270_s28 = scalar_select %p269_p3, %s1095_s26, 1  ;;  %v1131_v1 = vmov 0.0   ;;  %v1133_v2 = vmov 0.0   ;;  %v1135_v3 = vmov 0.0  }
  0x12   : > { %v1137_v4 = vmov 0.0  }
  0x13   : > { %s830_s29 = sshll.u32 %s270_s28, 4 }
  0x14   : > { %s1109_s8 = scalar_lea.vmem %s1306_s1, %s830_s29  ;;  %s1114_s11 = scalar_lea.vmem %s1307_s2, %s830_s29 }
  0x15   : > { %s1119_s14 = scalar_lea.vmem %s1308_s3, %s830_s29  ;;  %s1124_s17 = scalar_lea.vmem %s1309_s4, %s830_s29 }
  0x16   : > { %s1129_s20 = scalar_lea.vmem %s1311_s6, %s830_s29 }
  0x17 LB: >> { %v315_v5 = vlaneseq  ;;  %s1159_s22 = sshll.u32 %s1028_s21, 1  ;;  %v1175_v13 = vperm.slane %v1103_v0, 0  ;;  %v1178_v14 = vperm.slane %v1103_v0, 1  ;;  %vm414_vm0 = vcmask 130048   ;;  %s300_s21 = sadd.s32 1, %s1028_s21   ;;  %s1028_s21 = sphi %s1139_s21, %s300_s21   ;;  %v1024_v4 = vphi %v1137_v4, %v1313_v4   ;;  %v1020_v3 = vphi %v1135_v3, %v464_v3   ;;  %v1016_v2 = vphi %v1133_v2, %v465_v2   ;;  %v1012_v1 = vphi %v1131_v1, %v1312_v1  }
  0x18   : >> { %s308_s23 = scalar_lea.vmem %s1114_s11, %s1159_s22  ;;  %s306_s24 = scalar_lea.vmem %s1109_s8, %s1159_s22  ;;  %vm469_vm1 = vcmask 1041409   ;;  %vm473_vm2 = vcmask 123904  }
  0x19   : >> { %v1156_v6 = vshrl.u32 %v315_v5, 7  ;;  %v309_v8 = vld [vmem:[%s308_s23] sm:$0x3]  ;;  %s312_s0 = scalar_lea.vmem %s1124_s17, %s1159_s22  ;;  %s310_s27 = scalar_lea.vmem %s1119_s14, %s1159_s22 }
  0x1a   : >> { %v307_v9 = vld [vmem:[%s306_s24] sm:$0x3]  ;;  %v327_v10 = vperm.slane %v309_v8, 1  ;;  %v314_v12 = vperm.slane %v309_v8, 0  ;;  %s472_s28 = scalar_lea.vmem %s1129_s20, %s1159_s22  ;;  %p297_p4 = scmp.ge.s32.totalorder %s300_s21, 8  }
  0x1b   : >> { %927 = vset.pattern.permute.xlu2 %v1156_v6  ;;  %926 = vset.pattern.permute.xlu1 %v1156_v6  ;;  %v1166_v7 = vadd.s32 8, %v1156_v6  ;;  %v350_v11 = vperm.slane %v307_v9, 0  ;;  %v313_v15 = vld [vmem:[%s312_s0] sm:$0x3]  ;;  %v363_v16 = vperm.slane %v307_v9, 1  ;;  %s1229_s29 = smov (%p297_p4), 0  }
  0x1c   : >> { %v433_v17 = vperm.slane %v313_v15, 0  ;;  %v446_v18 = vperm.slane %v313_v15, 1  ;;  %v311_v25 = vld [vmem:[%s310_s27] sm:$0x3] }
  0x1d   : >> { %924 = vset.pattern.permute.xlu0 %v1166_v7  ;;  %v342_v26 = vperm.slane %v311_v25, 0  ;;  %v341_v37 = vrot.slane %v311_v25, 1  ;;  %v1225_v25 = vmov (%p297_p4), 0.0  }
  0x1f   : >> { %v343_v40 = vperm.slane %v341_v37, 0 }
  0x23   : >> { %332 = vperm.xlu1 %926, %v327_v10   ;;  %355 = vperm.xlu2 %927, %v350_v11  }
  0x25   : >> { %325 = vperm.xlu0 %924, %v314_v12  }
  0x2b   : >> { %928 = vset.pattern.permute.xlu1 %v1166_v7  ;;  %930 = vset.pattern.permute.xlu2 %v1166_v7 }
  0x2d   : >> { %925 = vset.pattern.permute.xlu0 %v1156_v6 }
  0x33   : >> { %338 = vperm.xlu1 %928, %v327_v10   ;;  %361 = vperm.xlu2 %930, %v350_v11  }
  0x35   : >> { %319 = vperm.xlu0 %925, %v314_v12  }
  0x3b   : >> { %929 = vset.pattern.permute.xlu1 %v1156_v6  ;;  %387 = vperm.xlu2 %930, %v1175_v13  }
  0x3d   : >> { %394 = vperm.xlu0 %925, %v1178_v14  }
  0x43   : >> { %381 = vperm.xlu1 %929, %v1175_v13   ;;  %932 = vset.pattern.permute.xlu2 %v1156_v6 }
  0x45   : >> { %933 = vset.pattern.permute.xlu0 %v1166_v7 }
  0x4b   : >> { %931 = vset.pattern.permute.xlu1 %v1166_v7  ;;  %368 = vperm.xlu2 %932, %v363_v16  }
  0x4d   : >> { %444 = vperm.xlu0 %933, %v433_v17  }
  0x53   : >> { %400 = vperm.xlu1 %931, %v1178_v14   ;;  %438 = vperm.xlu2 %932, %v433_v17  }
  0x5b   : >> { %374 = vperm.xlu1 %931, %v363_v16   ;;  %935 = vset.pattern.permute.xlu2 %v1166_v7 }
  0x63   : >> { %934 = vset.pattern.permute.xlu1 %v1156_v6  ;;  %457 = vperm.xlu2 %935, %v446_v18  }
  0x6b   : >> { %451 = vperm.xlu1 %934, %v446_v18  }
  0x7d   : >> { %v356_v19 = vpop.permute.xlu2 %355 }
  0x8d   : >> { %v362_v20 = vpop.permute.xlu2 %361 }
  0x95   : >> { %v388_v21 = vpop.permute.xlu2 %387  ;;  %v333_v23 = vpop.permute.xlu1 %332 }
  0x96   : >> { %v348_v50 = vmul.f32 %v343_v40, %v333_v23  ;;  %v1221_v23 = vmov (%p297_p4), 0.0  }
  0x97   : >> { %v326_v22 = vpop.permute.xlu0 %325 }
  0x98   : >> { %v347_v33 = vmul.f32 %v342_v26, %v326_v22 }
  0x9a   : >> { %v403_v38 = vmul.f32 %v388_v21, %v347_v33 }
  0x9c   : >> { %v407_v41 = vadd.f32 %v1020_v3, %v403_v38 }
  0x9e   : >> { %v411_v48 = vmul.f32 %v407_v41, %v362_v20 }
  0xa0   : >> { %v416_v53 = vsel %vm414_vm0, %v411_v48, 0.0 }
  0xa5   : >> { %v369_v24 = vpop.permute.xlu2 %368  ;;  %v339_v27 = vpop.permute.xlu1 %338 }
  0xa6   : >> { %v349_v43 = vmul.f32 %v343_v40, %v339_v27 }
  0xa7   : >> { %v320_v28 = vpop.permute.xlu0 %319 }
  0xa8   : >> { %v346_v30 = vmul.f32 %v342_v26, %v320_v28  ;;  %v1227_v26 = vmov (%p297_p4), 0.0  }
  0xad   : >> { %v439_v29 = vpop.permute.xlu2 %438 }
  0xae   : >> { %v459_v31 = vmul.f32 %v1024_v4, %v439_v29 }
  0xaf   : >> { %v395_v36 = vpop.permute.xlu0 %394 }
  0xb0   : >> { %v463_v32 = vadd.f32 %v459_v31, %v346_v30   ;;  %v404_v52 = vmul.f32 %v395_v36, %v348_v50 }
  0xb2   : >> { %v408_v57 = vadd.f32 %v1016_v2, %v404_v52 }
  0xb4   : >> { %v412_v60 = vmul.f32 %v408_v57, %v369_v24  ;;  %v1223_v24 = vmov (%p297_p4), 0.0  }
  0xb5   : >> { %v382_v34 = vpop.permute.xlu1 %381 }
  0xb6   : >> { %v402_v35 = vmul.f32 %v382_v34, %v346_v30  ;;  %v424_v5 = vsel %vm414_vm0, %v412_v60, 0.0 }
  0xb8   : >> { %v406_v39 = vadd.f32 %v1024_v4, %v402_v35 }
  0xba   : >> { %v410_v44 = vmul.f32 %v406_v39, %v356_v19 }
  0xbc   : >> { %v415_v51 = vsel %vm414_vm0, %v410_v44, 0.0 }
  0xbd   : >> { %v458_v42 = vpop.permute.xlu2 %457  ;;  %v417_v54 = vadd.f32 %v416_v53, %v415_v51 }
  0xbe   : >> { %v462_v45 = vmul.f32 %v1012_v1, %v458_v42 }
  0xbf   : >> { %v445_v46 = vpop.permute.xlu0 %444  ;;  %v418_v58 = vrot.slane %v417_v54, 4 }
  0xc0   : >> { %v466_v47 = vadd.f32 %v462_v45, %v349_v43   ;;  %v460_v49 = vmul.f32 %v1020_v3, %v445_v46 }
  0xc1   : >> { %v419_v61 = vadd.f32 %v418_v58, %v417_v54 }
  0xc2   : >> { %v464_v3 = vadd.f32 %v460_v49, %v347_v33  }
  0xc3   : >> { %v420_v8 = vrot.slane %v419_v61, 2 }
  0xc5   : >> { %v401_v55 = vpop.permute.xlu1 %400  ;;  %v421_v11 = vadd.f32 %v420_v8, %v419_v61 }
  0xc6   : >> { %v405_v56 = vmul.f32 %v401_v55, %v349_v43 }
  0xc7   : >> { %v422_v16 = vrot.slane %v421_v11, 1 }
  0xc8   : >> { %v409_v59 = vadd.f32 %v1012_v1, %v405_v56 }
  0xc9   : >> { %v423_v1 = vadd.f32 %v422_v16, %v421_v11 }
  0xcd   : >> { %v375_v62 = vpop.permute.xlu1 %374 }
  0xce   : >> { %v413_v63 = vmul.f32 %v409_v59, %v375_v62 }
  0xd0   : >> { %v425_v4 = vsel %vm414_vm0, %v413_v63, 0.0 }
  0xd1   : >> { %v426_v9 = vadd.f32 %v425_v4, %v424_v5  ;;  %v1313_v4 = vmov %v463_v32 }
  0xd3   : >> { %v427_v10 = vrot.slane %v426_v9, 4 }
  0xd5   : >> { %v428_v12 = vadd.f32 %v427_v10, %v426_v9 }
  0xd7   : >> { %v429_v15 = vrot.slane %v428_v12, 2 }
  0xd9   : >> { %v430_v17 = vadd.f32 %v429_v15, %v428_v12 }
  0xdb   : >> { %v431_v18 = vrot.slane %v430_v17, 1 }
  0xdc   : > { %299 = sbr.rel (!%p297_p4) target bundleno = 23 (0x17), region = 103 }
  0xdd   : >> { %v452_v19 = vpop.permute.xlu1 %451  ;;  %v432_v20 = vadd.f32 %v431_v18, %v430_v17 }
  0xde   : >> { %v461_v21 = vmul.f32 %v1016_v2, %v452_v19 }
  0xdf   : >> { %v470_v22 = vsel %vm469_vm1, %v432_v20, %v423_v1  ;;  %v1312_v1 = vmov %v466_v47 }
  0xe0   : >> { %v465_v2 = vadd.f32 %v461_v21, %v348_v50   ;;  %474 = vst.msk [vmem:[%s472_s28] sm:$0x3] %vm473_vm2, %v470_v22 }
  0xe1 LB: >> { %937 = vset.pattern.permute.xlu2 %v1166_v7  ;;  %936 = vset.pattern.permute.xlu1 %v1156_v6  ;;  %s485_s30 = sshra.s32 %s1048_s29, 7  ;;  %s490_s7 = sand.u32 127, %s1048_s29  ;;  %s1048_s29 = sphi %s1229_s29, %s480_s29   ;;  %v1044_v26 = vphi %v1227_v26, %v651_v26   ;;  %v1040_v25 = vphi %v1225_v25, %v652_v25   ;;  %v1036_v24 = vphi %v1223_v24, %v653_v24   ;;  %v1032_v23 = vphi %v1221_v23, %v654_v23  }
  0xe2   : >> { %938 = vset.pattern.permute.xlu0 %v1156_v6  ;;  %s487_s9 = sadd.s32 %s1095_s26, %s485_s30  ;;  %s480_s29 = sadd.s32 1, %s1048_s29  }
  0xe3   : >> { %s826_s10 = sshll.u32 %s487_s9, 7  ;;  %p477_p5 = scmp.ge.s32.totalorder %s480_s29, 8  }
  0xe4   : >> { %s491_s12 = sadd.s32 %s826_s10, %s490_s7 }
  0xe5   : >> { %s492_s13 = sld [smem:[#allocation3 + %s491_s12]] }
  0xe9   : >> { %575 = vperm.xlu2 %937, %v1175_v13   ;;  %569 = vperm.xlu1 %936, %v1175_v13  }
  0xeb   : >> { %s1254_s15 = sshll.u32 %s492_s13, 1 }
  0xec   : >> { %s496_s16 = scalar_lea.vmem %s1114_s11, %s1254_s15  ;;  %s494_s18 = scalar_lea.vmem %s1109_s8, %s1254_s15 }
  0xed   : >> { %v497_v0 = vld [vmem:[%s496_s16] sm:$0x3]  ;;  %s500_s19 = scalar_lea.vmem %s1124_s17, %s1254_s15  ;;  %s498_s21 = scalar_lea.vmem %s1119_s14, %s1254_s15 }
  0xee   : >> { %v515_v2 = vperm.slane %v497_v0, 1  ;;  %v502_v3 = vperm.slane %v497_v0, 0  ;;  %v495_v27 = vld [vmem:[%s494_s18] sm:$0x3]  ;;  %s655_s22 = scalar_lea.vmem %s1129_s20, %s1254_s15 }
  0xef   : >> { %v538_v28 = vperm.slane %v495_v27, 0  ;;  %v551_v29 = vperm.slane %v495_v27, 1  ;;  %v501_v30 = vld [vmem:[%s500_s19] sm:$0x3] }
  0xf0   : >> { %507 = vperm.xlu0 %938, %v502_v3   ;;  %v621_v31 = vperm.slane %v501_v30, 0  ;;  %v634_v32 = vperm.slane %v501_v30, 1  ;;  %v499_v37 = vld [vmem:[%s498_s21] sm:$0x3] }
  0xf1   : >> { %942 = vset.pattern.permute.xlu2 %v1156_v6  ;;  %520 = vperm.xlu1 %936, %v515_v2   ;;  %v530_v38 = vperm.slane %v499_v37, 0  ;;  %v529_v49 = vrot.slane %v499_v37, 1 }
  0xf3   : >> { %v531_v56 = vperm.slane %v529_v49, 0 }
  0xf8   : >> { %939 = vset.pattern.permute.xlu0 %v1166_v7 }
  0xf9   : >> { %543 = vperm.xlu2 %942, %v538_v28   ;;  %941 = vset.pattern.permute.xlu1 %v1166_v7 }
 0x100   : >> { %513 = vperm.xlu0 %939, %v502_v3  }
 0x101   : >> { %943 = vset.pattern.permute.xlu2 %v1166_v7  ;;  %526 = vperm.xlu1 %941, %v515_v2  }
 0x108   : >> { %940 = vset.pattern.permute.xlu0 %v1156_v6 }
 0x109   : >> { %549 = vperm.xlu2 %943, %v538_v28   ;;  %588 = vperm.xlu1 %941, %v1178_v14  }
 0x110   : >> { %582 = vperm.xlu0 %940, %v1178_v14  }
 0x111   : >> { %944 = vset.pattern.permute.xlu2 %v1156_v6  ;;  %562 = vperm.xlu1 %941, %v551_v29  }
 0x118   : >> { %945 = vset.pattern.permute.xlu0 %v1166_v7 }
 0x119   : >> { %556 = vperm.xlu2 %944, %v551_v29   ;;  %946 = vset.pattern.permute.xlu1 %v1156_v6 }
 0x120   : >> { %632 = vperm.xlu0 %945, %v621_v31  }
 0x121   : >> { %626 = vperm.xlu2 %944, %v621_v31   ;;  %639 = vperm.xlu1 %946, %v634_v32  }
 0x129   : >> { %947 = vset.pattern.permute.xlu2 %v1166_v7 }
 0x131   : >> { %645 = vperm.xlu2 %947, %v634_v32  }
 0x143   : >> { %v576_v33 = vpop.permute.xlu2 %575 }
 0x153   : >> { %v544_v34 = vpop.permute.xlu2 %543 }
 0x15b   : >> { %v570_v35 = vpop.permute.xlu1 %569 }
 0x162   : >> { %v508_v40 = vpop.permute.xlu0 %507 }
 0x163   : >> { %v550_v36 = vpop.permute.xlu2 %549  ;;  %v521_v39 = vpop.permute.xlu1 %520  ;;  %v534_v41 = vmul.f32 %v530_v38, %v508_v40 }
 0x164   : >> { %v536_v62 = vmul.f32 %v531_v56, %v521_v39 }
 0x165   : >> { %v590_v42 = vmul.f32 %v570_v35, %v534_v41 }
 0x167   : >> { %v594_v48 = vadd.f32 %v1044_v26, %v590_v42 }
 0x169   : >> { %v598_v52 = vmul.f32 %v594_v48, %v544_v34  ;;  %v656_v34 = vld [vmem:[%s655_s22] sm:$0x3] }
 0x16b   : >> { %v603_v59 = vsel %vm414_vm0, %v598_v52, 0.0 }
 0x172   : >> { %v514_v45 = vpop.permute.xlu0 %513 }
 0x173   : >> { %v557_v43 = vpop.permute.xlu2 %556  ;;  %v527_v44 = vpop.permute.xlu1 %526  ;;  %v535_v46 = vmul.f32 %v530_v38, %v514_v45 }
 0x174   : >> { %v537_v58 = vmul.f32 %v531_v56, %v527_v44 }
 0x175   : >> { %v591_v47 = vmul.f32 %v576_v33, %v535_v46 }
 0x177   : >> { %v595_v50 = vadd.f32 %v1040_v25, %v591_v47 }
 0x179   : >> { %v599_v53 = vmul.f32 %v595_v50, %v550_v36 }
 0x17b   : >> { %v627_v51 = vpop.permute.xlu2 %626  ;;  %v589_v55 = vpop.permute.xlu1 %588  ;;  %v604_v57 = vsel %vm414_vm0, %v599_v53, 0.0 }
 0x17c   : >> { %v647_v54 = vmul.f32 %v1044_v26, %v627_v51  ;;  %v605_v60 = vadd.f32 %v604_v57, %v603_v59  ;;  %v593_v61 = vmul.f32 %v589_v55, %v537_v58 }
 0x17e   : >> { %v651_v26 = vadd.f32 %v647_v54, %v534_v41   ;;  %v606_v5 = vrot.slane %v605_v60, 4  ;;  %v597_v9 = vadd.f32 %v1032_v23, %v593_v61 }
 0x180   : >> { %v607_v12 = vadd.f32 %v606_v5, %v605_v60 }
 0x182   : >> { %v583_v63 = vpop.permute.xlu0 %582  ;;  %v608_v19 = vrot.slane %v607_v12, 2 }
 0x183   : >> { %v563_v4 = vpop.permute.xlu1 %562  ;;  %v592_v8 = vmul.f32 %v583_v63, %v536_v62 }
 0x184   : >> { %v601_v10 = vmul.f32 %v597_v9, %v563_v4  ;;  %v609_v22 = vadd.f32 %v608_v19, %v607_v12 }
 0x185   : >> { %v596_v11 = vadd.f32 %v1036_v24, %v592_v8 }
 0x186   : >> { %v613_v16 = vsel %vm414_vm0, %v601_v10, 0.0  ;;  %v610_v27 = vrot.slane %v609_v22, 1 }
 0x187   : >> { %v600_v15 = vmul.f32 %v596_v11, %v557_v43 }
 0x188   : >> { %v611_v33 = vadd.f32 %v610_v27, %v609_v22 }
 0x189   : >> { %v612_v18 = vsel %vm414_vm0, %v600_v15, 0.0 }
 0x18a   : >> { %v614_v20 = vadd.f32 %v613_v16, %v612_v18 }
 0x18b   : >> { %v646_v17 = vpop.permute.xlu2 %645 }
 0x18c   : >> { %v650_v1 = vmul.f32 %v1032_v23, %v646_v17  ;;  %v615_v21 = vrot.slane %v614_v20, 4 }
 0x18e   : >> { %v654_v23 = vadd.f32 %v650_v1, %v537_v58   ;;  %v616_v0 = vadd.f32 %v615_v21, %v614_v20 }
 0x190   : >> { %v617_v2 = vrot.slane %v616_v0, 2 }
 0x192   : >> { %v633_v3 = vpop.permute.xlu0 %632  ;;  %v618_v29 = vadd.f32 %v617_v2, %v616_v0 }
 0x193   : >> { %v640_v28 = vpop.permute.xlu1 %639  ;;  %v648_v30 = vmul.f32 %v1040_v25, %v633_v3 }
 0x194   : >> { %v649_v31 = vmul.f32 %v1036_v24, %v640_v28  ;;  %v619_v32 = vrot.slane %v618_v29, 1 }
 0x195   : >> { %v652_v25 = vadd.f32 %v648_v30, %v535_v46  }
 0x196   : >> { %v653_v24 = vadd.f32 %v649_v31, %v536_v62   ;;  %v620_v35 = vadd.f32 %v619_v32, %v618_v29 }
 0x197   : > { %479 = sbr.rel (!%p477_p5) target bundleno = 225 (0xe1), region = 114 }
 0x198   : >> { %v660_v36 = vsel %vm469_vm1, %v620_v35, %v611_v33 }
 0x199   : >> { %v662_v37 = vadd.f32 %v660_v36, %v656_v34 }
 0x19b   : >> { %664 = vst.msk [vmem:[%s655_s22] sm:$0x3] %vm473_vm2, %v662_v37 }
 0x19c PF: > { %s24_s25 = sadd.s32 1, %s1008_s25  }
 0x19d   : > { %p21_p6 = scmp.ge.s32.totalorder %s24_s25, 4  }
 0x19f   :  { %23 = sbr.rel (!%p21_p6) target bundleno = 7 (0x7), region = 125 }

// kernel: rwkv_encoder_forward.9
= control target key start
LH: loop header
LB: loop body
LE: loop exit
PB: predicated region body
PF: predicated region fallthrough
CT: control target
= control target key end

     0   :  { %19 = vsyncpa [#allocation3], 0  ;;  %s1068_s0 = inlined_call_operand.vmem [shape: f32[16,32], index: 0, kind: input, shape index: {}]   ;;  %s1069_s1 = inlined_call_operand.hbm [shape: f32[16,16], index: 1, kind: input, shape index: {}]   ;;  %s1070_s2 = inlined_call_operand.vmem [shape: f32[1,32], index: 2, kind: input, shape index: {}]   ;;  %s1071_s3 = inlined_call_operand.vmem [shape: f32[1,32], index: 3, kind: input, shape index: {}]   ;;  %s1072_s4 = inlined_call_operand.vmem [shape: f32[1,32], index: 4, kind: input, shape index: {}]   ;;  %s1073_s5 = inlined_call_operand.vmem [shape: f32[1,160], index: 5, kind: input, shape index: {}]   ;;  %s1074_s6 = inlined_call_operand.vmem [shape: f32[32,160], index: 6, kind: input, shape index: {}]   ;;  %s1075_s7 = inlined_call_operand.hbm [shape: f32[160,160], index: 7, kind: input, shape index: {}]   ;;  %s1076_s8 = inlined_call_operand.vmem [shape: f32[128,128], index: 8, kind: input, shape index: {}]   ;;  %s1077_s9 = inlined_call_operand.vmem [shape: f32[32,64], index: 9, kind: input, shape index: {}]   ;;  %s1078_s10 = inlined_call_operand.vmem [shape: f32[64,32], index: 10, kind: input, shape index: {}]   ;;  %s1079_s11 = inlined_call_operand.vmem [shape: f32[1,32], index: 11, kind: input, shape index: {}]   ;;  %s1080_s12 = inlined_call_operand.vmem [shape: f32[16,128], index: 12, kind: output, shape index: {0}]   ;;  %s1081_s13 = inlined_call_operand.vmem [shape: f32[16,32], index: 13, kind: output, shape index: {1}]  }
   0x1   :  { %s27_s27 = sshll.u32 %s1069_s1, 4  ;;  %s28_s27 = int_to_ptr.hbm [resolvable:$true] %s27_s27 }
   0x2   :  { %20 = vsyncpa [#allocation5], 0  ;;  %s767_s28 = smov [#allocation2]   ;;  %s50_s15 = sshll.u32 %s1075_s7, 4  ;;  %s51_s15 = int_to_ptr.hbm [resolvable:$true] %s50_s15 }
   0x3   :  { %s29_s29 = sshll.u32 %s767_s28, 4  ;;  %s768_s16 = smov 128   ;;  %s30_s29 = int_to_ptr.vmem [resolvable:$true] %s29_s29 }
   0x4   :  { %s769_s17 = smov 8   ;;  %s770_s18 = smov [#allocation4]  }
   0x5   :  { %35 = dma.hbm_to_vmem [thread:$0]  %s28_s27, 256, %s30_s29, [#allocation3], %s768_s16, %s768_s16, %s769_s17  }
   0x6   :  { %s52_s19 = sshll.u32 %s770_s18, 4  ;;  %s771_s20 = smov 256   ;;  %s53_s19 = int_to_ptr.vmem [resolvable:$true] %s52_s19 }
   0x7   :  { %s772_s21 = smov 16  }
   0x8   :  { %58 = dma.hbm_to_vmem [thread:$0]  %s51_s15, 5120, %s53_s19, [#allocation5], %s771_s20, %s771_s20, %s772_s21  }
   0x9   :  { %763 = dma.done.wait [#allocation3], 256  }
   0xa   :  { %764 = vsyncadd [#allocation3], 4294967040 }
   0xb   :  { %765 = dma.done.wait [#allocation5], 5120  }
   0xc   :  { %766 = vsyncadd [#allocation5], 4294962176  ;;  %vm77_vm0 = vcmask 261120   ;;  %v76_v0 = vld [vmem:[%s1068_s0 + $0x8] sm:$0xff]  ;;  %v75_v2 = vld [vmem:[%s1068_s0] sm:$0xff]  ;;  %v773_v4 = vmov 32.0  }
   0xd   :  { %v81_v1 = vsel %vm77_vm0, %v76_v0, 0.0  ;;  %v78_v3 = vsel %vm77_vm0, %v75_v2, 0.0  ;;  %681 = vrcp.f32 %v773_v4  ;;  %v677_v35 = vld [vmem:[%s1070_s2] ss:$0 sm:$0xff]  ;;  %vm143_vm8 = vcmask 130048   ;;  %v142_v50 = vld [vmem:[#allocation2 + $0x8] sm:$0xff] }
   0xe   :  { %82 = vadd.xlane.f32.xlu0 %v81_v1  ;;  %v678_v38 = vld [vmem:[%s1071_s3] ss:$0 sm:$0xff]  ;;  %v189_v51 = vld [vmem:[%s1074_s6 + $0x30] sm:$0xff]  ;;  %v190_v52 = vld [vmem:[%s1074_s6 + $0x38] sm:$0xff]  ;;  %s774_s29 = smov 96   ;;  %vm457_vm9 = vcmask 523264  }
   0xf   :  { %v141_v49 = vld [vmem:[#allocation2] sm:$0xff]  ;;  %232 = vmatpush.msra.mxu2 %v190_v52  ;;  %v188_v54 = vld [vmem:[%s1074_s6 + $0x28] sm:$0xff]  ;;  %v185_v55 = vld [vmem:[%s1074_s6 + $0x10] sm:$0xff]  ;;  %vm460_vm10 = vcmask 785408  }
  0x10   :  { %v187_v53 = vld [vmem:[%s1074_s6 + $0x20] sm:$0xff]  ;;  %v186_v56 = vld [vmem:[%s1074_s6 + $0x18] sm:$0xff]  ;;  %v184_v58 = vld [vmem:[%s1074_s6 + $0x8] sm:$0xff] }
  0x11   :  { %233 = vmatpush.msra.mxu2 %v188_v54  ;;  %v183_v57 = vld [vmem:[%s1074_s6] sm:$0xff]  ;;  %v278_v60 = vld [vmem:[#allocation4 + $0xf8] sm:$0xff]  ;;  %v275_v61 = vld [vmem:[#allocation4 + $0xe0] sm:$0xff] }
  0x12   :  { %v277_v59 = vld [vmem:[#allocation4 + $0xf0] sm:$0xff]  ;;  %v276_v62 = vld [vmem:[#allocation4 + $0xe8] sm:$0xff]  ;;  %v271_v1 = vld [vmem:[#allocation4 + $0xc0] sm:$0xff] }
  0x13   :  { %v682_v5 = vpop.eup %681  ;;  %234 = vmatpush.msra.mxu2 %v186_v56  ;;  %299 = vmatpush.msra.mxu3 %v277_v59  ;;  %v273_v63 = vld [vmem:[#allocation4 + $0xd0] sm:$0xff]  ;;  %v270_v4 = vld [vmem:[#allocation4 + $0xb8] sm:$0xff]  ;;  %v552_v54 = vld [vmem:[%s1077_s9 + $0x18] sm:$0xff] }
  0x14   :  { %v85_v6 = vmul.f32 32.0, %v682_v5  ;;  %vm89_vm1 = vweird.f32 %v682_v5  ;;  %v550_v56 = vld [vmem:[%s1077_s9 + $0x8] sm:$0xff] }
  0x15   :  { %235 = vmatpush.msra.mxu2 %v184_v58  ;;  %300 = vmatpush.msra.mxu3 %v275_v61  ;;  %v287_v58 = vld [vmem:[%s1073_s5] sm:$0x3]  ;;  %s775_s5 = smov 64  }
  0x16   :  { %79 = vadd.xlane.f32.xlu0 %v78_v3  ;;  %v86_v7 = vsub.f32 1.0, %v85_v6  ;;  %v269_v3 = vld [vmem:[#allocation4 + $0xb0] sm:$0xff]  ;;  %v268_v6 = vld [vmem:[#allocation4 + $0xa8] sm:$0xff]  ;;  %v289_v59 = vperm.slane %v287_v58, 0 }
  0x17   :  { %301 = vmatpush.msra.mxu3 %v273_v63 }
  0x18   :  { %v87_v8 = vmul.f32 %v682_v5, %v86_v7  ;;  %v265_v7 = vld [vmem:[#allocation4 + $0x90] sm:$0xff] }
  0x19   :  { %302 = vmatpush.msra.mxu3 %v271_v1  ;;  %v290_v1 = vperm.slane %v287_v58, 1 }
  0x1a   :  { %v88_v9 = vadd.f32 %v682_v5, %v87_v8  ;;  %v266_v8 = vld [vmem:[#allocation4 + $0x98] sm:$0xff] }
  0x1b   :  { %303 = vmatpush.msra.mxu3 %v269_v3 }
  0x1c   :  { %v90_v10 = vsel %vm89_vm1, %v682_v5, %v88_v9  ;;  %v267_v5 = vld [vmem:[#allocation4 + $0xa0] sm:$0xff] }
  0x1d   :  { %304 = vmatpush.msra.mxu3 %v267_v5  ;;  %v263_v9 = vld [vmem:[#allocation4 + $0x80] sm:$0xff] }
  0x1f   :  { %305 = vmatpush.msra.mxu3 %v265_v7 }
  0x21   :  { %306 = vmatpush.msra.mxu3 %v263_v9 }
  0x81   :  { %v83_v11 = vpop.xlane.xlu0 %82 }
  0x82   :  { %v92_v12 = vmul.f32 %v90_v10, %v83_v11  ;;  %v261_v11 = vld [vmem:[#allocation4 + $0x70] sm:$0xff] }
  0x83   :  { %307 = vmatpush.msra.mxu3 %v261_v11 }
  0x84   :  { %v94_v13 = vsub.f32 %v76_v0, %v92_v12  ;;  %v274_v0 = vld [vmem:[#allocation4 + $0xd8] sm:$0xff] }
  0x85   :  { %v262_v12 = vld [vmem:[#allocation4 + $0x78] sm:$0xff] }
  0x86   :  { %v96_v14 = vmul.f32 %v94_v13, %v94_v13 }
  0x88   :  { %v100_v15 = vsel %vm77_vm0, %v96_v14, 0.0  ;;  %v259_v14 = vld [vmem:[#allocation4 + $0x60] sm:$0xff] }
  0x89   :  { %101 = vadd.xlane.f32.xlu1 %v100_v15  ;;  %v80_v16 = vpop.xlane.xlu0 %79  ;;  %v260_v15 = vld [vmem:[#allocation4 + $0x68] sm:$0xff]  ;;  %308 = vmatpush.msra.mxu3 %v259_v14 }
  0x8a   :  { %v91_v17 = vmul.f32 %v90_v10, %v80_v16 }
  0x8c   :  { %v93_v18 = vsub.f32 %v75_v2, %v91_v17  ;;  %v272_v2 = vld [vmem:[#allocation4 + $0xc8] sm:$0xff] }
  0x8e   :  { %v95_v19 = vmul.f32 %v93_v18, %v93_v18 }
  0x90   :  { %v97_v20 = vsel %vm77_vm0, %v95_v19, 0.0  ;;  %v258_v19 = vld [vmem:[#allocation4 + $0x58] sm:$0xff] }
  0x91   :  { %98 = vadd.xlane.f32.xlu1 %v97_v20 }
  0xfc   :  { %v102_v21 = vpop.xlane.xlu1 %101 }
  0xfd   :  { %v104_v22 = vmul.f32 %v102_v21, %v90_v10 }
  0xff   :  { %v106_v23 = vadd.f32 1e-05, %v104_v22  ;;  %v255_v22 = vld [vmem:[#allocation4 + $0x40] sm:$0xff] }
 0x101   :  { %683 = vrsqrt.f32 %v106_v23  ;;  %vm123_vm3 = vweird.f32 %v106_v23 }
 0x104   :  { %v99_v24 = vpop.xlane.xlu1 %98 }
 0x105   :  { %v103_v25 = vmul.f32 %v99_v24, %v90_v10  ;;  %v264_v10 = vld [vmem:[#allocation4 + $0x88] sm:$0xff] }
 0x107   :  { %v684_v26 = vpop.eup %683  ;;  %v105_v27 = vadd.f32 1e-05, %v103_v25 }
 0x108   :  { %v118_v28 = vmul.f32 %v684_v26, %v106_v23  ;;  %vm124_vm2 = vweird.f32 %v684_v26  ;;  %v256_v23 = vld [vmem:[#allocation4 + $0x48] sm:$0xff] }
 0x109   :  { %685 = vrsqrt.f32 %v105_v27  ;;  %vm125_vm4 = vmor %vm123_vm3, %vm124_vm2  ;;  %vm113_vm6 = vweird.f32 %v105_v27 }
 0x10a   :  { %v119_v29 = vmul.f32 %v684_v26, %v118_v28  ;;  %v253_v28 = vld [vmem:[#allocation4 + $0x30] sm:$0xff] }
 0x10c   :  { %v120_v30 = vmul.f32 0.5, %v119_v29  ;;  %v254_v29 = vld [vmem:[#allocation4 + $0x38] sm:$0xff] }
 0x10e   :  { %v121_v31 = vsub.f32 1.5, %v120_v30  ;;  %v251_v30 = vld [vmem:[#allocation4 + $0x20] sm:$0xff] }
 0x10f   :  { %v686_v32 = vpop.eup %685 }
 0x110   :  { %v122_v33 = vmul.f32 %v684_v26, %v121_v31  ;;  %v108_v34 = vmul.f32 %v686_v32, %v105_v27  ;;  %vm114_vm5 = vweird.f32 %v686_v32  ;;  %v252_v31 = vld [vmem:[#allocation4 + $0x28] sm:$0xff] }
 0x111   :  { %vm115_vm7 = vmor %vm113_vm6, %vm114_vm5 }
 0x112   :  { %v126_v36 = vsel %vm125_vm4, %v684_v26, %v122_v33  ;;  %v109_v37 = vmul.f32 %v686_v32, %v108_v34  ;;  %v250_v33 = vld [vmem:[#allocation4 + $0x18] sm:$0xff]  ;;  %v247_v34 = vld [vmem:[#allocation4] sm:$0xff] }
 0x113   :  { %v128_v39 = vmul.f32 %v126_v36, %v94_v13  ;;  %v679_v13 = vld [vmem:[%s1072_s4] ss:$0 sm:$0xff]  ;;  %v248_v36 = vld [vmem:[#allocation4 + $0x8] sm:$0xff] }
 0x114   :  { %v110_v40 = vmul.f32 0.5, %v109_v37  ;;  %v286_v37 = vld [vmem:[#allocation4 + $0x138] sm:$0xff] }
 0x115   :  { %v134_v41 = vmul.f32 %v677_v35, %v128_v39  ;;  %380 = vmatpush.msrb.mxu2 %v286_v37  ;;  %v284_v39 = vld [vmem:[#allocation4 + $0x128] sm:$0xff] }
 0x116   :  { %v111_v42 = vsub.f32 1.5, %v110_v40  ;;  %v281_v40 = vld [vmem:[#allocation4 + $0x110] sm:$0xff]  ;;  %v478_v37 = vld [vmem:[%s1076_s8 + $0x78] sm:$0xff] }
 0x117   :  { %v869_v43 = vadd.f32 %v678_v38, %v134_v41  ;;  %v282_v41 = vld [vmem:[#allocation4 + $0x118] sm:$0xff]  ;;  %381 = vmatpush.msrb.mxu2 %v284_v39 }
 0x118   :  { %v112_v44 = vmul.f32 %v686_v32, %v111_v42  ;;  %v279_v42 = vld [vmem:[#allocation4 + $0x100] sm:$0xff]  ;;  %v476_v39 = vld [vmem:[%s1076_s8 + $0x68] sm:$0xff] }
 0x119   :  { %164 = vmatpush.msra.mxu0 %v869_v43  ;;  %665 = vmatpush.msra.mxu1 %v869_v43 }
 0x11a   :  { %v116_v45 = vsel %vm115_vm7, %v686_v32, %v112_v44  ;;  %v249_v32 = vld [vmem:[#allocation4 + $0x10] sm:$0xff]  ;;  %v280_v44 = vld [vmem:[#allocation4 + $0x108] sm:$0xff]  ;;  %382 = vmatpush.msrb.mxu2 %v282_v41 }
 0x11b   :  { %v127_v46 = vmul.f32 %v116_v45, %v93_v18  ;;  %v257_v18 = vld [vmem:[#allocation4 + $0x50] sm:$0xff] }
 0x11c   :  { %309 = vmatpush.msra.mxu3 %v257_v18  ;;  %383 = vmatpush.msrb.mxu2 %v280_v44  ;;  %v475_v44 = vld [vmem:[%s1076_s8 + $0x60] sm:$0xff] }
 0x11d   :  { %v133_v47 = vmul.f32 %v677_v35, %v127_v46  ;;  %v285_v35 = vld [vmem:[#allocation4 + $0x130] sm:$0xff] }
 0x11e   :  { %310 = vmatpush.msra.mxu3 %v255_v22 }
 0x11f   :  { %v873_v48 = vadd.f32 %v678_v38, %v133_v47  ;;  %v283_v38 = vld [vmem:[#allocation4 + $0x120] sm:$0xff] }
 0x120   :  { %311 = vmatpush.msra.mxu3 %v253_v28  ;;  %v587_v28 = vld [vmem:[%s1078_s10 + $0x18] sm:$0xff] }
 0x121   :  { %165 = vmatpush.msra.mxu0 %v873_v48  ;;  %666 = vmatpush.msra.mxu1 %v873_v48 }
 0x122   :  { %649 = vmatmul.msk.f32.vlgmr.msra.gmra.mxu0 %vm143_vm8, %v141_v49  ;;  %650 = vmatmul.msk.f32.vlgmr.msra.gmra.mxu1 %vm143_vm8, %v142_v50 }
 0x123   :  { %209 = vmatpush.msrb.mxu1 %v189_v51  ;;  %312 = vmatpush.msra.mxu3 %v251_v30 }
 0x124   :  { %334 = vmatpush.msrb.mxu0 %v285_v35 }
 0x125   :  { %210 = vmatpush.msrb.mxu1 %v187_v53  ;;  %313 = vmatpush.msra.mxu3 %v249_v32 }
 0x126   :  { %335 = vmatpush.msrb.mxu0 %v283_v38  ;;  %v477_v38 = vld [vmem:[%s1076_s8 + $0x70] sm:$0xff] }
 0x127   :  { %211 = vmatpush.msrb.mxu1 %v185_v55  ;;  %314 = vmatpush.msra.mxu3 %v247_v34  ;;  %v551_v55 = vld [vmem:[%s1077_s9 + $0x10] sm:$0xff] }
 0x128   :  { %336 = vmatpush.msrb.mxu0 %v281_v40 }
 0x129   :  { %212 = vmatpush.msrb.mxu1 %v183_v57  ;;  %v549_v57 = vld [vmem:[%s1077_s9] sm:$0xff]  ;;  %s776_s9 = smov 32  }
 0x12a   :  { %337 = vmatpush.msrb.mxu0 %v279_v42 }
 0x12b   :  { %345 = vmatpush.msra.mxu1 %v278_v60 }
 0x12c   :  { %479 = vmatpush.msra.mxu0 %v478_v37 }
 0x12d   :  { %346 = vmatpush.msra.mxu1 %v276_v62 }
 0x12e   :  { %480 = vmatpush.msra.mxu0 %v477_v38  ;;  %v502_v38 = vlaneseq }
 0x12f   :  { %347 = vmatpush.msra.mxu1 %v274_v0 }
 0x130   :  { %481 = vmatpush.msra.mxu0 %v476_v39 }
 0x131   :  { %348 = vmatpush.msra.mxu1 %v272_v2 }
 0x132   :  { %482 = vmatpush.msra.mxu0 %v475_v44  ;;  %v503_v44 = vand.u32 127, %v502_v38 }
 0x133   :  { %349 = vmatpush.msra.mxu1 %v270_v4 }
 0x134   :  { %vm504_vm15 = vcmp.ge.s32.totalorder %v503_v44, 96 }
 0x135   :  { %350 = vmatpush.msra.mxu1 %v268_v6 }
 0x137   :  { %351 = vmatpush.msra.mxu1 %v266_v8 }
 0x139   :  { %352 = vmatpush.msra.mxu1 %v264_v10 }
 0x13b   :  { %353 = vmatpush.msra.mxu1 %v262_v12 }
 0x13d   :  { %354 = vmatpush.msra.mxu1 %v260_v15 }
 0x13f   :  { %355 = vmatpush.msra.mxu1 %v258_v19  ;;  %v591_v19 = vld [vmem:[%s1078_s10 + $0x38] sm:$0xff] }
 0x140   :  { %606 = vmatpush.msrb.mxu3 %v591_v19 }
 0x141   :  { %356 = vmatpush.msra.mxu1 %v256_v23  ;;  %v589_v23 = vld [vmem:[%s1078_s10 + $0x28] sm:$0xff] }
 0x143   :  { %357 = vmatpush.msra.mxu1 %v254_v29  ;;  %v586_v29 = vld [vmem:[%s1078_s10 + $0x10] sm:$0xff] }
 0x145   :  { %358 = vmatpush.msra.mxu1 %v252_v31  ;;  %v585_v31 = vld [vmem:[%s1078_s10 + $0x8] sm:$0xff] }
 0x147   :  { %359 = vmatpush.msra.mxu1 %v250_v33  ;;  %v584_v33 = vld [vmem:[%s1078_s10] sm:$0xff] }
 0x149   :  { %360 = vmatpush.msra.mxu1 %v248_v36 }
 0x19f   :  { %v167_v16 = vpop.f32.mrf.mxu0  ;;  %v170_v20 = vpop.f32.mrf.mxu1 }
 0x1a0   :  { %v905_v17 = vsub.f32 %v167_v16, %v873_v48  ;;  %v909_v24 = vsub.f32 %v170_v20, %v869_v43  ;;  %v590_v20 = vld [vmem:[%s1078_s10 + $0x30] sm:$0xff] }
 0x1a1   :  { %607 = vmatpush.msrb.mxu3 %v590_v20 }
 0x1a2   :  { %v179_v21 = vmul.f32 %v679_v13, %v905_v17  ;;  %v180_v26 = vmul.f32 %v679_v13, %v909_v24 }
 0x1a3   :  { %608 = vmatpush.msrb.mxu3 %v589_v23 }
 0x1a4   :  { %v181_v25 = vadd.f32 %v179_v21, %v873_v48  ;;  %v182_v27 = vadd.f32 %v180_v26, %v869_v43 }
 0x1a6   :  { %651 = vmatmul.msk.f32.vlgmr.msrb.gmra.mxu1 %vm77_vm0, %v181_v25  ;;  %653 = vmatmul.msk.f32.vlgmr.msra.gmra.mxu2 %vm77_vm0, %v181_v25  ;;  %v588_v25 = vld [vmem:[%s1078_s10 + $0x20] sm:$0xff] }
 0x1a7   :  { %571 = vmatpush.msra.mxu2 %v552_v54  ;;  %609 = vmatpush.msrb.mxu3 %v588_v25 }
 0x1a9   :  { %572 = vmatpush.msra.mxu2 %v551_v55  ;;  %610 = vmatpush.msrb.mxu3 %v587_v28  ;;  %v469_v55 = vld [vmem:[%s1076_s8 + $0x30] sm:$0xff] }
 0x1ab   :  { %573 = vmatpush.msra.mxu2 %v550_v56  ;;  %611 = vmatpush.msrb.mxu3 %v586_v29  ;;  %v468_v56 = vld [vmem:[%s1076_s8 + $0x28] sm:$0xff] }
 0x1ad   :  { %574 = vmatpush.msra.mxu2 %v549_v57  ;;  %612 = vmatpush.msrb.mxu3 %v585_v31 }
 0x1ae   :  { %652 = vmatmul.msk.f32.gmra.mxu1 %vm77_vm0, %v182_v27  ;;  %654 = vmatmul.msk.f32.gmra.mxu2 %vm77_vm0, %v182_v27 }
 0x1af   :  { %613 = vmatpush.msrb.mxu3 %v584_v33 }
 0x223   :  { %v214_v45 = vpop.f32.mrf.mxu1 }
 0x224   :  { %687 = vtanh.f32 %v214_v45 }
 0x229   :  { %v237_v46 = vpop.f32.mrf.mxu2 }
 0x22a   :  { %v688_v47 = vpop.eup %687  ;;  %689 = vtanh.f32 %v237_v46 }
 0x22b   :  { %v217_v49 = vpop.f32.mrf.mxu1  ;;  %315 = vmatmul.f32.vlgmr.msra.gmra.mxu3 %v688_v47  ;;  %361 = vmatmul.f32.vlgmr.msra.gmra.mxu1 %v688_v47  ;;  %v474_v47 = vld [vmem:[%s1076_s8 + $0x58] sm:$0xff] }
 0x22c   :  { %691 = vtanh.f32 %v217_v49  ;;  %483 = vmatpush.msra.mxu0 %v474_v47 }
 0x230   :  { %v690_v50 = vpop.eup %689 }
 0x231   :  { %v240_v51 = vpop.f32.mrf.mxu2  ;;  %655 = vmatmul.msk.f32.vlgmr.msrb.gmra.mxu0 %vm77_vm0, %v690_v50  ;;  %657 = vmatmul.msk.f32.vlgmr.msrb.gmra.mxu2 %vm77_vm0, %v690_v50  ;;  %v473_v50 = vld [vmem:[%s1076_s8 + $0x50] sm:$0xff] }
 0x232   :  { %v692_v52 = vpop.eup %691  ;;  %693 = vtanh.f32 %v240_v51  ;;  %v472_v51 = vld [vmem:[%s1076_s8 + $0x48] sm:$0xff]  ;;  %484 = vmatpush.msra.mxu0 %v473_v50 }
 0x233   :  { %318 = vmatmul.f32.gmra.mxu3 %v692_v52  ;;  %364 = vmatmul.f32.gmra.mxu1 %v692_v52  ;;  %v471_v52 = vld [vmem:[%s1076_s8 + $0x40] sm:$0xff] }
 0x234   :  { %485 = vmatpush.msra.mxu0 %v472_v51 }
 0x236   :  { %486 = vmatpush.msra.mxu0 %v471_v52 }
 0x238   :  { %v694_v53 = vpop.eup %693 }
 0x239   :  { %656 = vmatmul.msk.f32.gmra.mxu0 %vm77_vm0, %v694_v53  ;;  %658 = vmatmul.msk.f32.gmra.mxu2 %vm77_vm0, %v694_v53  ;;  %v470_v53 = vld [vmem:[%s1076_s8 + $0x38] sm:$0xff] }
 0x23a   :  { %487 = vmatpush.msra.mxu0 %v470_v53 }
 0x23c   :  { %488 = vmatpush.msra.mxu0 %v469_v55 }
 0x23e   :  { %489 = vmatpush.msra.mxu0 %v468_v56 }
 0x2a8   :  { %v362_v2 = vpop.f32.mrf.mxu1 }
 0x2a9   :  { %v363_v7 = vadd.f32 %v362_v2, %v290_v1 }
 0x2ae   :  { %v316_v60 = vpop.f32.mrf.mxu3  ;;  %v339_v61 = vpop.f32.mrf.mxu0 }
 0x2af   :  { %v317_v62 = vadd.f32 %v316_v60, %v289_v59  ;;  %v467_v60 = vld [vmem:[%s1076_s8 + $0x20] sm:$0xff] }
 0x2b0   :  { %v365_v27 = vpop.f32.mrf.mxu1  ;;  %490 = vmatpush.msra.mxu0 %v467_v60 }
 0x2b1   :  { %v340_v63 = vadd.f32 %v339_v61, %v317_v62  ;;  %v366_v32 = vadd.f32 %v365_v27, %v290_v1  ;;  %v466_v61 = vld [vmem:[%s1076_s8 + $0x18] sm:$0xff]  ;;  %v465_v62 = vld [vmem:[%s1076_s8 + $0x10] sm:$0xff] }
 0x2b2   :  { %491 = vmatpush.msra.mxu0 %v466_v61 }
 0x2b3   :  { %v391_v0 = vmul.f32 %v340_v63, %v905_v17  ;;  %397 = vrot.lane.b32.xlu2 %v340_v63, %s774_s29 }
 0x2b4   :  { %v385_v5 = vpop.f32.mrf.mxu2  ;;  %492 = vmatpush.msra.mxu0 %v465_v62 }
 0x2b5   :  { %v393_v3 = vadd.f32 %v391_v0, %v873_v48  ;;  %v386_v10 = vadd.f32 %v385_v5, %v363_v7  ;;  %v463_v0 = vld [vmem:[%s1076_s8] sm:$0xff] }
 0x2b6   :  { %v319_v4 = vpop.f32.mrf.mxu3  ;;  %v342_v8 = vpop.f32.mrf.mxu0 }
 0x2b7   :  { %v320_v6 = vadd.f32 %v319_v4, %v289_v59  ;;  %661 = vmatmul.msk.f32.vlgmr.msra.gmra.mxu2 %vm77_vm0, %v393_v3  ;;  %v427_v13 = vmul.f32 %v386_v10, %v905_v17 }
 0x2b9   :  { %v343_v9 = vadd.f32 %v342_v8, %v320_v6  ;;  %v429_v14 = vadd.f32 %v427_v13, %v873_v48 }
 0x2bb   :  { %407 = vrot.lane.b32.xlu2 %v340_v63, %s775_s5  ;;  %409 = vrot.lane.b32.xlu1 %v343_v9, %s775_s5  ;;  %v392_v11 = vmul.f32 %v343_v9, %v909_v24 }
 0x2bc   :  { %399 = vrot.lane.b32.xlu0 %v343_v9, %s774_s29  ;;  %v388_v30 = vpop.f32.mrf.mxu2 }
 0x2bd   :  { %v394_v12 = vadd.f32 %v392_v11, %v869_v43  ;;  %v389_v34 = vadd.f32 %v388_v30, %v366_v32 }
 0x2bf   :  { %662 = vmatmul.msk.f32.gmra.mxu2 %vm77_vm0, %v394_v12  ;;  %v428_v35 = vmul.f32 %v389_v34, %v909_v24 }
 0x2c1   :  { %v430_v36 = vadd.f32 %v428_v35, %v869_v43 }
 0x2c3   :  { %417 = vrot.lane.b32.xlu2 %v340_v63, %s776_s9  ;;  %v464_v63 = vld [vmem:[%s1076_s8 + $0x8] sm:$0xff] }
 0x2c4   :  { %449 = vrot.lane.b32.xlu0 %v429_v14, %s774_s29  ;;  %493 = vmatpush.msra.mxu0 %v464_v63 }
 0x2c6   :  { %494 = vmatpush.msra.mxu0 %v463_v0 }
 0x30d   :  { %v398_v15 = vpop.permute.xlu2 %397 }
 0x30e   :  { %v403_v16 = vmul.f32 %v398_v15, %v905_v17 }
 0x310   :  { %v405_v18 = vadd.f32 %v403_v16, %v873_v48 }
 0x312   :  { %433 = vrot.lane.b32.xlu2 %v405_v18, %s776_s9  ;;  %v680_v18 = vld [vmem:[%s1079_s11] ss:$0 sm:$0xff] }
 0x315   :  { %v408_v21 = vpop.permute.xlu2 %407 }
 0x316   :  { %v413_v22 = vmul.f32 %v408_v21, %v905_v17 }
 0x318   :  { %v415_v26 = vadd.f32 %v413_v22, %v873_v48 }
 0x31a   :  { %441 = vrot.lane.b32.xlu2 %v415_v26, %s775_s5 }
 0x31d   :  { %v418_v1 = vpop.permute.xlu2 %417 }
 0x31e   :  { %v423_v3 = vmul.f32 %v418_v1, %v905_v17 }
 0x320   :  { %v425_v4 = vadd.f32 %v423_v3, %v873_v48 }
 0x322   :  { %419 = vrot.lane.b32.xlu2 %v343_v9, %s776_s9 }
 0x32a   :  { %451 = vrot.lane.b32.xlu2 %v430_v36, %s774_s29 }
 0x32d   :  { %v410_v40 = vpop.permute.xlu1 %409 }
 0x32e   :  { %v414_v41 = vmul.f32 %v410_v40, %v909_v24  ;;  %v400_v42 = vpop.permute.xlu0 %399 }
 0x32f   :  { %v404_v45 = vmul.f32 %v400_v42, %v909_v24 }
 0x330   :  { %v416_v46 = vadd.f32 %v414_v41, %v869_v43 }
 0x331   :  { %v406_v49 = vadd.f32 %v404_v45, %v869_v43 }
 0x332   :  { %443 = vrot.lane.b32.xlu0 %v416_v46, %s775_s5 }
 0x333   :  { %435 = vrot.lane.b32.xlu1 %v406_v49, %s776_s9 }
 0x336   :  { %v450_v7 = vpop.permute.xlu0 %449 }
 0x33a   :  { %v576_v54 = vpop.f32.mrf.mxu2 }
 0x33b   :  { %695 = vtanh.f32 %v576_v54 }
 0x341   :  { %v696_v57 = vpop.eup %695 }
 0x342   :  { %v579_v58 = vpop.f32.mrf.mxu2  ;;  %663 = vmatmul.msk.f32.vlgmr.msrb.gmra.mxu3 %vm457_vm9, %v696_v57 }
 0x343   :  { %697 = vtanh.f32 %v579_v58 }
 0x349   :  { %v698_v59 = vpop.eup %697 }
 0x34a   :  { %664 = vmatmul.msk.f32.gmra.mxu3 %vm457_vm9, %v698_v59 }
 0x36c   :  { %v434_v2 = vpop.permute.xlu2 %433 }
 0x36d   :  { %v455_v5 = vsel %vm77_vm0, %v425_v4, %v434_v2 }
 0x374   :  { %v442_v6 = vpop.permute.xlu2 %441 }
 0x375   :  { %v458_v8 = vsel %vm457_vm9, %v455_v5, %v442_v6 }
 0x376   :  { %v461_v9 = vsel %vm460_vm10, %v458_v8, %v450_v7 }
 0x377   :  { %495 = vmatmul.f32.vlgmr.msra.gmra.mxu0 %v461_v9 }
 0x37c   :  { %v420_v10 = vpop.permute.xlu2 %419 }
 0x37d   :  { %v424_v11 = vmul.f32 %v420_v10, %v909_v24 }
 0x37f   :  { %v426_v12 = vadd.f32 %v424_v11, %v869_v43 }
 0x384   :  { %v452_v15 = vpop.permute.xlu2 %451 }
 0x3a4   :  { %v444_v13 = vpop.permute.xlu0 %443 }
 0x3a5   :  { %v436_v14 = vpop.permute.xlu1 %435 }
 0x3a6   :  { %v456_v17 = vsel %vm77_vm0, %v426_v12, %v436_v14 }
 0x3a7   :  { %v459_v48 = vsel %vm457_vm9, %v456_v17, %v444_v13 }
 0x3a8   :  { %v462_v16 = vsel %vm460_vm10, %v459_v48, %v452_v15 }
 0x3a9   :  { %498 = vmatmul.f32.gmra.mxu0 %v462_v16 }
 0x3c5   :  { %v615_v19 = vpop.f32.mrf.mxu3 }
 0x3c6   :  { %v625_v20 = vadd.f32 %v680_v18, %v615_v19 }
 0x3c8   :  { %v627_v21 = vmul.f32 1.442695, %v625_v20 }
 0x3ca   :  { %699 = vpow2.f32 %v627_v21 }
 0x3cd   :  { %v618_v24 = vpop.f32.mrf.mxu3 }
 0x3ce   :  { %v626_v22 = vadd.f32 %v680_v18, %v618_v24 }
 0x3d0   :  { %v700_v43 = vpop.eup %699  ;;  %v629_v23 = vmul.f32 1.442695, %v626_v22 }
 0x3d1   :  { %v631_v25 = vsub.f32 0.0, %v700_v43 }
 0x3d2   :  { %701 = vpow2.f32 %v629_v23 }
 0x3d3   :  { %v633_v26 = vmul.f32 1.442695, %v631_v25 }
 0x3d5   :  { %703 = vpow2.f32 %v633_v26 }
 0x3d8   :  { %v702_v27 = vpop.eup %701 }
 0x3d9   :  { %v632_v28 = vsub.f32 0.0, %v702_v27 }
 0x3db   :  { %v704_v29 = vpop.eup %703  ;;  %v635_v30 = vmul.f32 1.442695, %v632_v28 }
 0x3dc   :  { %637 = vst.msk [vmem:[%s1081_s13] sm:$0xff] %vm77_vm0, %v704_v29 }
 0x3dd   :  { %705 = vpow2.f32 %v635_v30 }
 0x3e3   :  { %v706_v31 = vpop.eup %705 }
 0x3e4   :  { %638 = vst.msk [vmem:[%s1081_s13 + $0x8] sm:$0xff] %vm77_vm0, %v706_v31 }
 0x3f4   :  { %v496_v32 = vpop.f32.mrf.mxu0 }
 0x3f5   :  { %v659_v33 = vmul.f32 -1.442695, %v496_v32 }
 0x3f7   :  { %707 = vpow2.f32 %v659_v33 }
 0x3fd   :  { %v708_v34 = vpop.eup %707 }
 0x3fe   :  { %v511_v35 = vadd.f32 1.0, %v708_v34 }
 0x400   :  { %709 = vrcp.f32 %v511_v35  ;;  %v524_v40 = vand.u32 2147483648, %v511_v35  ;;  %v522_v42 = vand.u32 2147483647, %v511_v35  ;;  %vm518_vm12 = vweird.f32 %v511_v35 }
 0x402   :  { %v525_v46 = vor.u32 1.1754944e-38, %v524_v40  ;;  %vm523_vm14 = vcmp.eq.f32.partialorder %v522_v42, 8.507059e+37 }
 0x406   :  { %v710_v36 = vpop.eup %709 }
 0x407   :  { %v514_v37 = vmul.f32 %v710_v36, %v511_v35  ;;  %vm519_vm11 = vweird.f32 %v710_v36 }
 0x408   :  { %vm520_vm13 = vmor %vm518_vm12, %vm519_vm11 }
 0x409   :  { %v515_v39 = vsub.f32 1.0, %v514_v37 }
 0x40b   :  { %v516_v41 = vmul.f32 %v710_v36, %v515_v39 }
 0x40d   :  { %v517_v45 = vadd.f32 %v710_v36, %v516_v41 }
 0x40f   :  { %v521_v47 = vsel %vm520_vm13, %v710_v36, %v517_v45 }
 0x410   :  { %v526_v49 = vsel %vm523_vm14, %v525_v46, %v521_v47 }
 0x411   :  { %v543_v50 = vmul.f32 %v526_v49, %v496_v32 }
 0x413   :  { %v545_v51 = vsel %vm504_vm15, %v543_v50, %v496_v32 }
 0x414   :  { %547 = vst [vmem:[%s1080_s12] sm:$0xff] %v545_v51 }
 0x426   :  { %v499_v52 = vpop.f32.mrf.mxu0 }
 0x427   :  { %v660_v53 = vmul.f32 -1.442695, %v499_v52 }
 0x429   :  { %711 = vpow2.f32 %v660_v53 }
 0x42f   :  { %v712_v54 = vpop.eup %711 }
 0x430   :  { %v512_v55 = vadd.f32 1.0, %v712_v54 }
 0x432   :  { %713 = vrcp.f32 %v512_v55  ;;  %v539_v59 = vand.u32 2147483648, %v512_v55  ;;  %v537_v61 = vand.u32 2147483647, %v512_v55  ;;  %vm533_vm1 = vweird.f32 %v512_v55 }
 0x434   :  { %v540_v63 = vor.u32 1.1754944e-38, %v539_v59  ;;  %vm538_vm3 = vcmp.eq.f32.partialorder %v537_v61, 8.507059e+37 }
 0x438   :  { %v714_v56 = vpop.eup %713 }
 0x439   :  { %v529_v57 = vmul.f32 %v714_v56, %v512_v55  ;;  %vm534_vm0 = vweird.f32 %v714_v56 }
 0x43a   :  { %vm535_vm2 = vmor %vm533_vm1, %vm534_vm0 }
 0x43b   :  { %v530_v58 = vsub.f32 1.0, %v529_v57 }
 0x43d   :  { %v531_v60 = vmul.f32 %v714_v56, %v530_v58 }
 0x43f   :  { %v532_v62 = vadd.f32 %v714_v56, %v531_v60 }
 0x441   :  { %v536_v0 = vsel %vm535_vm2, %v714_v56, %v532_v62 }
 0x442   :  { %v541_v1 = vsel %vm538_vm3, %v540_v63, %v536_v0 }
 0x443   :  { %v544_v2 = vmul.f32 %v541_v1, %v499_v52 }
 0x445   :  { %v546_v3 = vsel %vm504_vm15, %v544_v2, %v499_v52 }
 0x446   :  { %548 = vst [vmem:[%s1080_s12 + $0x8] sm:$0xff] %v546_v3 }
 0x447   :  { %647 = vsyncpa [#allocation3], 1 }
 0x448   :  { %648 = vsyncpa [#allocation5], 1 }

// kernel: rwkv_encoder_forward.11
= control target key start
LH: loop header
LB: loop body
LE: loop exit
PB: predicated region body
PF: predicated region fallthrough
CT: control target
= control target key end

     0   :  { %20 = vsyncpa [#allocation3], 0  ;;  %s947_s0 = inlined_call_operand.vmem [shape: f32[16,32], index: 0, kind: input, shape index: {}]   ;;  %s948_s1 = inlined_call_operand.vmem [shape: f32[16,32], index: 1, kind: input, shape index: {}]   ;;  %s949_s2 = inlined_call_operand.vmem [shape: f32[16,128], index: 2, kind: input, shape index: {}]   ;;  %s950_s3 = inlined_call_operand.vmem [shape: f32[32,32], index: 3, kind: input, shape index: {}]   ;;  %s951_s4 = inlined_call_operand.vmem [shape: f32[1,32], index: 4, kind: input, shape index: {}]   ;;  %s952_s5 = inlined_call_operand.vmem [shape: f32[1,32], index: 5, kind: input, shape index: {}]   ;;  %s953_s6 = inlined_call_operand.vmem [shape: f32[32,32], index: 6, kind: input, shape index: {}]   ;;  %s954_s7 = inlined_call_operand.hbm [shape: f32[16,16], index: 7, kind: input, shape index: {}]   ;;  %s955_s8 = inlined_call_operand.vmem [shape: f32[1,32], index: 8, kind: input, shape index: {}]   ;;  %s956_s9 = inlined_call_operand.hbm [shape: f32[1,32], index: 9, kind: input, shape index: {}]   ;;  %s957_s10 = inlined_call_operand.hbm [shape: f32[1,32], index: 10, kind: input, shape index: {}]   ;;  %s958_s11 = inlined_call_operand.hbm [shape: f32[1,32], index: 11, kind: input, shape index: {}]   ;;  %s959_s12 = inlined_call_operand.vmem [shape: f32[32,128], index: 12, kind: input, shape index: {}]   ;;  %s960_s13 = inlined_call_operand.vmem [shape: f32[128,32], index: 13, kind: input, shape index: {}]   ;;  %s961_s14 = inlined_call_operand.vmem [shape: f32[32,32], index: 14, kind: input, shape index: {}]   ;;  %s962_s15 = inlined_call_operand.vmem [shape: f32[16,32], index: 15, kind: output, shape index: {}]  }
   0x1   :  { %21 = vsyncpa [#allocation5], 0  ;;  %s57_s20 = sshll.u32 %s956_s9, 4  ;;  %s58_s20 = int_to_ptr.hbm [resolvable:$true] %s57_s20 }
   0x2   :  { %22 = vsyncpa [#allocation8], 0  ;;  %s686_s21 = smov [#allocation4]   ;;  %s41_s25 = sshll.u32 %s954_s7, 4  ;;  %s42_s25 = int_to_ptr.hbm [resolvable:$true] %s41_s25 }
   0x3   :  { %s59_s22 = sshll.u32 %s686_s21, 4  ;;  %s687_s26 = smov [#allocation2]   ;;  %s60_s22 = int_to_ptr.vmem [resolvable:$true] %s59_s22 }
   0x4   :  { %62 = dma.hbm_to_vmem [thread:$0]  %s58_s20, 16, %s60_s22, [#allocation5]  }
   0x5   :  { %s43_s27 = sshll.u32 %s687_s26, 4  ;;  %s688_s28 = smov 128   ;;  %s44_s27 = int_to_ptr.vmem [resolvable:$true] %s43_s27 }
   0x6   :  { %s689_s29 = smov 8   ;;  %s68_s9 = sshll.u32 %s957_s10, 4  ;;  %s69_s9 = int_to_ptr.hbm [resolvable:$true] %s68_s9 }
   0x7   :  { %49 = dma.hbm_to_vmem [thread:$0]  %s42_s25, 256, %s44_s27, [#allocation3], %s688_s28, %s688_s28, %s689_s29  }
   0x8   :  { %s690_s17 = smov [#allocation6]   ;;  %s79_s7 = sshll.u32 %s958_s11, 4  ;;  %s80_s7 = int_to_ptr.hbm [resolvable:$true] %s79_s7 }
   0x9   :  { %s70_s18 = sshll.u32 %s690_s17, 4  ;;  %s691_s20 = smov [#allocation7]   ;;  %s71_s18 = int_to_ptr.vmem [resolvable:$true] %s70_s18 }
   0xa   :  { %73 = dma.hbm_to_vmem [thread:$0]  %s69_s9, 16, %s71_s18, [#allocation5]  }
   0xb   :  { %s81_s22 = sshll.u32 %s691_s20, 4  ;;  %s82_s22 = int_to_ptr.vmem [resolvable:$true] %s81_s22 }
   0xc   :  { %84 = dma.hbm_to_vmem [thread:$0]  %s80_s7, 16, %s82_s22, [#allocation8]  }
   0xd   :  { %680 = dma.done.wait [#allocation3], 256  }
   0xe   :  { %681 = vsyncadd [#allocation3], 4294967040 }
   0xf   :  { %682 = dma.done.wait [#allocation5], 32  }
  0x10   :  { %683 = vsyncadd [#allocation5], 4294967264 }
  0x11   :  { %684 = dma.done.wait [#allocation8], 16  }
  0x12   :  { %685 = vsyncadd [#allocation8], 4294967280  ;;  %v114_v0 = vld [vmem:[%s950_s3 + $0x18] sm:$0xff]  ;;  %v113_v1 = vld [vmem:[%s950_s3 + $0x10] sm:$0xff]  ;;  %s692_s17 = smov 32   ;;  %vm115_vm0 = vcmask 261120  }
  0x13   :  { %134 = vmatpush.msra.mxu2 %v114_v0  ;;  %v112_v2 = vld [vmem:[%s950_s3 + $0x8] sm:$0xff]  ;;  %165 = vmatpush.msra.mxu1 %v114_v0  ;;  %v109_v3 = vld [vmem:[%s948_s1] sm:$0xff]  ;;  %v233_v10 = vld [vmem:[%s953_s6 + $0x18] sm:$0xff]  ;;  %v693_v60 = vmov 32.0   ;;  %vm330_vm14 = vcmask 130048  }
  0x14   :  { %v218_v4 = vld [vmem:[%s949_s2] sm:$0xff]  ;;  %v145_v6 = vmul.f32 %v109_v3, %v109_v3  ;;  %v219_v7 = vld [vmem:[%s949_s2 + $0x8] sm:$0xff]  ;;  %v232_v11 = vld [vmem:[%s953_s6 + $0x10] sm:$0xff] }
  0x15   :  { %135 = vmatpush.msra.mxu2 %v113_v1  ;;  %166 = vmatpush.msra.mxu1 %v113_v1  ;;  %v111_v5 = vld [vmem:[%s950_s3] sm:$0xff]  ;;  %v110_v8 = vld [vmem:[%s948_s1 + $0x8] sm:$0xff] }
  0x16   :  { %222 = vrot.lane.b32.xlu0 %v218_v4, %s692_s17  ;;  %v146_v9 = vmul.f32 %v110_v8, %v110_v8  ;;  %v231_v12 = vld [vmem:[%s953_s6 + $0x8] sm:$0xff]  ;;  %v230_v14 = vld [vmem:[%s953_s6] sm:$0xff] }
  0x17   :  { %136 = vmatpush.msra.mxu2 %v112_v2  ;;  %167 = vmatpush.msra.mxu1 %v112_v2  ;;  %v560_v33 = vld [vmem:[%s951_s4] ss:$0 sm:$0xff]  ;;  %v108_v53 = vld [vmem:[%s947_s0 + $0x8] sm:$0xff] }
  0x18   :  { %v561_v37 = vld [vmem:[%s952_s5] ss:$0 sm:$0xff] }
  0x19   :  { %137 = vmatpush.msra.mxu2 %v111_v5  ;;  %168 = vmatpush.msra.mxu1 %v111_v5  ;;  %v107_v57 = vld [vmem:[%s947_s0] sm:$0xff] }
  0x1a   :  { %538 = vmatmul.msk.f32.vlgmr.msra.gmra.mxu2 %vm115_vm0, %v109_v3  ;;  %540 = vmatmul.msk.f32.vlgmr.msra.gmra.mxu1 %vm115_vm0, %v145_v6 }
  0x1b   :  { %252 = vmatpush.msrb.mxu2 %v233_v10 }
  0x1d   :  { %253 = vmatpush.msrb.mxu2 %v232_v11 }
  0x1e   :  { %224 = vrot.lane.b32.xlu0 %v219_v7, %s692_s17 }
  0x1f   :  { %254 = vmatpush.msrb.mxu2 %v231_v12 }
  0x21   :  { %255 = vmatpush.msrb.mxu2 %v230_v14 }
  0x22   :  { %539 = vmatmul.msk.f32.gmra.mxu2 %vm115_vm0, %v110_v8  ;;  %541 = vmatmul.msk.f32.gmra.mxu1 %vm115_vm0, %v146_v9 }
  0x88   :  { %v223_v39 = vpop.permute.xlu0 %222 }
  0x90   :  { %v225_v49 = vpop.permute.xlu0 %224 }
  0x97   :  { %v170_v13 = vpop.f32.mrf.mxu1 }
  0x9d   :  { %v139_v15 = vpop.f32.mrf.mxu2 }
  0x9e   :  { %v176_v16 = vmul.f32 %v139_v15, %v139_v15  ;;  %v180_v32 = vsub.f32 %v109_v3, %v139_v15 }
  0x9f   :  { %v173_v20 = vpop.f32.mrf.mxu1 }
  0xa0   :  { %v178_v17 = vsub.f32 %v170_v13, %v176_v16 }
  0xa2   :  { %v182_v18 = vadd.f32 0.00064, %v178_v17 }
  0xa4   :  { %566 = vrsqrt.f32 %v182_v18  ;;  %vm190_vm2 = vweird.f32 %v182_v18 }
  0xa5   :  { %v142_v19 = vpop.f32.mrf.mxu2 }
  0xa6   :  { %v177_v21 = vmul.f32 %v142_v19, %v142_v19  ;;  %v181_v44 = vsub.f32 %v110_v8, %v142_v19 }
  0xa8   :  { %v179_v22 = vsub.f32 %v173_v20, %v177_v21 }
  0xaa   :  { %v567_v23 = vpop.eup %566  ;;  %v183_v24 = vadd.f32 0.00064, %v179_v22 }
  0xab   :  { %v185_v25 = vmul.f32 %v567_v23, %v182_v18  ;;  %vm191_vm1 = vweird.f32 %v567_v23 }
  0xac   :  { %568 = vrsqrt.f32 %v183_v24  ;;  %vm192_vm3 = vmor %vm190_vm2, %vm191_vm1  ;;  %vm200_vm5 = vweird.f32 %v183_v24 }
  0xad   :  { %v186_v26 = vmul.f32 %v567_v23, %v185_v25  ;;  %570 = vrcp.f32 %v693_v60  ;;  %v423_v60 = vld [vmem:[%s960_s13 + $0x40] sm:$0xff] }
  0xaf   :  { %v187_v27 = vmul.f32 0.5, %v186_v26 }
  0xb1   :  { %v188_v28 = vsub.f32 1.5, %v187_v27  ;;  %v562_v27 = vld [vmem:[%s955_s8] ss:$0 sm:$0xff] }
  0xb2   :  { %v569_v29 = vpop.eup %568 }
  0xb3   :  { %v189_v30 = vmul.f32 %v567_v23, %v188_v28  ;;  %v195_v31 = vmul.f32 %v569_v29, %v183_v24  ;;  %vm201_vm4 = vweird.f32 %v569_v29  ;;  %v571_v61 = vpop.eup %570 }
  0xb4   :  { %vm202_vm6 = vmor %vm200_vm5, %vm201_vm4  ;;  %v272_v62 = vmul.f32 32.0, %v571_v61  ;;  %vm276_vm7 = vweird.f32 %v571_v61 }
  0xb5   :  { %v196_v34 = vmul.f32 %v569_v29, %v195_v31  ;;  %v193_v35 = vsel %vm192_vm3, %v567_v23, %v189_v30  ;;  %v563_v31 = vld [vmem:[#allocation4] ss:$0 sm:$0xff] }
  0xb6   :  { %v204_v36 = vmul.f32 %v193_v35, %v180_v32  ;;  %v273_v63 = vsub.f32 1.0, %v272_v62  ;;  %v564_v62 = vld [vmem:[#allocation6] ss:$0 sm:$0xff] }
  0xb7   :  { %v197_v38 = vmul.f32 0.5, %v196_v34 }
  0xb8   :  { %v210_v40 = vmul.f32 %v560_v33, %v204_v36  ;;  %v274_v0 = vmul.f32 %v571_v61, %v273_v63  ;;  %v565_v63 = vld [vmem:[#allocation7] ss:$0 sm:$0xff] }
  0xb9   :  { %v198_v41 = vsub.f32 1.5, %v197_v38 }
  0xba   :  { %v216_v42 = vadd.f32 %v561_v37, %v210_v40  ;;  %v275_v1 = vadd.f32 %v571_v61, %v274_v0  ;;  %v421_v0 = vld [vmem:[%s960_s13 + $0x30] sm:$0xff] }
  0xbb   :  { %v199_v43 = vmul.f32 %v569_v29, %v198_v41  ;;  %v328_v41 = vld [vmem:[#allocation2] sm:$0xff] }
  0xbc   :  { %v228_v45 = vmul.f32 %v223_v39, %v216_v42  ;;  %v277_v2 = vsel %vm276_vm7, %v571_v61, %v275_v1  ;;  %v381_v42 = vld [vmem:[%s959_s12 + $0x18] sm:$0xff] }
  0xbd   :  { %v203_v46 = vsel %vm202_vm6, %v569_v29, %v199_v43  ;;  %v380_v43 = vld [vmem:[%s959_s12 + $0x10] sm:$0xff]  ;;  %v422_v61 = vld [vmem:[%s960_s13 + $0x38] sm:$0xff] }
  0xbe   :  { %542 = vmatmul.msk.f32.vlgmr.msrb.gmra.mxu2 %vm115_vm0, %v228_v45  ;;  %v205_v47 = vmul.f32 %v203_v46, %v181_v44  ;;  %v379_v44 = vld [vmem:[%s959_s12 + $0x8] sm:$0xff]  ;;  %v457_v46 = vld [vmem:[%s961_s14 + $0x18] sm:$0xff] }
  0xbf   :  { %v329_v45 = vld [vmem:[#allocation2 + $0x8] sm:$0xff]  ;;  %476 = vmatpush.msrb.mxu1 %v457_v46 }
  0xc0   :  { %v211_v48 = vmul.f32 %v560_v33, %v205_v47  ;;  %v456_v47 = vld [vmem:[%s961_s14 + $0x10] sm:$0xff] }
  0xc1   :  { %477 = vmatpush.msrb.mxu1 %v456_v47 }
  0xc2   :  { %v217_v50 = vadd.f32 %v561_v37, %v211_v48  ;;  %v455_v48 = vld [vmem:[%s961_s14 + $0x8] sm:$0xff] }
  0xc3   :  { %478 = vmatpush.msrb.mxu1 %v455_v48 }
  0xc4   :  { %v229_v51 = vmul.f32 %v225_v49, %v217_v50  ;;  %v378_v49 = vld [vmem:[%s959_s12] sm:$0xff] }
  0xc5   :  { %v454_v50 = vld [vmem:[%s961_s14] sm:$0xff] }
  0xc6   :  { %543 = vmatmul.msk.f32.gmra.mxu2 %vm115_vm0, %v229_v51  ;;  %479 = vmatpush.msrb.mxu1 %v454_v50  ;;  %v430_v51 = vld [vmem:[%s960_s13 + $0x78] sm:$0xff] }
  0xc7   :  { %431 = vmatpush.msra.mxu0 %v430_v51 }
 0x141   :  { %v257_v52 = vpop.f32.mrf.mxu2 }
 0x142   :  { %v844_v58 = vadd.f32 %v257_v52, %v107_v57  ;;  %v429_v52 = vld [vmem:[%s960_s13 + $0x70] sm:$0xff] }
 0x143   :  { %432 = vmatpush.msra.mxu0 %v429_v52  ;;  %v425_v57 = vld [vmem:[%s960_s13 + $0x50] sm:$0xff] }
 0x144   :  { %v265_v59 = vsel %vm115_vm0, %v844_v58, 0.0 }
 0x149   :  { %v260_v54 = vpop.f32.mrf.mxu2 }
 0x14a   :  { %v837_v55 = vadd.f32 %v260_v54, %v108_v53  ;;  %v428_v53 = vld [vmem:[%s960_s13 + $0x68] sm:$0xff]  ;;  %v427_v54 = vld [vmem:[%s960_s13 + $0x60] sm:$0xff] }
 0x14b   :  { %433 = vmatpush.msra.mxu0 %v428_v53 }
 0x14c   :  { %v268_v56 = vsel %vm115_vm0, %v837_v55, 0.0 }
 0x14d   :  { %269 = vadd.xlane.f32.xlu1 %v268_v56  ;;  %v426_v56 = vld [vmem:[%s960_s13 + $0x58] sm:$0xff]  ;;  %434 = vmatpush.msra.mxu0 %v427_v54 }
 0x14f   :  { %435 = vmatpush.msra.mxu0 %v426_v56 }
 0x151   :  { %436 = vmatpush.msra.mxu0 %v425_v57 }
 0x155   :  { %266 = vadd.xlane.f32.xlu1 %v265_v59  ;;  %v424_v59 = vld [vmem:[%s960_s13 + $0x48] sm:$0xff] }
 0x156   :  { %437 = vmatpush.msra.mxu0 %v424_v59 }
 0x158   :  { %438 = vmatpush.msra.mxu0 %v423_v60 }
 0x15a   :  { %439 = vmatpush.msra.mxu0 %v422_v61 }
 0x15c   :  { %440 = vmatpush.msra.mxu0 %v421_v0 }
 0x1c0   :  { %v270_v3 = vpop.xlane.xlu1 %269 }
 0x1c1   :  { %v279_v4 = vmul.f32 %v277_v2, %v270_v3  ;;  %v420_v3 = vld [vmem:[%s960_s13 + $0x28] sm:$0xff] }
 0x1c2   :  { %441 = vmatpush.msra.mxu0 %v420_v3 }
 0x1c3   :  { %v281_v5 = vsub.f32 %v837_v55, %v279_v4 }
 0x1c5   :  { %v283_v6 = vmul.f32 %v281_v5, %v281_v5 }
 0x1c7   :  { %v287_v7 = vsel %vm115_vm0, %v283_v6, 0.0 }
 0x1c8   :  { %288 = vadd.xlane.f32.xlu2 %v287_v7  ;;  %v267_v8 = vpop.xlane.xlu1 %266 }
 0x1c9   :  { %v278_v9 = vmul.f32 %v277_v2, %v267_v8 }
 0x1cb   :  { %v280_v10 = vsub.f32 %v844_v58, %v278_v9 }
 0x1cd   :  { %v282_v11 = vmul.f32 %v280_v10, %v280_v10 }
 0x1cf   :  { %v284_v12 = vsel %vm115_vm0, %v282_v11, 0.0 }
 0x1d0   :  { %285 = vadd.xlane.f32.xlu2 %v284_v12 }
 0x23b   :  { %v289_v13 = vpop.xlane.xlu2 %288 }
 0x23c   :  { %v291_v14 = vmul.f32 %v289_v13, %v277_v2 }
 0x23e   :  { %v293_v15 = vadd.f32 1e-05, %v291_v14  ;;  %v419_v14 = vld [vmem:[%s960_s13 + $0x20] sm:$0xff] }
 0x23f   :  { %442 = vmatpush.msra.mxu0 %v419_v14 }
 0x240   :  { %572 = vrsqrt.f32 %v293_v15  ;;  %vm310_vm9 = vweird.f32 %v293_v15 }
 0x243   :  { %v286_v16 = vpop.xlane.xlu2 %285 }
 0x244   :  { %v290_v17 = vmul.f32 %v286_v16, %v277_v2  ;;  %v417_v16 = vld [vmem:[%s960_s13 + $0x10] sm:$0xff] }
 0x246   :  { %v573_v18 = vpop.eup %572  ;;  %v292_v19 = vadd.f32 1e-05, %v290_v17  ;;  %v416_v17 = vld [vmem:[%s960_s13 + $0x8] sm:$0xff] }
 0x247   :  { %v305_v20 = vmul.f32 %v573_v18, %v293_v15  ;;  %vm311_vm8 = vweird.f32 %v573_v18  ;;  %v418_v15 = vld [vmem:[%s960_s13 + $0x18] sm:$0xff] }
 0x248   :  { %574 = vrsqrt.f32 %v292_v19  ;;  %vm312_vm10 = vmor %vm310_vm9, %vm311_vm8  ;;  %vm300_vm12 = vweird.f32 %v292_v19  ;;  %443 = vmatpush.msra.mxu0 %v418_v15 }
 0x249   :  { %v306_v21 = vmul.f32 %v573_v18, %v305_v20 }
 0x24a   :  { %444 = vmatpush.msra.mxu0 %v417_v16 }
 0x24b   :  { %v307_v22 = vmul.f32 0.5, %v306_v21 }
 0x24c   :  { %445 = vmatpush.msra.mxu0 %v416_v17 }
 0x24d   :  { %v308_v23 = vsub.f32 1.5, %v307_v22 }
 0x24e   :  { %v575_v24 = vpop.eup %574 }
 0x24f   :  { %v309_v25 = vmul.f32 %v573_v18, %v308_v23  ;;  %v295_v26 = vmul.f32 %v575_v24, %v292_v19  ;;  %vm301_vm11 = vweird.f32 %v575_v24 }
 0x250   :  { %vm302_vm13 = vmor %vm300_vm12, %vm301_vm11 }
 0x251   :  { %v313_v28 = vsel %vm312_vm10, %v573_v18, %v309_v25  ;;  %v296_v29 = vmul.f32 %v575_v24, %v295_v26  ;;  %v415_v18 = vld [vmem:[%s960_s13] sm:$0xff] }
 0x252   :  { %v315_v30 = vmul.f32 %v313_v28, %v281_v5  ;;  %446 = vmatpush.msra.mxu0 %v415_v18 }
 0x253   :  { %v297_v32 = vmul.f32 0.5, %v296_v29 }
 0x254   :  { %v321_v33 = vmul.f32 %v562_v27, %v315_v30 }
 0x255   :  { %v298_v34 = vsub.f32 1.5, %v297_v32 }
 0x256   :  { %v855_v35 = vadd.f32 %v563_v31, %v321_v33 }
 0x257   :  { %v299_v36 = vmul.f32 %v575_v24, %v298_v34 }
 0x258   :  { %351 = vmatpush.msra.mxu3 %v855_v35 }
 0x259   :  { %v303_v37 = vsel %vm302_vm13, %v575_v24, %v299_v36 }
 0x25a   :  { %v314_v38 = vmul.f32 %v303_v37, %v280_v10 }
 0x25c   :  { %v320_v39 = vmul.f32 %v562_v27, %v314_v38 }
 0x25e   :  { %v326_v40 = vadd.f32 %v563_v31, %v320_v39 }
 0x260   :  { %352 = vmatpush.msra.mxu3 %v326_v40 }
 0x261   :  { %544 = vmatmul.msk.f32.vlgmr.msra.gmra.mxu3 %vm330_vm14, %v328_v41 }
 0x262   :  { %400 = vmatpush.msrb.mxu3 %v381_v42 }
 0x264   :  { %401 = vmatpush.msrb.mxu3 %v380_v43 }
 0x266   :  { %402 = vmatpush.msrb.mxu3 %v379_v44 }
 0x268   :  { %403 = vmatpush.msrb.mxu3 %v378_v49 }
 0x269   :  { %545 = vmatmul.msk.f32.gmra.mxu3 %vm330_vm14, %v329_v45 }
 0x2e4   :  { %v354_v1 = vpop.f32.mrf.mxu3 }
 0x2e5   :  { %v360_v2 = vsub.f32 %v354_v1, %v326_v40 }
 0x2e7   :  { %v366_v4 = vmul.f32 %v564_v62, %v360_v2  ;;  %v374_v5 = vmul.f32 %v565_v63, %v360_v2 }
 0x2e9   :  { %v368_v6 = vadd.f32 %v366_v4, %v326_v40  ;;  %v376_v7 = vadd.f32 %v374_v5, %v326_v40 }
 0x2eb   :  { %546 = vmatmul.msk.f32.vlgmr.msrb.gmra.mxu3 %vm115_vm0, %v368_v6  ;;  %548 = vmatmul.msk.f32.vlgmr.msrb.gmra.mxu1 %vm115_vm0, %v376_v7 }
 0x2ec   :  { %v357_v8 = vpop.f32.mrf.mxu3 }
 0x2ed   :  { %v361_v9 = vsub.f32 %v357_v8, %v855_v35 }
 0x2ef   :  { %v367_v10 = vmul.f32 %v564_v62, %v361_v9  ;;  %v375_v11 = vmul.f32 %v565_v63, %v361_v9 }
 0x2f1   :  { %v369_v12 = vadd.f32 %v367_v10, %v855_v35  ;;  %v377_v13 = vadd.f32 %v375_v11, %v855_v35 }
 0x2f3   :  { %547 = vmatmul.msk.f32.gmra.mxu3 %vm115_vm0, %v369_v12  ;;  %549 = vmatmul.msk.f32.gmra.mxu1 %vm115_vm0, %v377_v13 }
 0x368   :  { %v481_v25 = vpop.f32.mrf.mxu1 }
 0x369   :  { %v550_v26 = vmul.f32 -1.442695, %v481_v25 }
 0x36b   :  { %576 = vpow2.f32 %v550_v26 }
 0x36e   :  { %v405_v19 = vpop.f32.mrf.mxu3 }
 0x36f   :  { %v411_v20 = vmax.f32 %v405_v19, 0.0 }
 0x370   :  { %v484_v27 = vpop.f32.mrf.mxu1 }
 0x371   :  { %v413_v21 = vmul.f32 %v411_v20, %v411_v20  ;;  %v551_v28 = vmul.f32 -1.442695, %v484_v27  ;;  %v577_v29 = vpop.eup %576 }
 0x372   :  { %v493_v30 = vadd.f32 1.0, %v577_v29 }
 0x373   :  { %447 = vmatmul.f32.vlgmr.msra.gmra.mxu0 %v413_v21  ;;  %578 = vpow2.f32 %v551_v28 }
 0x374   :  { %580 = vrcp.f32 %v493_v30  ;;  %v506_v41 = vand.u32 2147483648, %v493_v30  ;;  %vm500_vm1 = vweird.f32 %v493_v30  ;;  %v504_v42 = vand.u32 2147483647, %v493_v30 }
 0x376   :  { %v408_v22 = vpop.f32.mrf.mxu3  ;;  %v507_v45 = vor.u32 1.1754944e-38, %v506_v41  ;;  %vm505_vm3 = vcmp.eq.f32.partialorder %v504_v42, 8.507059e+37 }
 0x377   :  { %v412_v23 = vmax.f32 %v408_v22, 0.0 }
 0x379   :  { %v414_v24 = vmul.f32 %v412_v23, %v412_v23  ;;  %v579_v31 = vpop.eup %578 }
 0x37a   :  { %v494_v32 = vadd.f32 1.0, %v579_v31  ;;  %v581_v33 = vpop.eup %580 }
 0x37b   :  { %450 = vmatmul.f32.gmra.mxu0 %v414_v24  ;;  %v496_v34 = vmul.f32 %v581_v33, %v493_v30  ;;  %vm501_vm15 = vweird.f32 %v581_v33 }
 0x37c   :  { %582 = vrcp.f32 %v494_v32  ;;  %vm502_vm2 = vmor %vm500_vm1, %vm501_vm15  ;;  %v521_v50 = vand.u32 2147483648, %v494_v32  ;;  %vm515_vm5 = vweird.f32 %v494_v32  ;;  %v519_v52 = vand.u32 2147483647, %v494_v32 }
 0x37d   :  { %v497_v35 = vsub.f32 1.0, %v496_v34 }
 0x37e   :  { %v522_v54 = vor.u32 1.1754944e-38, %v521_v50  ;;  %vm520_vm7 = vcmp.eq.f32.partialorder %v519_v52, 8.507059e+37 }
 0x37f   :  { %v498_v37 = vmul.f32 %v581_v33, %v497_v35 }
 0x381   :  { %v499_v39 = vadd.f32 %v581_v33, %v498_v37 }
 0x382   :  { %v583_v36 = vpop.eup %582 }
 0x383   :  { %v511_v38 = vmul.f32 %v583_v36, %v494_v32  ;;  %v503_v43 = vsel %vm502_vm2, %v581_v33, %v499_v39  ;;  %vm516_vm4 = vweird.f32 %v583_v36 }
 0x384   :  { %v508_v47 = vsel %vm505_vm3, %v507_v45, %v503_v43  ;;  %vm517_vm6 = vmor %vm515_vm5, %vm516_vm4 }
 0x385   :  { %v512_v40 = vsub.f32 1.0, %v511_v38 }
 0x387   :  { %v513_v44 = vmul.f32 %v583_v36, %v512_v40 }
 0x389   :  { %v514_v49 = vadd.f32 %v583_v36, %v513_v44 }
 0x38b   :  { %v518_v53 = vsel %vm517_vm6, %v583_v36, %v514_v49 }
 0x38c   :  { %v523_v57 = vsel %vm520_vm7, %v522_v54, %v518_v53 }
 0x3f0   :  { %v448_v46 = vpop.f32.mrf.mxu0 }
 0x3f1   :  { %v525_v48 = vmul.f32 %v508_v47, %v448_v46 }
 0x3f3   :  { %v527_v51 = vadd.f32 %v525_v48, %v844_v58 }
 0x3f5   :  { %529 = vst.msk [vmem:[%s962_s15] sm:$0xff] %vm115_vm0, %v527_v51 }
 0x3f8   :  { %v451_v56 = vpop.f32.mrf.mxu0 }
 0x3f9   :  { %v526_v59 = vmul.f32 %v523_v57, %v451_v56 }
 0x3fb   :  { %v528_v60 = vadd.f32 %v526_v59, %v837_v55 }
 0x3fd   :  { %530 = vst.msk [vmem:[%s962_s15 + $0x8] sm:$0xff] %vm115_vm0, %v528_v60 }
 0x3fe   :  { %535 = vsyncpa [#allocation3], 1 }
 0x3ff   :  { %536 = vsyncpa [#allocation5], 1 }
 0x400   :  { %537 = vsyncpa [#allocation8], 1 }

// kernel: rwkv_encoder_forward.15
= control target key start
LH: loop header
LB: loop body
LE: loop exit
PB: predicated region body
PF: predicated region fallthrough
CT: control target
= control target key end

     0   :  { %vm20_vm0 = vcmask 261120   ;;  %s244_s0 = inlined_call_operand.vmem [shape: f32[16,32], index: 0, kind: input, shape index: {}]   ;;  %s245_s1 = inlined_call_operand.vmem [shape: f32[1,32], index: 1, kind: input, shape index: {}]   ;;  %s246_s2 = inlined_call_operand.vmem [shape: f32[1,32], index: 2, kind: input, shape index: {}]   ;;  %s247_s3 = inlined_call_operand.vmem [shape: f32[32,64], index: 3, kind: input, shape index: {}]   ;;  %s248_s4 = inlined_call_operand.hbm [shape: f32[16,64], index: 4, kind: output, shape index: {}]  }
   0x1   :  { %v18_v0 = vld [vmem:[%s244_s0] sm:$0xff] }
   0x2   :  { %v21_v1 = vsel %vm20_vm0, %v18_v0, 0.0 }
   0x3   :  { %9 = vsyncpa [#allocation3], 0  ;;  %22 = vadd.xlane.f32.xlu0 %v21_v1  ;;  %v19_v2 = vld [vmem:[%s244_s0 + $0x8] sm:$0xff]  ;;  %v182_v4 = vmov 32.0   ;;  %v87_v21 = vld [vmem:[%s247_s3 + $0x18] sm:$0xff]  ;;  %vm117_vm8 = vcmask 523264  }
   0x4   :  { %v24_v3 = vsel %vm20_vm0, %v19_v2, 0.0  ;;  %150 = vrcp.f32 %v182_v4  ;;  %106 = vmatpush.msra.mxu0 %v87_v21  ;;  %140 = vmatpush.msra.mxu1 %v87_v21  ;;  %v86_v22 = vld [vmem:[%s247_s3 + $0x10] sm:$0xff]  ;;  %v85_v23 = vld [vmem:[%s247_s3 + $0x8] sm:$0xff]  ;;  %v84_v24 = vld [vmem:[%s247_s3] sm:$0xff]  ;;  %s126_s5 = sshll.u32 %s248_s4, 4  ;;  %s184_s6 = smov 128   ;;  %s127_s5 = int_to_ptr.hbm [resolvable:$true] %s126_s5 }
   0x5   :  { %v148_v39 = vld [vmem:[%s245_s1] ss:$0 sm:$0xff]  ;;  %s183_s1 = smov [#allocation2]   ;;  %s185_s7 = smov 8  }
   0x6   :  { %107 = vmatpush.msra.mxu0 %v86_v22  ;;  %141 = vmatpush.msra.mxu1 %v86_v22  ;;  %v149_v43 = vld [vmem:[%s246_s2] ss:$0 sm:$0xff]  ;;  %s124_s2 = sshll.u32 %s183_s1, 4  ;;  %s125_s2 = int_to_ptr.vmem [resolvable:$true] %s124_s2 }
   0x8   :  { %108 = vmatpush.msra.mxu0 %v85_v23  ;;  %142 = vmatpush.msra.mxu1 %v85_v23 }
   0xa   :  { %v151_v5 = vpop.eup %150  ;;  %109 = vmatpush.msra.mxu0 %v84_v24  ;;  %143 = vmatpush.msra.mxu1 %v84_v24 }
   0xb   :  { %25 = vadd.xlane.f32.xlu0 %v24_v3  ;;  %v28_v6 = vmul.f32 32.0, %v151_v5  ;;  %vm32_vm1 = vweird.f32 %v151_v5 }
   0xd   :  { %v29_v7 = vsub.f32 1.0, %v28_v6 }
   0xf   :  { %v30_v8 = vmul.f32 %v151_v5, %v29_v7 }
  0x11   :  { %v31_v9 = vadd.f32 %v151_v5, %v30_v8 }
  0x13   :  { %v33_v10 = vsel %vm32_vm1, %v151_v5, %v31_v9 }
  0x76   :  { %v23_v11 = vpop.xlane.xlu0 %22 }
  0x77   :  { %v34_v12 = vmul.f32 %v33_v10, %v23_v11 }
  0x79   :  { %v36_v13 = vsub.f32 %v18_v0, %v34_v12 }
  0x7b   :  { %v38_v14 = vmul.f32 %v36_v13, %v36_v13 }
  0x7d   :  { %v40_v15 = vsel %vm20_vm0, %v38_v14, 0.0 }
  0x7e   :  { %41 = vadd.xlane.f32.xlu1 %v40_v15  ;;  %v26_v16 = vpop.xlane.xlu0 %25 }
  0x7f   :  { %v35_v17 = vmul.f32 %v33_v10, %v26_v16 }
  0x81   :  { %v37_v18 = vsub.f32 %v19_v2, %v35_v17 }
  0x83   :  { %v39_v19 = vmul.f32 %v37_v18, %v37_v18 }
  0x85   :  { %v43_v20 = vsel %vm20_vm0, %v39_v19, 0.0 }
  0x86   :  { %44 = vadd.xlane.f32.xlu1 %v43_v20 }
  0xf1   :  { %v42_v25 = vpop.xlane.xlu1 %41 }
  0xf2   :  { %v46_v26 = vmul.f32 %v42_v25, %v33_v10 }
  0xf4   :  { %v48_v27 = vadd.f32 1e-05, %v46_v26 }
  0xf6   :  { %152 = vrsqrt.f32 %v48_v27  ;;  %vm56_vm3 = vweird.f32 %v48_v27 }
  0xf9   :  { %v45_v28 = vpop.xlane.xlu1 %44 }
  0xfa   :  { %v47_v29 = vmul.f32 %v45_v28, %v33_v10 }
  0xfc   :  { %v153_v30 = vpop.eup %152  ;;  %v49_v31 = vadd.f32 1e-05, %v47_v29 }
  0xfd   :  { %v51_v32 = vmul.f32 %v153_v30, %v48_v27  ;;  %vm57_vm2 = vweird.f32 %v153_v30 }
  0xfe   :  { %154 = vrsqrt.f32 %v49_v31  ;;  %vm58_vm4 = vmor %vm56_vm3, %vm57_vm2  ;;  %vm66_vm6 = vweird.f32 %v49_v31 }
  0xff   :  { %v52_v33 = vmul.f32 %v153_v30, %v51_v32 }
 0x101   :  { %v53_v34 = vmul.f32 0.5, %v52_v33 }
 0x103   :  { %v54_v35 = vsub.f32 1.5, %v53_v34 }
 0x104   :  { %v155_v36 = vpop.eup %154 }
 0x105   :  { %v55_v37 = vmul.f32 %v153_v30, %v54_v35  ;;  %v61_v38 = vmul.f32 %v155_v36, %v49_v31  ;;  %vm67_vm5 = vweird.f32 %v155_v36 }
 0x106   :  { %vm68_vm7 = vmor %vm66_vm6, %vm67_vm5 }
 0x107   :  { %v59_v40 = vsel %vm58_vm4, %v153_v30, %v55_v37  ;;  %v62_v41 = vmul.f32 %v155_v36, %v61_v38 }
 0x108   :  { %v70_v42 = vmul.f32 %v59_v40, %v36_v13 }
 0x109   :  { %v63_v44 = vmul.f32 0.5, %v62_v41 }
 0x10a   :  { %v76_v45 = vmul.f32 %v148_v39, %v70_v42 }
 0x10b   :  { %v64_v46 = vsub.f32 1.5, %v63_v44 }
 0x10c   :  { %v82_v47 = vadd.f32 %v149_v43, %v76_v45 }
 0x10d   :  { %v65_v48 = vmul.f32 %v155_v36, %v64_v46 }
 0x10e   :  { %138 = vmatmul.msk.f32.vlgmr.msra.gmra.mxu0 %vm20_vm0, %v82_v47 }
 0x10f   :  { %v69_v49 = vsel %vm68_vm7, %v155_v36, %v65_v48 }
 0x110   :  { %v71_v50 = vmul.f32 %v69_v49, %v37_v18 }
 0x112   :  { %v77_v51 = vmul.f32 %v148_v39, %v71_v50 }
 0x114   :  { %v83_v52 = vadd.f32 %v149_v43, %v77_v51 }
 0x116   :  { %139 = vmatmul.msk.f32.vlgmr.msra.gmra.mxu1 %vm20_vm0, %v83_v52 }
 0x18b   :  { %v111_v53 = vpop.f32.mrf.mxu0 }
 0x18c   :  { %118 = vst.msk [vmem:[#allocation2] sm:$0xff] %vm117_vm8, %v111_v53 }
 0x193   :  { %v114_v54 = vpop.f32.mrf.mxu1 }
 0x194   :  { %119 = vst.msk [vmem:[#allocation2 + $0x8] sm:$0xff] %vm117_vm8, %v114_v54 }
 0x195   :  { %132 = dma.vmem_to_hbm [thread:$0]  %s125_s2, 256, %s127_s5, [#allocation3], %s184_s6, %s184_s6, %s185_s7  }
 0x196   :  { %180 = dma.done.wait [#allocation3], 256  }
 0x197   :  { %181 = vsyncadd [#allocation3], 4294967040 }
 0x198   :  { %137 = vsyncpa [#allocation3], 1 }

// kernel: rwkv_encoder_forward.12
= control target key start
LH: loop header
LB: loop body
LE: loop exit
PB: predicated region body
PF: predicated region fallthrough
CT: control target
= control target key end

     0   :  { %19 = vsyncpa [#allocation3], 0  ;;  %s1336_s0 = inlined_call_operand.vmem [shape: f32[16,32], index: 0, kind: input, shape index: {}]   ;;  %s1337_s1 = inlined_call_operand.hbm [shape: f32[16,16], index: 1, kind: input, shape index: {}]   ;;  %s1338_s2 = inlined_call_operand.hbm [shape: f32[1,32], index: 2, kind: input, shape index: {}]   ;;  %s1339_s3 = inlined_call_operand.hbm [shape: f32[1,32], index: 3, kind: input, shape index: {}]   ;;  %s1340_s4 = inlined_call_operand.hbm [shape: f32[1,32], index: 4, kind: input, shape index: {}]   ;;  %s1341_s5 = inlined_call_operand.vmem [shape: f32[1,160], index: 5, kind: input, shape index: {}]   ;;  %s1342_s6 = inlined_call_operand.vmem [shape: f32[32,160], index: 6, kind: input, shape index: {}]   ;;  %s1343_s7 = inlined_call_operand.vmem [shape: f32[160,160], index: 7, kind: input, shape index: {}]   ;;  %s1344_s8 = inlined_call_operand.vmem [shape: f32[128,128], index: 8, kind: input, shape index: {}]   ;;  %s1345_s9 = inlined_call_operand.hbm [shape: f32[32,64], index: 9, kind: input, shape index: {}]   ;;  %s1346_s10 = inlined_call_operand.vmem [shape: f32[64,32], index: 10, kind: input, shape index: {}]   ;;  %s1347_s11 = inlined_call_operand.hbm [shape: f32[1,32], index: 11, kind: input, shape index: {}]   ;;  %s1348_s12 = inlined_call_operand.vmem [shape: f32[16,128], index: 12, kind: output, shape index: {0}]   ;;  %s1349_s13 = inlined_call_operand.vmem [shape: f32[16,32], index: 13, kind: output, shape index: {1}]  }
   0x1   :  { %20 = vsyncpa [#allocation5], 0 }
   0x2   :  { %21 = vsyncpa [#allocation8], 0  ;;  %s43_s27 = sshll.u32 %s1338_s2, 4  ;;  %s44_s27 = int_to_ptr.hbm [resolvable:$true] %s43_s27 }
   0x3   :  { %22 = vsyncpa [#allocation11], 0  ;;  %s925_s28 = smov [#allocation4]   ;;  %s65_s15 = sshll.u32 %s1340_s4, 4  ;;  %s66_s15 = int_to_ptr.hbm [resolvable:$true] %s65_s15 }
   0x4   :  { %s45_s29 = sshll.u32 %s925_s28, 4  ;;  %s926_s16 = smov [#allocation7]   ;;  %s46_s29 = int_to_ptr.vmem [resolvable:$true] %s45_s29 }
   0x5   :  { %48 = dma.hbm_to_vmem [thread:$0]  %s44_s27, 16, %s46_s29, [#allocation5]  }
   0x6   :  { %s67_s17 = sshll.u32 %s926_s16, 4  ;;  %s29_s20 = sshll.u32 %s1337_s1, 4  ;;  %s68_s17 = int_to_ptr.vmem [resolvable:$true] %s67_s17  ;;  %s30_s20 = int_to_ptr.hbm [resolvable:$true] %s29_s20 }
   0x7   :  { %70 = dma.hbm_to_vmem [thread:$0]  %s66_s15, 16, %s68_s17, [#allocation8]  }
   0x8   :  { %s927_s2 = smov [#allocation2]   ;;  %s54_s24 = sshll.u32 %s1339_s3, 4  ;;  %s55_s24 = int_to_ptr.hbm [resolvable:$true] %s54_s24 }
   0x9   :  { %s31_s21 = sshll.u32 %s927_s2, 4  ;;  %s928_s25 = smov 128   ;;  %s32_s21 = int_to_ptr.vmem [resolvable:$true] %s31_s21 }
   0xa   :  { %s929_s4 = smov 8   ;;  %s930_s26 = smov [#allocation6]  }
   0xb   :  { %37 = dma.hbm_to_vmem [thread:$0]  %s30_s20, 256, %s32_s21, [#allocation3], %s928_s25, %s928_s25, %s929_s4  }
   0xc   :  { %s56_s27 = sshll.u32 %s930_s26, 4  ;;  %s83_s1 = sshll.u32 %s1345_s9, 4  ;;  %s57_s27 = int_to_ptr.vmem [resolvable:$true] %s56_s27  ;;  %s84_s1 = int_to_ptr.hbm [resolvable:$true] %s83_s1 }
   0xd   :  { %59 = dma.hbm_to_vmem [thread:$0]  %s55_s24, 16, %s57_s27, [#allocation5]  }
   0xe   :  { %s99_s15 = sshll.u32 %s1347_s11, 4  ;;  %s931_s16 = smov [#allocation9]   ;;  %s100_s15 = int_to_ptr.hbm [resolvable:$true] %s99_s15 }
   0xf   :  { %s85_s17 = sshll.u32 %s931_s16, 4  ;;  %s932_s3 = smov [#allocation10]   ;;  %s86_s17 = int_to_ptr.vmem [resolvable:$true] %s85_s17 }
  0x10   :  { %91 = dma.hbm_to_vmem [thread:$0]  %s84_s1, 512, %s86_s17, [#allocation8], %s928_s25, %s928_s25, %s929_s4  }
  0x11   :  { %s101_s18 = sshll.u32 %s932_s3, 4  ;;  %s102_s18 = int_to_ptr.vmem [resolvable:$true] %s101_s18 }
  0x12   :  { %104 = dma.hbm_to_vmem [thread:$0]  %s100_s15, 16, %s102_s18, [#allocation11]  }
  0x13   :  { %917 = dma.done.wait [#allocation3], 256  }
  0x14   :  { %918 = vsyncadd [#allocation3], 4294967040 }
  0x15   :  { %919 = dma.done.wait [#allocation5], 32  }
  0x16   :  { %920 = vsyncadd [#allocation5], 4294967264 }
  0x17   :  { %921 = dma.done.wait [#allocation8], 528  }
  0x18   :  { %922 = vsyncadd [#allocation8], 4294966768 }
  0x19   :  { %923 = dma.done.wait [#allocation11], 16  }
  0x1a   :  { %924 = vsyncadd [#allocation11], 4294967280  ;;  %vm131_vm0 = vcmask 261120   ;;  %v130_v0 = vld [vmem:[%s1336_s0 + $0x8] sm:$0xff]  ;;  %v129_v2 = vld [vmem:[%s1336_s0] sm:$0xff]  ;;  %v933_v4 = vmov 32.0  }
  0x1b   :  { %v135_v1 = vsel %vm131_vm0, %v130_v0, 0.0  ;;  %v132_v3 = vsel %vm131_vm0, %v129_v2, 0.0  ;;  %739 = vrcp.f32 %v933_v4  ;;  %v735_v35 = vld [vmem:[#allocation4] ss:$0 sm:$0xff]  ;;  %v736_v38 = vld [vmem:[#allocation6] ss:$0 sm:$0xff] }
  0x1c   :  { %136 = vadd.xlane.f32.xlu0 %v135_v1  ;;  %v195_v49 = vld [vmem:[#allocation2] sm:$0xff]  ;;  %vm197_vm8 = vcmask 130048   ;;  %v196_v50 = vld [vmem:[#allocation2 + $0x8] sm:$0xff]  ;;  %v243_v51 = vld [vmem:[%s1342_s6 + $0x30] sm:$0xff]  ;;  %s934_s19 = smov 96   ;;  %vm511_vm9 = vcmask 523264  }
  0x1d   :  { %v244_v52 = vld [vmem:[%s1342_s6 + $0x38] sm:$0xff]  ;;  %v241_v53 = vld [vmem:[%s1342_s6 + $0x20] sm:$0xff]  ;;  %v242_v54 = vld [vmem:[%s1342_s6 + $0x28] sm:$0xff]  ;;  %vm514_vm10 = vcmask 785408  }
  0x1e   :  { %286 = vmatpush.msra.mxu2 %v244_v52  ;;  %v239_v55 = vld [vmem:[%s1342_s6 + $0x10] sm:$0xff]  ;;  %v240_v56 = vld [vmem:[%s1342_s6 + $0x18] sm:$0xff]  ;;  %v237_v57 = vld [vmem:[%s1342_s6] sm:$0xff] }
  0x1f   :  { %v238_v58 = vld [vmem:[%s1342_s6 + $0x8] sm:$0xff]  ;;  %v331_v59 = vld [vmem:[%s1343_s7 + $0xf0] sm:$0xff]  ;;  %v332_v60 = vld [vmem:[%s1343_s7 + $0xf8] sm:$0xff]  ;;  %s936_s6 = smov 32  }
  0x20   :  { %287 = vmatpush.msra.mxu2 %v242_v54  ;;  %v329_v61 = vld [vmem:[%s1343_s7 + $0xe0] sm:$0xff]  ;;  %353 = vmatpush.msra.mxu3 %v331_v59  ;;  %v330_v62 = vld [vmem:[%s1343_s7 + $0xe8] sm:$0xff]  ;;  %v327_v63 = vld [vmem:[%s1343_s7 + $0xd0] sm:$0xff] }
  0x21   :  { %v740_v5 = vpop.eup %739  ;;  %v325_v1 = vld [vmem:[%s1343_s7 + $0xc0] sm:$0xff]  ;;  %v324_v4 = vld [vmem:[%s1343_s7 + $0xb8] sm:$0xff]  ;;  %v606_v54 = vld [vmem:[#allocation9 + $0x18] sm:$0xff] }
  0x22   :  { %v139_v6 = vmul.f32 32.0, %v740_v5  ;;  %vm143_vm1 = vweird.f32 %v740_v5  ;;  %288 = vmatpush.msra.mxu2 %v240_v56  ;;  %354 = vmatpush.msra.mxu3 %v329_v61  ;;  %v604_v56 = vld [vmem:[#allocation9 + $0x8] sm:$0xff] }
  0x24   :  { %133 = vadd.xlane.f32.xlu0 %v132_v3  ;;  %v140_v7 = vsub.f32 1.0, %v139_v6  ;;  %289 = vmatpush.msra.mxu2 %v238_v58  ;;  %v323_v3 = vld [vmem:[%s1343_s7 + $0xb0] sm:$0xff]  ;;  %v322_v6 = vld [vmem:[%s1343_s7 + $0xa8] sm:$0xff]  ;;  %v341_v58 = vld [vmem:[%s1341_s5] sm:$0x3]  ;;  %s935_s5 = smov 64  }
  0x25   :  { %355 = vmatpush.msra.mxu3 %v327_v63  ;;  %v343_v59 = vperm.slane %v341_v58, 0 }
  0x26   :  { %v141_v8 = vmul.f32 %v740_v5, %v140_v7  ;;  %v319_v7 = vld [vmem:[%s1343_s7 + $0x90] sm:$0xff] }
  0x27   :  { %356 = vmatpush.msra.mxu3 %v325_v1  ;;  %v344_v1 = vperm.slane %v341_v58, 1 }
  0x28   :  { %v142_v9 = vadd.f32 %v740_v5, %v141_v8  ;;  %v320_v8 = vld [vmem:[%s1343_s7 + $0x98] sm:$0xff] }
  0x29   :  { %357 = vmatpush.msra.mxu3 %v323_v3 }
  0x2a   :  { %v144_v10 = vsel %vm143_vm1, %v740_v5, %v142_v9  ;;  %v321_v5 = vld [vmem:[%s1343_s7 + $0xa0] sm:$0xff] }
  0x2b   :  { %358 = vmatpush.msra.mxu3 %v321_v5  ;;  %v317_v9 = vld [vmem:[%s1343_s7 + $0x80] sm:$0xff] }
  0x2d   :  { %359 = vmatpush.msra.mxu3 %v319_v7 }
  0x2f   :  { %360 = vmatpush.msra.mxu3 %v317_v9 }
  0x8f   :  { %v137_v11 = vpop.xlane.xlu0 %136 }
  0x90   :  { %v146_v12 = vmul.f32 %v144_v10, %v137_v11  ;;  %v315_v11 = vld [vmem:[%s1343_s7 + $0x70] sm:$0xff] }
  0x91   :  { %361 = vmatpush.msra.mxu3 %v315_v11 }
  0x92   :  { %v148_v13 = vsub.f32 %v130_v0, %v146_v12  ;;  %v328_v0 = vld [vmem:[%s1343_s7 + $0xd8] sm:$0xff] }
  0x93   :  { %v316_v12 = vld [vmem:[%s1343_s7 + $0x78] sm:$0xff] }
  0x94   :  { %v150_v14 = vmul.f32 %v148_v13, %v148_v13 }
  0x96   :  { %v154_v15 = vsel %vm131_vm0, %v150_v14, 0.0  ;;  %v313_v14 = vld [vmem:[%s1343_s7 + $0x60] sm:$0xff] }
  0x97   :  { %155 = vadd.xlane.f32.xlu1 %v154_v15  ;;  %v134_v16 = vpop.xlane.xlu0 %133  ;;  %v314_v15 = vld [vmem:[%s1343_s7 + $0x68] sm:$0xff]  ;;  %362 = vmatpush.msra.mxu3 %v313_v14 }
  0x98   :  { %v145_v17 = vmul.f32 %v144_v10, %v134_v16 }
  0x9a   :  { %v147_v18 = vsub.f32 %v129_v2, %v145_v17  ;;  %v326_v2 = vld [vmem:[%s1343_s7 + $0xc8] sm:$0xff] }
  0x9c   :  { %v149_v19 = vmul.f32 %v147_v18, %v147_v18 }
  0x9e   :  { %v151_v20 = vsel %vm131_vm0, %v149_v19, 0.0  ;;  %v312_v19 = vld [vmem:[%s1343_s7 + $0x58] sm:$0xff] }
  0x9f   :  { %152 = vadd.xlane.f32.xlu1 %v151_v20 }
 0x10a   :  { %v156_v21 = vpop.xlane.xlu1 %155 }
 0x10b   :  { %v158_v22 = vmul.f32 %v156_v21, %v144_v10 }
 0x10d   :  { %v160_v23 = vadd.f32 1e-05, %v158_v22  ;;  %v309_v22 = vld [vmem:[%s1343_s7 + $0x40] sm:$0xff] }
 0x10f   :  { %741 = vrsqrt.f32 %v160_v23  ;;  %vm177_vm3 = vweird.f32 %v160_v23 }
 0x112   :  { %v153_v24 = vpop.xlane.xlu1 %152 }
 0x113   :  { %v157_v25 = vmul.f32 %v153_v24, %v144_v10  ;;  %v318_v10 = vld [vmem:[%s1343_s7 + $0x88] sm:$0xff] }
 0x115   :  { %v742_v26 = vpop.eup %741  ;;  %v159_v27 = vadd.f32 1e-05, %v157_v25 }
 0x116   :  { %v172_v28 = vmul.f32 %v742_v26, %v160_v23  ;;  %vm178_vm2 = vweird.f32 %v742_v26  ;;  %v310_v23 = vld [vmem:[%s1343_s7 + $0x48] sm:$0xff] }
 0x117   :  { %743 = vrsqrt.f32 %v159_v27  ;;  %vm179_vm4 = vmor %vm177_vm3, %vm178_vm2  ;;  %vm167_vm6 = vweird.f32 %v159_v27 }
 0x118   :  { %v173_v29 = vmul.f32 %v742_v26, %v172_v28  ;;  %v307_v28 = vld [vmem:[%s1343_s7 + $0x30] sm:$0xff] }
 0x11a   :  { %v174_v30 = vmul.f32 0.5, %v173_v29  ;;  %v308_v29 = vld [vmem:[%s1343_s7 + $0x38] sm:$0xff] }
 0x11c   :  { %v175_v31 = vsub.f32 1.5, %v174_v30  ;;  %v305_v30 = vld [vmem:[%s1343_s7 + $0x20] sm:$0xff] }
 0x11d   :  { %v744_v32 = vpop.eup %743 }
 0x11e   :  { %v176_v33 = vmul.f32 %v742_v26, %v175_v31  ;;  %v162_v34 = vmul.f32 %v744_v32, %v159_v27  ;;  %vm168_vm5 = vweird.f32 %v744_v32  ;;  %v306_v31 = vld [vmem:[%s1343_s7 + $0x28] sm:$0xff] }
 0x11f   :  { %vm169_vm7 = vmor %vm167_vm6, %vm168_vm5 }
 0x120   :  { %v180_v36 = vsel %vm179_vm4, %v742_v26, %v176_v33  ;;  %v163_v37 = vmul.f32 %v744_v32, %v162_v34  ;;  %v304_v33 = vld [vmem:[%s1343_s7 + $0x18] sm:$0xff]  ;;  %v301_v34 = vld [vmem:[%s1343_s7] sm:$0xff] }
 0x121   :  { %v182_v39 = vmul.f32 %v180_v36, %v148_v13  ;;  %v737_v13 = vld [vmem:[#allocation7] ss:$0 sm:$0xff]  ;;  %v302_v36 = vld [vmem:[%s1343_s7 + $0x8] sm:$0xff] }
 0x122   :  { %v164_v40 = vmul.f32 0.5, %v163_v37  ;;  %v340_v37 = vld [vmem:[%s1343_s7 + $0x138] sm:$0xff] }
 0x123   :  { %v188_v41 = vmul.f32 %v735_v35, %v182_v39  ;;  %434 = vmatpush.msrb.mxu2 %v340_v37  ;;  %v338_v39 = vld [vmem:[%s1343_s7 + $0x128] sm:$0xff]  ;;  %v532_v37 = vld [vmem:[%s1344_s8 + $0x78] sm:$0xff] }
 0x124   :  { %v165_v42 = vsub.f32 1.5, %v164_v40  ;;  %v335_v40 = vld [vmem:[%s1343_s7 + $0x110] sm:$0xff] }
 0x125   :  { %v1035_v43 = vadd.f32 %v736_v38, %v188_v41  ;;  %v336_v41 = vld [vmem:[%s1343_s7 + $0x118] sm:$0xff]  ;;  %435 = vmatpush.msrb.mxu2 %v338_v39  ;;  %v530_v39 = vld [vmem:[%s1344_s8 + $0x68] sm:$0xff] }
 0x126   :  { %v166_v44 = vmul.f32 %v744_v32, %v165_v42  ;;  %v333_v42 = vld [vmem:[%s1343_s7 + $0x100] sm:$0xff] }
 0x127   :  { %218 = vmatpush.msra.mxu0 %v1035_v43  ;;  %721 = vmatpush.msra.mxu1 %v1035_v43 }
 0x128   :  { %v170_v45 = vsel %vm169_vm7, %v744_v32, %v166_v44  ;;  %v303_v32 = vld [vmem:[%s1343_s7 + $0x10] sm:$0xff]  ;;  %v334_v44 = vld [vmem:[%s1343_s7 + $0x108] sm:$0xff]  ;;  %436 = vmatpush.msrb.mxu2 %v336_v41 }
 0x129   :  { %v181_v46 = vmul.f32 %v170_v45, %v147_v18  ;;  %v311_v18 = vld [vmem:[%s1343_s7 + $0x50] sm:$0xff] }
 0x12a   :  { %363 = vmatpush.msra.mxu3 %v311_v18  ;;  %437 = vmatpush.msrb.mxu2 %v334_v44  ;;  %v529_v44 = vld [vmem:[%s1344_s8 + $0x60] sm:$0xff] }
 0x12b   :  { %v187_v47 = vmul.f32 %v735_v35, %v181_v46  ;;  %v339_v35 = vld [vmem:[%s1343_s7 + $0x130] sm:$0xff] }
 0x12c   :  { %364 = vmatpush.msra.mxu3 %v309_v22 }
 0x12d   :  { %v1039_v48 = vadd.f32 %v736_v38, %v187_v47  ;;  %v337_v38 = vld [vmem:[%s1343_s7 + $0x120] sm:$0xff] }
 0x12e   :  { %365 = vmatpush.msra.mxu3 %v307_v28  ;;  %v641_v28 = vld [vmem:[%s1346_s10 + $0x18] sm:$0xff] }
 0x12f   :  { %219 = vmatpush.msra.mxu0 %v1039_v48  ;;  %722 = vmatpush.msra.mxu1 %v1039_v48 }
 0x130   :  { %705 = vmatmul.msk.f32.vlgmr.msra.gmra.mxu0 %vm197_vm8, %v195_v49  ;;  %706 = vmatmul.msk.f32.vlgmr.msra.gmra.mxu1 %vm197_vm8, %v196_v50 }
 0x131   :  { %263 = vmatpush.msrb.mxu1 %v243_v51  ;;  %366 = vmatpush.msra.mxu3 %v305_v30 }
 0x132   :  { %388 = vmatpush.msrb.mxu0 %v339_v35 }
 0x133   :  { %264 = vmatpush.msrb.mxu1 %v241_v53  ;;  %367 = vmatpush.msra.mxu3 %v303_v32 }
 0x134   :  { %389 = vmatpush.msrb.mxu0 %v337_v38  ;;  %v531_v38 = vld [vmem:[%s1344_s8 + $0x70] sm:$0xff] }
 0x135   :  { %265 = vmatpush.msrb.mxu1 %v239_v55  ;;  %368 = vmatpush.msra.mxu3 %v301_v34  ;;  %v605_v55 = vld [vmem:[#allocation9 + $0x10] sm:$0xff] }
 0x136   :  { %390 = vmatpush.msrb.mxu0 %v335_v40 }
 0x137   :  { %266 = vmatpush.msrb.mxu1 %v237_v57  ;;  %v603_v57 = vld [vmem:[#allocation9] sm:$0xff] }
 0x138   :  { %391 = vmatpush.msrb.mxu0 %v333_v42 }
 0x139   :  { %399 = vmatpush.msra.mxu1 %v332_v60 }
 0x13a   :  { %533 = vmatpush.msra.mxu0 %v532_v37 }
 0x13b   :  { %400 = vmatpush.msra.mxu1 %v330_v62 }
 0x13c   :  { %534 = vmatpush.msra.mxu0 %v531_v38  ;;  %v556_v38 = vlaneseq }
 0x13d   :  { %401 = vmatpush.msra.mxu1 %v328_v0 }
 0x13e   :  { %535 = vmatpush.msra.mxu0 %v530_v39 }
 0x13f   :  { %402 = vmatpush.msra.mxu1 %v326_v2 }
 0x140   :  { %536 = vmatpush.msra.mxu0 %v529_v44  ;;  %v557_v44 = vand.u32 127, %v556_v38 }
 0x141   :  { %403 = vmatpush.msra.mxu1 %v324_v4 }
 0x142   :  { %vm558_vm15 = vcmp.ge.s32.totalorder %v557_v44, 96 }
 0x143   :  { %404 = vmatpush.msra.mxu1 %v322_v6 }
 0x145   :  { %405 = vmatpush.msra.mxu1 %v320_v8 }
 0x147   :  { %406 = vmatpush.msra.mxu1 %v318_v10 }
 0x149   :  { %407 = vmatpush.msra.mxu1 %v316_v12 }
 0x14b   :  { %408 = vmatpush.msra.mxu1 %v314_v15 }
 0x14d   :  { %409 = vmatpush.msra.mxu1 %v312_v19  ;;  %v645_v19 = vld [vmem:[%s1346_s10 + $0x38] sm:$0xff] }
 0x14e   :  { %660 = vmatpush.msrb.mxu3 %v645_v19 }
 0x14f   :  { %410 = vmatpush.msra.mxu1 %v310_v23  ;;  %v643_v23 = vld [vmem:[%s1346_s10 + $0x28] sm:$0xff] }
 0x151   :  { %411 = vmatpush.msra.mxu1 %v308_v29  ;;  %v640_v29 = vld [vmem:[%s1346_s10 + $0x10] sm:$0xff] }
 0x153   :  { %412 = vmatpush.msra.mxu1 %v306_v31  ;;  %v639_v31 = vld [vmem:[%s1346_s10 + $0x8] sm:$0xff] }
 0x155   :  { %413 = vmatpush.msra.mxu1 %v304_v33  ;;  %v638_v33 = vld [vmem:[%s1346_s10] sm:$0xff] }
 0x157   :  { %414 = vmatpush.msra.mxu1 %v302_v36 }
 0x1ad   :  { %v221_v16 = vpop.f32.mrf.mxu0  ;;  %v224_v20 = vpop.f32.mrf.mxu1 }
 0x1ae   :  { %v1128_v17 = vsub.f32 %v221_v16, %v1039_v48  ;;  %v1144_v24 = vsub.f32 %v224_v20, %v1035_v43  ;;  %v644_v20 = vld [vmem:[%s1346_s10 + $0x30] sm:$0xff] }
 0x1af   :  { %661 = vmatpush.msrb.mxu3 %v644_v20 }
 0x1b0   :  { %v233_v21 = vmul.f32 %v737_v13, %v1128_v17  ;;  %v234_v26 = vmul.f32 %v737_v13, %v1144_v24 }
 0x1b1   :  { %662 = vmatpush.msrb.mxu3 %v643_v23 }
 0x1b2   :  { %v235_v25 = vadd.f32 %v233_v21, %v1039_v48  ;;  %v236_v27 = vadd.f32 %v234_v26, %v1035_v43 }
 0x1b4   :  { %707 = vmatmul.msk.f32.vlgmr.msrb.gmra.mxu1 %vm131_vm0, %v235_v25  ;;  %709 = vmatmul.msk.f32.vlgmr.msra.gmra.mxu2 %vm131_vm0, %v235_v25  ;;  %v642_v25 = vld [vmem:[%s1346_s10 + $0x20] sm:$0xff] }
 0x1b5   :  { %625 = vmatpush.msra.mxu2 %v606_v54  ;;  %663 = vmatpush.msrb.mxu3 %v642_v25 }
 0x1b7   :  { %626 = vmatpush.msra.mxu2 %v605_v55  ;;  %664 = vmatpush.msrb.mxu3 %v641_v28  ;;  %v523_v55 = vld [vmem:[%s1344_s8 + $0x30] sm:$0xff] }
 0x1b9   :  { %627 = vmatpush.msra.mxu2 %v604_v56  ;;  %665 = vmatpush.msrb.mxu3 %v640_v29  ;;  %v522_v56 = vld [vmem:[%s1344_s8 + $0x28] sm:$0xff] }
 0x1bb   :  { %628 = vmatpush.msra.mxu2 %v603_v57  ;;  %666 = vmatpush.msrb.mxu3 %v639_v31 }
 0x1bc   :  { %708 = vmatmul.msk.f32.gmra.mxu1 %vm131_vm0, %v236_v27  ;;  %710 = vmatmul.msk.f32.gmra.mxu2 %vm131_vm0, %v236_v27 }
 0x1bd   :  { %667 = vmatpush.msrb.mxu3 %v638_v33 }
 0x231   :  { %v268_v45 = vpop.f32.mrf.mxu1 }
 0x232   :  { %745 = vtanh.f32 %v268_v45 }
 0x237   :  { %v291_v46 = vpop.f32.mrf.mxu2 }
 0x238   :  { %v746_v47 = vpop.eup %745  ;;  %747 = vtanh.f32 %v291_v46 }
 0x239   :  { %v271_v49 = vpop.f32.mrf.mxu1  ;;  %369 = vmatmul.f32.vlgmr.msra.gmra.mxu3 %v746_v47  ;;  %415 = vmatmul.f32.vlgmr.msra.gmra.mxu1 %v746_v47  ;;  %v528_v47 = vld [vmem:[%s1344_s8 + $0x58] sm:$0xff] }
 0x23a   :  { %749 = vtanh.f32 %v271_v49  ;;  %537 = vmatpush.msra.mxu0 %v528_v47 }
 0x23e   :  { %v748_v50 = vpop.eup %747 }
 0x23f   :  { %v294_v51 = vpop.f32.mrf.mxu2  ;;  %711 = vmatmul.msk.f32.vlgmr.msrb.gmra.mxu0 %vm131_vm0, %v748_v50  ;;  %713 = vmatmul.msk.f32.vlgmr.msrb.gmra.mxu2 %vm131_vm0, %v748_v50  ;;  %v527_v50 = vld [vmem:[%s1344_s8 + $0x50] sm:$0xff] }
 0x240   :  { %v750_v52 = vpop.eup %749  ;;  %751 = vtanh.f32 %v294_v51  ;;  %v526_v51 = vld [vmem:[%s1344_s8 + $0x48] sm:$0xff]  ;;  %538 = vmatpush.msra.mxu0 %v527_v50 }
 0x241   :  { %372 = vmatmul.f32.gmra.mxu3 %v750_v52  ;;  %418 = vmatmul.f32.gmra.mxu1 %v750_v52  ;;  %v525_v52 = vld [vmem:[%s1344_s8 + $0x40] sm:$0xff] }
 0x242   :  { %539 = vmatpush.msra.mxu0 %v526_v51 }
 0x244   :  { %540 = vmatpush.msra.mxu0 %v525_v52 }
 0x246   :  { %v752_v53 = vpop.eup %751 }
 0x247   :  { %712 = vmatmul.msk.f32.gmra.mxu0 %vm131_vm0, %v752_v53  ;;  %714 = vmatmul.msk.f32.gmra.mxu2 %vm131_vm0, %v752_v53  ;;  %v524_v53 = vld [vmem:[%s1344_s8 + $0x38] sm:$0xff] }
 0x248   :  { %541 = vmatpush.msra.mxu0 %v524_v53 }
 0x24a   :  { %542 = vmatpush.msra.mxu0 %v523_v55 }
 0x24c   :  { %543 = vmatpush.msra.mxu0 %v522_v56 }
 0x2b6   :  { %v416_v2 = vpop.f32.mrf.mxu1 }
 0x2b7   :  { %v417_v7 = vadd.f32 %v416_v2, %v344_v1 }
 0x2bc   :  { %v370_v60 = vpop.f32.mrf.mxu3  ;;  %v393_v61 = vpop.f32.mrf.mxu0 }
 0x2bd   :  { %v371_v62 = vadd.f32 %v370_v60, %v343_v59  ;;  %v521_v60 = vld [vmem:[%s1344_s8 + $0x20] sm:$0xff] }
 0x2be   :  { %v419_v27 = vpop.f32.mrf.mxu1  ;;  %544 = vmatpush.msra.mxu0 %v521_v60 }
 0x2bf   :  { %v394_v63 = vadd.f32 %v393_v61, %v371_v62  ;;  %v420_v32 = vadd.f32 %v419_v27, %v344_v1  ;;  %v520_v61 = vld [vmem:[%s1344_s8 + $0x18] sm:$0xff]  ;;  %v519_v62 = vld [vmem:[%s1344_s8 + $0x10] sm:$0xff] }
 0x2c0   :  { %545 = vmatpush.msra.mxu0 %v520_v61 }
 0x2c1   :  { %v445_v0 = vmul.f32 %v394_v63, %v1128_v17  ;;  %451 = vrot.lane.b32.xlu2 %v394_v63, %s934_s19 }
 0x2c2   :  { %v439_v5 = vpop.f32.mrf.mxu2  ;;  %546 = vmatpush.msra.mxu0 %v519_v62 }
 0x2c3   :  { %v447_v3 = vadd.f32 %v445_v0, %v1039_v48  ;;  %v440_v10 = vadd.f32 %v439_v5, %v417_v7  ;;  %v517_v0 = vld [vmem:[%s1344_s8] sm:$0xff] }
 0x2c4   :  { %v373_v4 = vpop.f32.mrf.mxu3  ;;  %v396_v8 = vpop.f32.mrf.mxu0 }
 0x2c5   :  { %v374_v6 = vadd.f32 %v373_v4, %v343_v59  ;;  %717 = vmatmul.msk.f32.vlgmr.msra.gmra.mxu2 %vm131_vm0, %v447_v3  ;;  %v481_v13 = vmul.f32 %v440_v10, %v1128_v17 }
 0x2c7   :  { %v397_v9 = vadd.f32 %v396_v8, %v374_v6  ;;  %v483_v14 = vadd.f32 %v481_v13, %v1039_v48 }
 0x2c9   :  { %461 = vrot.lane.b32.xlu2 %v394_v63, %s935_s5  ;;  %463 = vrot.lane.b32.xlu1 %v397_v9, %s935_s5  ;;  %v446_v11 = vmul.f32 %v397_v9, %v1144_v24 }
 0x2ca   :  { %453 = vrot.lane.b32.xlu0 %v397_v9, %s934_s19  ;;  %v442_v30 = vpop.f32.mrf.mxu2 }
 0x2cb   :  { %v448_v12 = vadd.f32 %v446_v11, %v1035_v43  ;;  %v443_v34 = vadd.f32 %v442_v30, %v420_v32 }
 0x2cd   :  { %718 = vmatmul.msk.f32.gmra.mxu2 %vm131_vm0, %v448_v12  ;;  %v482_v35 = vmul.f32 %v443_v34, %v1144_v24 }
 0x2cf   :  { %v484_v36 = vadd.f32 %v482_v35, %v1035_v43 }
 0x2d1   :  { %471 = vrot.lane.b32.xlu2 %v394_v63, %s936_s6  ;;  %v518_v63 = vld [vmem:[%s1344_s8 + $0x8] sm:$0xff] }
 0x2d2   :  { %503 = vrot.lane.b32.xlu0 %v483_v14, %s934_s19  ;;  %547 = vmatpush.msra.mxu0 %v518_v63 }
 0x2d4   :  { %548 = vmatpush.msra.mxu0 %v517_v0 }
 0x31b   :  { %v452_v15 = vpop.permute.xlu2 %451 }
 0x31c   :  { %v457_v16 = vmul.f32 %v452_v15, %v1128_v17 }
 0x31e   :  { %v459_v18 = vadd.f32 %v457_v16, %v1039_v48 }
 0x320   :  { %487 = vrot.lane.b32.xlu2 %v459_v18, %s936_s6  ;;  %v738_v18 = vld [vmem:[#allocation10] ss:$0 sm:$0xff] }
 0x323   :  { %v462_v21 = vpop.permute.xlu2 %461 }
 0x324   :  { %v467_v22 = vmul.f32 %v462_v21, %v1128_v17 }
 0x326   :  { %v469_v26 = vadd.f32 %v467_v22, %v1039_v48 }
 0x328   :  { %495 = vrot.lane.b32.xlu2 %v469_v26, %s935_s5 }
 0x32b   :  { %v472_v1 = vpop.permute.xlu2 %471 }
 0x32c   :  { %v477_v3 = vmul.f32 %v472_v1, %v1128_v17 }
 0x32e   :  { %v479_v4 = vadd.f32 %v477_v3, %v1039_v48 }
 0x330   :  { %473 = vrot.lane.b32.xlu2 %v397_v9, %s936_s6 }
 0x338   :  { %505 = vrot.lane.b32.xlu2 %v484_v36, %s934_s19 }
 0x33b   :  { %v464_v40 = vpop.permute.xlu1 %463 }
 0x33c   :  { %v468_v41 = vmul.f32 %v464_v40, %v1144_v24  ;;  %v454_v42 = vpop.permute.xlu0 %453 }
 0x33d   :  { %v458_v45 = vmul.f32 %v454_v42, %v1144_v24 }
 0x33e   :  { %v470_v46 = vadd.f32 %v468_v41, %v1035_v43 }
 0x33f   :  { %v460_v49 = vadd.f32 %v458_v45, %v1035_v43 }
 0x340   :  { %497 = vrot.lane.b32.xlu0 %v470_v46, %s935_s5 }
 0x341   :  { %489 = vrot.lane.b32.xlu1 %v460_v49, %s936_s6 }
 0x344   :  { %v504_v7 = vpop.permute.xlu0 %503 }
 0x348   :  { %v630_v54 = vpop.f32.mrf.mxu2 }
 0x349   :  { %753 = vtanh.f32 %v630_v54 }
 0x34f   :  { %v754_v57 = vpop.eup %753 }
 0x350   :  { %v633_v58 = vpop.f32.mrf.mxu2  ;;  %719 = vmatmul.msk.f32.vlgmr.msrb.gmra.mxu3 %vm511_vm9, %v754_v57 }
 0x351   :  { %755 = vtanh.f32 %v633_v58 }
 0x357   :  { %v756_v59 = vpop.eup %755 }
 0x358   :  { %720 = vmatmul.msk.f32.gmra.mxu3 %vm511_vm9, %v756_v59 }
 0x37a   :  { %v488_v2 = vpop.permute.xlu2 %487 }
 0x37b   :  { %v509_v5 = vsel %vm131_vm0, %v479_v4, %v488_v2 }
 0x382   :  { %v496_v6 = vpop.permute.xlu2 %495 }
 0x383   :  { %v512_v8 = vsel %vm511_vm9, %v509_v5, %v496_v6 }
 0x384   :  { %v515_v9 = vsel %vm514_vm10, %v512_v8, %v504_v7 }
 0x385   :  { %549 = vmatmul.f32.vlgmr.msra.gmra.mxu0 %v515_v9 }
 0x38a   :  { %v474_v10 = vpop.permute.xlu2 %473 }
 0x38b   :  { %v478_v11 = vmul.f32 %v474_v10, %v1144_v24 }
 0x38d   :  { %v480_v12 = vadd.f32 %v478_v11, %v1035_v43 }
 0x392   :  { %v506_v15 = vpop.permute.xlu2 %505 }
 0x3b2   :  { %v498_v13 = vpop.permute.xlu0 %497 }
 0x3b3   :  { %v490_v14 = vpop.permute.xlu1 %489 }
 0x3b4   :  { %v510_v17 = vsel %vm131_vm0, %v480_v12, %v490_v14 }
 0x3b5   :  { %v513_v48 = vsel %vm511_vm9, %v510_v17, %v498_v13 }
 0x3b6   :  { %v516_v16 = vsel %vm514_vm10, %v513_v48, %v506_v15 }
 0x3b7   :  { %552 = vmatmul.f32.gmra.mxu0 %v516_v16 }
 0x3d3   :  { %v669_v19 = vpop.f32.mrf.mxu3 }
 0x3d4   :  { %v679_v20 = vadd.f32 %v738_v18, %v669_v19 }
 0x3d6   :  { %v681_v21 = vmul.f32 1.442695, %v679_v20 }
 0x3d8   :  { %757 = vpow2.f32 %v681_v21 }
 0x3db   :  { %v672_v22 = vpop.f32.mrf.mxu3 }
 0x3dc   :  { %v680_v23 = vadd.f32 %v738_v18, %v672_v22 }
 0x3de   :  { %v758_v25 = vpop.eup %757  ;;  %v683_v24 = vmul.f32 1.442695, %v680_v23 }
 0x3df   :  { %v685_v26 = vsub.f32 0.0, %v758_v25 }
 0x3e0   :  { %759 = vpow2.f32 %v683_v24 }
 0x3e1   :  { %v687_v43 = vmul.f32 1.442695, %v685_v26 }
 0x3e3   :  { %761 = vpow2.f32 %v687_v43 }
 0x3e6   :  { %v760_v27 = vpop.eup %759 }
 0x3e7   :  { %v686_v28 = vsub.f32 0.0, %v760_v27 }
 0x3e9   :  { %v762_v29 = vpop.eup %761  ;;  %v689_v30 = vmul.f32 1.442695, %v686_v28 }
 0x3ea   :  { %691 = vst.msk [vmem:[%s1349_s13] sm:$0xff] %vm131_vm0, %v762_v29 }
 0x3eb   :  { %763 = vpow2.f32 %v689_v30 }
 0x3f1   :  { %v764_v31 = vpop.eup %763 }
 0x3f2   :  { %692 = vst.msk [vmem:[%s1349_s13 + $0x8] sm:$0xff] %vm131_vm0, %v764_v31 }
 0x402   :  { %v550_v32 = vpop.f32.mrf.mxu0 }
 0x403   :  { %v715_v33 = vmul.f32 -1.442695, %v550_v32 }
 0x405   :  { %765 = vpow2.f32 %v715_v33 }
 0x40b   :  { %v766_v34 = vpop.eup %765 }
 0x40c   :  { %v565_v35 = vadd.f32 1.0, %v766_v34 }
 0x40e   :  { %767 = vrcp.f32 %v565_v35  ;;  %v578_v40 = vand.u32 2147483648, %v565_v35  ;;  %v576_v42 = vand.u32 2147483647, %v565_v35  ;;  %vm572_vm12 = vweird.f32 %v565_v35 }
 0x410   :  { %v579_v46 = vor.u32 1.1754944e-38, %v578_v40  ;;  %vm577_vm14 = vcmp.eq.f32.partialorder %v576_v42, 8.507059e+37 }
 0x414   :  { %v768_v36 = vpop.eup %767 }
 0x415   :  { %v568_v37 = vmul.f32 %v768_v36, %v565_v35  ;;  %vm573_vm11 = vweird.f32 %v768_v36 }
 0x416   :  { %vm574_vm13 = vmor %vm572_vm12, %vm573_vm11 }
 0x417   :  { %v569_v39 = vsub.f32 1.0, %v568_v37 }
 0x419   :  { %v570_v41 = vmul.f32 %v768_v36, %v569_v39 }
 0x41b   :  { %v571_v45 = vadd.f32 %v768_v36, %v570_v41 }
 0x41d   :  { %v575_v47 = vsel %vm574_vm13, %v768_v36, %v571_v45 }
 0x41e   :  { %v580_v49 = vsel %vm577_vm14, %v579_v46, %v575_v47 }
 0x41f   :  { %v597_v50 = vmul.f32 %v580_v49, %v550_v32 }
 0x421   :  { %v599_v51 = vsel %vm558_vm15, %v597_v50, %v550_v32 }
 0x422   :  { %601 = vst [vmem:[%s1348_s12] sm:$0xff] %v599_v51 }
 0x434   :  { %v553_v52 = vpop.f32.mrf.mxu0 }
 0x435   :  { %v716_v53 = vmul.f32 -1.442695, %v553_v52 }
 0x437   :  { %769 = vpow2.f32 %v716_v53 }
 0x43d   :  { %v770_v54 = vpop.eup %769 }
 0x43e   :  { %v566_v55 = vadd.f32 1.0, %v770_v54 }
 0x440   :  { %771 = vrcp.f32 %v566_v55  ;;  %v593_v59 = vand.u32 2147483648, %v566_v55  ;;  %v591_v61 = vand.u32 2147483647, %v566_v55  ;;  %vm587_vm1 = vweird.f32 %v566_v55 }
 0x442   :  { %v594_v63 = vor.u32 1.1754944e-38, %v593_v59  ;;  %vm592_vm3 = vcmp.eq.f32.partialorder %v591_v61, 8.507059e+37 }
 0x446   :  { %v772_v56 = vpop.eup %771 }
 0x447   :  { %v583_v57 = vmul.f32 %v772_v56, %v566_v55  ;;  %vm588_vm0 = vweird.f32 %v772_v56 }
 0x448   :  { %vm589_vm2 = vmor %vm587_vm1, %vm588_vm0 }
 0x449   :  { %v584_v58 = vsub.f32 1.0, %v583_v57 }
 0x44b   :  { %v585_v60 = vmul.f32 %v772_v56, %v584_v58 }
 0x44d   :  { %v586_v62 = vadd.f32 %v772_v56, %v585_v60 }
 0x44f   :  { %v590_v0 = vsel %vm589_vm2, %v772_v56, %v586_v62 }
 0x450   :  { %v595_v1 = vsel %vm592_vm3, %v594_v63, %v590_v0 }
 0x451   :  { %v598_v2 = vmul.f32 %v595_v1, %v553_v52 }
 0x453   :  { %v600_v3 = vsel %vm558_vm15, %v598_v2, %v553_v52 }
 0x454   :  { %602 = vst [vmem:[%s1348_s12 + $0x8] sm:$0xff] %v600_v3 }
 0x455   :  { %701 = vsyncpa [#allocation3], 1 }
 0x456   :  { %702 = vsyncpa [#allocation5], 1 }
 0x457   :  { %703 = vsyncpa [#allocation8], 1 }
 0x458   :  { %704 = vsyncpa [#allocation11], 1 }

// kernel: rwkv_encoder_forward.14
= control target key start
LH: loop header
LB: loop body
LE: loop exit
PB: predicated region body
PF: predicated region fallthrough
CT: control target
= control target key end

     0   :  { %s518_s30 = smov 32   ;;  %vm58_vm0 = vcmask 261120   ;;  %v519_v60 = vmov 32.0   ;;  %vm273_vm14 = vcmask 130048   ;;  %s776_s3 = inlined_call_operand.vmem [shape: f32[32,32], index: 3, kind: input, shape index: {}]   ;;  %s777_s2 = inlined_call_operand.vmem [shape: f32[16,128], index: 2, kind: input, shape index: {}]   ;;  %s778_s1 = inlined_call_operand.vmem [shape: f32[16,32], index: 1, kind: input, shape index: {}]   ;;  %s779_s4 = inlined_call_operand.vmem [shape: f32[1,32], index: 4, kind: input, shape index: {}]   ;;  %s780_s5 = inlined_call_operand.vmem [shape: f32[1,32], index: 5, kind: input, shape index: {}]   ;;  %s781_s6 = inlined_call_operand.vmem [shape: f32[32,32], index: 6, kind: input, shape index: {}]   ;;  %s782_s0 = inlined_call_operand.vmem [shape: f32[16,32], index: 0, kind: input, shape index: {}]   ;;  %s783_s8 = inlined_call_operand.vmem [shape: f32[1,32], index: 8, kind: input, shape index: {}]   ;;  %s784_s9 = inlined_call_operand.vmem [shape: f32[1,32], index: 9, kind: input, shape index: {}]   ;;  %s785_s10 = inlined_call_operand.vmem [shape: f32[1,32], index: 10, kind: input, shape index: {}]   ;;  %s786_s11 = inlined_call_operand.vmem [shape: f32[1,32], index: 11, kind: input, shape index: {}]   ;;  %s787_s7 = inlined_call_operand.vmem [shape: f32[16,16], index: 7, kind: input, shape index: {}]   ;;  %s788_s12 = inlined_call_operand.vmem [shape: f32[32,128], index: 12, kind: input, shape index: {}]   ;;  %s789_s14 = inlined_call_operand.vmem [shape: f32[32,32], index: 14, kind: input, shape index: {}]   ;;  %s790_s13 = inlined_call_operand.vmem [shape: f32[128,32], index: 13, kind: input, shape index: {}]   ;;  %s791_s15 = inlined_call_operand.vmem [shape: f32[16,32], index: 15, kind: output, shape index: {}]  }
   0x1   :  { %v57_v0 = vld [vmem:[%s776_s3 + $0x18] sm:$0xff]  ;;  %v56_v1 = vld [vmem:[%s776_s3 + $0x10] sm:$0xff]  ;;  %v55_v2 = vld [vmem:[%s776_s3 + $0x8] sm:$0xff] }
   0x2   :  { %77 = vmatpush.msra.mxu2 %v57_v0  ;;  %108 = vmatpush.msra.mxu1 %v57_v0  ;;  %v161_v3 = vld [vmem:[%s777_s2] sm:$0xff]  ;;  %v162_v7 = vld [vmem:[%s777_s2 + $0x8] sm:$0xff]  ;;  %v176_v10 = vld [vmem:[%s781_s6 + $0x18] sm:$0xff] }
   0x3   :  { %v52_v4 = vld [vmem:[%s778_s1] sm:$0xff]  ;;  %165 = vrot.lane.b32.xlu0 %v161_v3, %s518_s30  ;;  %v53_v8 = vld [vmem:[%s778_s1 + $0x8] sm:$0xff]  ;;  %v175_v11 = vld [vmem:[%s781_s6 + $0x10] sm:$0xff] }
   0x4   :  { %78 = vmatpush.msra.mxu2 %v56_v1  ;;  %109 = vmatpush.msra.mxu1 %v56_v1  ;;  %v54_v5 = vld [vmem:[%s776_s3] sm:$0xff]  ;;  %v88_v6 = vmul.f32 %v52_v4, %v52_v4  ;;  %v89_v9 = vmul.f32 %v53_v8, %v53_v8  ;;  %v174_v12 = vld [vmem:[%s781_s6 + $0x8] sm:$0xff] }
   0x5   :  { %v173_v14 = vld [vmem:[%s781_s6] sm:$0xff]  ;;  %v51_v53 = vld [vmem:[%s782_s0 + $0x8] sm:$0xff] }
   0x6   :  { %79 = vmatpush.msra.mxu2 %v55_v2  ;;  %110 = vmatpush.msra.mxu1 %v55_v2  ;;  %v494_v33 = vld [vmem:[%s779_s4] ss:$0 sm:$0xff] }
   0x7   :  { %v495_v36 = vld [vmem:[%s780_s5] ss:$0 sm:$0xff] }
   0x8   :  { %80 = vmatpush.msra.mxu2 %v54_v5  ;;  %111 = vmatpush.msra.mxu1 %v54_v5  ;;  %v50_v57 = vld [vmem:[%s782_s0] sm:$0xff] }
   0x9   :  { %478 = vmatmul.msk.f32.vlgmr.msra.gmra.mxu2 %vm58_vm0, %v52_v4  ;;  %480 = vmatmul.msk.f32.vlgmr.msra.gmra.mxu1 %vm58_vm0, %v88_v6 }
   0xa   :  { %195 = vmatpush.msrb.mxu2 %v176_v10 }
   0xb   :  { %167 = vrot.lane.b32.xlu0 %v162_v7, %s518_s30 }
   0xc   :  { %196 = vmatpush.msrb.mxu2 %v175_v11 }
   0xe   :  { %197 = vmatpush.msrb.mxu2 %v174_v12 }
  0x10   :  { %198 = vmatpush.msrb.mxu2 %v173_v14 }
  0x11   :  { %479 = vmatmul.msk.f32.gmra.mxu2 %vm58_vm0, %v53_v8  ;;  %481 = vmatmul.msk.f32.gmra.mxu1 %vm58_vm0, %v89_v9 }
  0x75   :  { %v166_v39 = vpop.permute.xlu0 %165 }
  0x7d   :  { %v168_v49 = vpop.permute.xlu0 %167 }
  0x86   :  { %v113_v13 = vpop.f32.mrf.mxu1 }
  0x8c   :  { %v82_v15 = vpop.f32.mrf.mxu2 }
  0x8d   :  { %v119_v16 = vmul.f32 %v82_v15, %v82_v15  ;;  %v123_v32 = vsub.f32 %v52_v4, %v82_v15 }
  0x8e   :  { %v116_v20 = vpop.f32.mrf.mxu1 }
  0x8f   :  { %v121_v17 = vsub.f32 %v113_v13, %v119_v16 }
  0x91   :  { %v125_v18 = vadd.f32 0.00064, %v121_v17 }
  0x93   :  { %500 = vrsqrt.f32 %v125_v18  ;;  %vm133_vm2 = vweird.f32 %v125_v18 }
  0x94   :  { %v85_v19 = vpop.f32.mrf.mxu2 }
  0x95   :  { %v120_v21 = vmul.f32 %v85_v19, %v85_v19  ;;  %v124_v44 = vsub.f32 %v53_v8, %v85_v19 }
  0x97   :  { %v122_v22 = vsub.f32 %v116_v20, %v120_v21 }
  0x99   :  { %v501_v23 = vpop.eup %500  ;;  %v126_v24 = vadd.f32 0.00064, %v122_v22 }
  0x9a   :  { %v128_v25 = vmul.f32 %v501_v23, %v125_v18  ;;  %vm134_vm1 = vweird.f32 %v501_v23 }
  0x9b   :  { %502 = vrsqrt.f32 %v126_v24  ;;  %vm135_vm3 = vmor %vm133_vm2, %vm134_vm1  ;;  %vm143_vm5 = vweird.f32 %v126_v24 }
  0x9c   :  { %v129_v26 = vmul.f32 %v501_v23, %v128_v25  ;;  %504 = vrcp.f32 %v519_v60  ;;  %v366_v60 = vld [vmem:[%s790_s13 + $0x40] sm:$0xff] }
  0x9e   :  { %v130_v27 = vmul.f32 0.5, %v129_v26 }
  0xa0   :  { %v131_v28 = vsub.f32 1.5, %v130_v27  ;;  %v496_v27 = vld [vmem:[%s783_s8] ss:$0 sm:$0xff] }
  0xa1   :  { %v503_v29 = vpop.eup %502 }
  0xa2   :  { %v132_v30 = vmul.f32 %v501_v23, %v131_v28  ;;  %v138_v31 = vmul.f32 %v503_v29, %v126_v24  ;;  %vm144_vm4 = vweird.f32 %v503_v29  ;;  %v505_v61 = vpop.eup %504 }
  0xa3   :  { %vm145_vm6 = vmor %vm143_vm5, %vm144_vm4  ;;  %v215_v62 = vmul.f32 32.0, %v505_v61  ;;  %vm219_vm7 = vweird.f32 %v505_v61 }
  0xa4   :  { %v139_v34 = vmul.f32 %v503_v29, %v138_v31  ;;  %v136_v35 = vsel %vm135_vm3, %v501_v23, %v132_v30  ;;  %v497_v31 = vld [vmem:[%s784_s9] ss:$0 sm:$0xff] }
  0xa5   :  { %v147_v37 = vmul.f32 %v136_v35, %v123_v32  ;;  %v216_v63 = vsub.f32 1.0, %v215_v62  ;;  %v498_v62 = vld [vmem:[%s785_s10] ss:$0 sm:$0xff] }
  0xa6   :  { %v140_v38 = vmul.f32 0.5, %v139_v34 }
  0xa7   :  { %v153_v40 = vmul.f32 %v494_v33, %v147_v37  ;;  %v217_v0 = vmul.f32 %v505_v61, %v216_v63  ;;  %v499_v63 = vld [vmem:[%s786_s11] ss:$0 sm:$0xff] }
  0xa8   :  { %v141_v41 = vsub.f32 1.5, %v140_v38 }
  0xa9   :  { %v159_v42 = vadd.f32 %v495_v36, %v153_v40  ;;  %v218_v1 = vadd.f32 %v505_v61, %v217_v0  ;;  %v364_v0 = vld [vmem:[%s790_s13 + $0x30] sm:$0xff] }
  0xaa   :  { %v142_v43 = vmul.f32 %v503_v29, %v141_v41  ;;  %v271_v41 = vld [vmem:[%s787_s7] sm:$0xff] }
  0xab   :  { %v171_v45 = vmul.f32 %v166_v39, %v159_v42  ;;  %v220_v2 = vsel %vm219_vm7, %v505_v61, %v218_v1  ;;  %v324_v42 = vld [vmem:[%s788_s12 + $0x18] sm:$0xff] }
  0xac   :  { %v146_v46 = vsel %vm145_vm6, %v503_v29, %v142_v43  ;;  %v323_v43 = vld [vmem:[%s788_s12 + $0x10] sm:$0xff]  ;;  %v365_v61 = vld [vmem:[%s790_s13 + $0x38] sm:$0xff] }
  0xad   :  { %482 = vmatmul.msk.f32.vlgmr.msrb.gmra.mxu2 %vm58_vm0, %v171_v45  ;;  %v148_v47 = vmul.f32 %v146_v46, %v124_v44  ;;  %v322_v44 = vld [vmem:[%s788_s12 + $0x8] sm:$0xff]  ;;  %v400_v46 = vld [vmem:[%s789_s14 + $0x18] sm:$0xff] }
  0xae   :  { %v272_v45 = vld [vmem:[%s787_s7 + $0x8] sm:$0xff]  ;;  %419 = vmatpush.msrb.mxu1 %v400_v46 }
  0xaf   :  { %v154_v48 = vmul.f32 %v494_v33, %v148_v47  ;;  %v399_v47 = vld [vmem:[%s789_s14 + $0x10] sm:$0xff] }
  0xb0   :  { %420 = vmatpush.msrb.mxu1 %v399_v47 }
  0xb1   :  { %v160_v50 = vadd.f32 %v495_v36, %v154_v48  ;;  %v398_v48 = vld [vmem:[%s789_s14 + $0x8] sm:$0xff] }
  0xb2   :  { %421 = vmatpush.msrb.mxu1 %v398_v48 }
  0xb3   :  { %v172_v51 = vmul.f32 %v168_v49, %v160_v50  ;;  %v321_v49 = vld [vmem:[%s788_s12] sm:$0xff] }
  0xb4   :  { %v397_v50 = vld [vmem:[%s789_s14] sm:$0xff] }
  0xb5   :  { %483 = vmatmul.msk.f32.gmra.mxu2 %vm58_vm0, %v172_v51  ;;  %422 = vmatpush.msrb.mxu1 %v397_v50  ;;  %v373_v51 = vld [vmem:[%s790_s13 + $0x78] sm:$0xff] }
  0xb6   :  { %374 = vmatpush.msra.mxu0 %v373_v51 }
 0x130   :  { %v200_v52 = vpop.f32.mrf.mxu2 }
 0x131   :  { %v658_v58 = vadd.f32 %v200_v52, %v50_v57  ;;  %v372_v52 = vld [vmem:[%s790_s13 + $0x70] sm:$0xff] }
 0x132   :  { %375 = vmatpush.msra.mxu0 %v372_v52  ;;  %v368_v57 = vld [vmem:[%s790_s13 + $0x50] sm:$0xff] }
 0x133   :  { %v208_v59 = vsel %vm58_vm0, %v658_v58, 0.0 }
 0x138   :  { %v203_v54 = vpop.f32.mrf.mxu2 }
 0x139   :  { %v651_v55 = vadd.f32 %v203_v54, %v51_v53  ;;  %v371_v53 = vld [vmem:[%s790_s13 + $0x68] sm:$0xff]  ;;  %v370_v54 = vld [vmem:[%s790_s13 + $0x60] sm:$0xff] }
 0x13a   :  { %376 = vmatpush.msra.mxu0 %v371_v53 }
 0x13b   :  { %v211_v56 = vsel %vm58_vm0, %v651_v55, 0.0 }
 0x13c   :  { %212 = vadd.xlane.f32.xlu1 %v211_v56  ;;  %v369_v56 = vld [vmem:[%s790_s13 + $0x58] sm:$0xff]  ;;  %377 = vmatpush.msra.mxu0 %v370_v54 }
 0x13e   :  { %378 = vmatpush.msra.mxu0 %v369_v56 }
 0x140   :  { %379 = vmatpush.msra.mxu0 %v368_v57 }
 0x144   :  { %209 = vadd.xlane.f32.xlu1 %v208_v59  ;;  %v367_v59 = vld [vmem:[%s790_s13 + $0x48] sm:$0xff] }
 0x145   :  { %380 = vmatpush.msra.mxu0 %v367_v59 }
 0x147   :  { %381 = vmatpush.msra.mxu0 %v366_v60 }
 0x149   :  { %382 = vmatpush.msra.mxu0 %v365_v61 }
 0x14b   :  { %383 = vmatpush.msra.mxu0 %v364_v0 }
 0x1af   :  { %v213_v3 = vpop.xlane.xlu1 %212 }
 0x1b0   :  { %v222_v4 = vmul.f32 %v220_v2, %v213_v3  ;;  %v363_v3 = vld [vmem:[%s790_s13 + $0x28] sm:$0xff] }
 0x1b1   :  { %384 = vmatpush.msra.mxu0 %v363_v3 }
 0x1b2   :  { %v224_v5 = vsub.f32 %v651_v55, %v222_v4 }
 0x1b4   :  { %v226_v6 = vmul.f32 %v224_v5, %v224_v5 }
 0x1b6   :  { %v230_v7 = vsel %vm58_vm0, %v226_v6, 0.0 }
 0x1b7   :  { %231 = vadd.xlane.f32.xlu2 %v230_v7  ;;  %v210_v8 = vpop.xlane.xlu1 %209 }
 0x1b8   :  { %v221_v9 = vmul.f32 %v220_v2, %v210_v8 }
 0x1ba   :  { %v223_v10 = vsub.f32 %v658_v58, %v221_v9 }
 0x1bc   :  { %v225_v11 = vmul.f32 %v223_v10, %v223_v10 }
 0x1be   :  { %v227_v12 = vsel %vm58_vm0, %v225_v11, 0.0 }
 0x1bf   :  { %228 = vadd.xlane.f32.xlu2 %v227_v12 }
 0x22a   :  { %v232_v13 = vpop.xlane.xlu2 %231 }
 0x22b   :  { %v234_v14 = vmul.f32 %v232_v13, %v220_v2 }
 0x22d   :  { %v236_v15 = vadd.f32 1e-05, %v234_v14  ;;  %v362_v14 = vld [vmem:[%s790_s13 + $0x20] sm:$0xff] }
 0x22e   :  { %385 = vmatpush.msra.mxu0 %v362_v14 }
 0x22f   :  { %506 = vrsqrt.f32 %v236_v15  ;;  %vm253_vm9 = vweird.f32 %v236_v15 }
 0x232   :  { %v229_v16 = vpop.xlane.xlu2 %228 }
 0x233   :  { %v233_v17 = vmul.f32 %v229_v16, %v220_v2  ;;  %v360_v16 = vld [vmem:[%s790_s13 + $0x10] sm:$0xff] }
 0x235   :  { %v507_v18 = vpop.eup %506  ;;  %v235_v19 = vadd.f32 1e-05, %v233_v17  ;;  %v359_v17 = vld [vmem:[%s790_s13 + $0x8] sm:$0xff] }
 0x236   :  { %v248_v20 = vmul.f32 %v507_v18, %v236_v15  ;;  %vm254_vm8 = vweird.f32 %v507_v18  ;;  %v361_v15 = vld [vmem:[%s790_s13 + $0x18] sm:$0xff] }
 0x237   :  { %508 = vrsqrt.f32 %v235_v19  ;;  %vm255_vm10 = vmor %vm253_vm9, %vm254_vm8  ;;  %vm243_vm12 = vweird.f32 %v235_v19  ;;  %386 = vmatpush.msra.mxu0 %v361_v15 }
 0x238   :  { %v249_v21 = vmul.f32 %v507_v18, %v248_v20 }
 0x239   :  { %387 = vmatpush.msra.mxu0 %v360_v16 }
 0x23a   :  { %v250_v22 = vmul.f32 0.5, %v249_v21 }
 0x23b   :  { %388 = vmatpush.msra.mxu0 %v359_v17 }
 0x23c   :  { %v251_v23 = vsub.f32 1.5, %v250_v22 }
 0x23d   :  { %v509_v24 = vpop.eup %508 }
 0x23e   :  { %v252_v25 = vmul.f32 %v507_v18, %v251_v23  ;;  %v238_v26 = vmul.f32 %v509_v24, %v235_v19  ;;  %vm244_vm11 = vweird.f32 %v509_v24 }
 0x23f   :  { %vm245_vm13 = vmor %vm243_vm12, %vm244_vm11 }
 0x240   :  { %v256_v28 = vsel %vm255_vm10, %v507_v18, %v252_v25  ;;  %v239_v29 = vmul.f32 %v509_v24, %v238_v26  ;;  %v358_v18 = vld [vmem:[%s790_s13] sm:$0xff] }
 0x241   :  { %v258_v30 = vmul.f32 %v256_v28, %v224_v5  ;;  %389 = vmatpush.msra.mxu0 %v358_v18 }
 0x242   :  { %v240_v32 = vmul.f32 0.5, %v239_v29 }
 0x243   :  { %v264_v33 = vmul.f32 %v496_v27, %v258_v30 }
 0x244   :  { %v241_v34 = vsub.f32 1.5, %v240_v32 }
 0x245   :  { %v672_v35 = vadd.f32 %v497_v31, %v264_v33 }
 0x246   :  { %v242_v36 = vmul.f32 %v509_v24, %v241_v34 }
 0x247   :  { %294 = vmatpush.msra.mxu3 %v672_v35 }
 0x248   :  { %v246_v37 = vsel %vm245_vm13, %v509_v24, %v242_v36 }
 0x249   :  { %v257_v38 = vmul.f32 %v246_v37, %v223_v10 }
 0x24b   :  { %v263_v39 = vmul.f32 %v496_v27, %v257_v38 }
 0x24d   :  { %v269_v40 = vadd.f32 %v497_v31, %v263_v39 }
 0x24f   :  { %295 = vmatpush.msra.mxu3 %v269_v40 }
 0x250   :  { %484 = vmatmul.msk.f32.vlgmr.msra.gmra.mxu3 %vm273_vm14, %v271_v41 }
 0x251   :  { %343 = vmatpush.msrb.mxu3 %v324_v42 }
 0x253   :  { %344 = vmatpush.msrb.mxu3 %v323_v43 }
 0x255   :  { %345 = vmatpush.msrb.mxu3 %v322_v44 }
 0x257   :  { %346 = vmatpush.msrb.mxu3 %v321_v49 }
 0x258   :  { %485 = vmatmul.msk.f32.gmra.mxu3 %vm273_vm14, %v272_v45 }
 0x2d3   :  { %v297_v1 = vpop.f32.mrf.mxu3 }
 0x2d4   :  { %v303_v2 = vsub.f32 %v297_v1, %v269_v40 }
 0x2d6   :  { %v309_v4 = vmul.f32 %v498_v62, %v303_v2  ;;  %v317_v5 = vmul.f32 %v499_v63, %v303_v2 }
 0x2d8   :  { %v311_v6 = vadd.f32 %v309_v4, %v269_v40  ;;  %v319_v7 = vadd.f32 %v317_v5, %v269_v40 }
 0x2da   :  { %486 = vmatmul.msk.f32.vlgmr.msrb.gmra.mxu3 %vm58_vm0, %v311_v6  ;;  %488 = vmatmul.msk.f32.vlgmr.msrb.gmra.mxu1 %vm58_vm0, %v319_v7 }
 0x2db   :  { %v300_v8 = vpop.f32.mrf.mxu3 }
 0x2dc   :  { %v304_v9 = vsub.f32 %v300_v8, %v672_v35 }
 0x2de   :  { %v310_v10 = vmul.f32 %v498_v62, %v304_v9  ;;  %v318_v11 = vmul.f32 %v499_v63, %v304_v9 }
 0x2e0   :  { %v312_v12 = vadd.f32 %v310_v10, %v672_v35  ;;  %v320_v13 = vadd.f32 %v318_v11, %v672_v35 }
 0x2e2   :  { %487 = vmatmul.msk.f32.gmra.mxu3 %vm58_vm0, %v312_v12  ;;  %489 = vmatmul.msk.f32.gmra.mxu1 %vm58_vm0, %v320_v13 }
 0x357   :  { %v424_v25 = vpop.f32.mrf.mxu1 }
 0x358   :  { %v490_v26 = vmul.f32 -1.442695, %v424_v25 }
 0x35a   :  { %510 = vpow2.f32 %v490_v26 }
 0x35d   :  { %v348_v19 = vpop.f32.mrf.mxu3 }
 0x35e   :  { %v354_v20 = vmax.f32 %v348_v19, 0.0 }
 0x35f   :  { %v427_v27 = vpop.f32.mrf.mxu1 }
 0x360   :  { %v356_v21 = vmul.f32 %v354_v20, %v354_v20  ;;  %v491_v28 = vmul.f32 -1.442695, %v427_v27  ;;  %v511_v29 = vpop.eup %510 }
 0x361   :  { %v436_v30 = vadd.f32 1.0, %v511_v29 }
 0x362   :  { %390 = vmatmul.f32.vlgmr.msra.gmra.mxu0 %v356_v21  ;;  %512 = vpow2.f32 %v491_v28 }
 0x363   :  { %514 = vrcp.f32 %v436_v30  ;;  %v449_v41 = vand.u32 2147483648, %v436_v30  ;;  %vm443_vm1 = vweird.f32 %v436_v30  ;;  %v447_v42 = vand.u32 2147483647, %v436_v30 }
 0x365   :  { %v351_v22 = vpop.f32.mrf.mxu3  ;;  %v450_v45 = vor.u32 1.1754944e-38, %v449_v41  ;;  %vm448_vm3 = vcmp.eq.f32.partialorder %v447_v42, 8.507059e+37 }
 0x366   :  { %v355_v23 = vmax.f32 %v351_v22, 0.0 }
 0x368   :  { %v357_v24 = vmul.f32 %v355_v23, %v355_v23  ;;  %v513_v31 = vpop.eup %512 }
 0x369   :  { %v437_v32 = vadd.f32 1.0, %v513_v31  ;;  %v515_v33 = vpop.eup %514 }
 0x36a   :  { %393 = vmatmul.f32.gmra.mxu0 %v357_v24  ;;  %v439_v34 = vmul.f32 %v515_v33, %v436_v30  ;;  %vm444_vm15 = vweird.f32 %v515_v33 }
 0x36b   :  { %516 = vrcp.f32 %v437_v32  ;;  %vm445_vm2 = vmor %vm443_vm1, %vm444_vm15  ;;  %v464_v50 = vand.u32 2147483648, %v437_v32  ;;  %vm458_vm5 = vweird.f32 %v437_v32  ;;  %v462_v52 = vand.u32 2147483647, %v437_v32 }
 0x36c   :  { %v440_v35 = vsub.f32 1.0, %v439_v34 }
 0x36d   :  { %v465_v54 = vor.u32 1.1754944e-38, %v464_v50  ;;  %vm463_vm7 = vcmp.eq.f32.partialorder %v462_v52, 8.507059e+37 }
 0x36e   :  { %v441_v37 = vmul.f32 %v515_v33, %v440_v35 }
 0x370   :  { %v442_v39 = vadd.f32 %v515_v33, %v441_v37 }
 0x371   :  { %v517_v36 = vpop.eup %516 }
 0x372   :  { %v454_v38 = vmul.f32 %v517_v36, %v437_v32  ;;  %v446_v43 = vsel %vm445_vm2, %v515_v33, %v442_v39  ;;  %vm459_vm4 = vweird.f32 %v517_v36 }
 0x373   :  { %v451_v47 = vsel %vm448_vm3, %v450_v45, %v446_v43  ;;  %vm460_vm6 = vmor %vm458_vm5, %vm459_vm4 }
 0x374   :  { %v455_v40 = vsub.f32 1.0, %v454_v38 }
 0x376   :  { %v456_v44 = vmul.f32 %v517_v36, %v455_v40 }
 0x378   :  { %v457_v49 = vadd.f32 %v517_v36, %v456_v44 }
 0x37a   :  { %v461_v53 = vsel %vm460_vm6, %v517_v36, %v457_v49 }
 0x37b   :  { %v466_v57 = vsel %vm463_vm7, %v465_v54, %v461_v53 }
 0x3df   :  { %v391_v46 = vpop.f32.mrf.mxu0 }
 0x3e0   :  { %v468_v48 = vmul.f32 %v451_v47, %v391_v46 }
 0x3e2   :  { %v470_v51 = vadd.f32 %v468_v48, %v658_v58 }
 0x3e4   :  { %472 = vst.msk [vmem:[%s791_s15] sm:$0xff] %vm58_vm0, %v470_v51 }
 0x3e7   :  { %v394_v56 = vpop.f32.mrf.mxu0 }
 0x3e8   :  { %v469_v59 = vmul.f32 %v466_v57, %v394_v56 }
 0x3ea   :  { %v471_v60 = vadd.f32 %v469_v59, %v651_v55 }
 0x3ec   :  { %473 = vst.msk [vmem:[%s791_s15 + $0x8] sm:$0xff] %vm58_vm0, %v471_v60 }

</bundles_post_ra>
